<compile_context>
chip_gen: v6e
topology: v6e:2x2x1
jax: 0.10.0
libtpu: 0.0.40
codegen_flags: <defaults>
</compile_context>

<pallas_src>
import functools
import math

import jax
import jax.numpy as jnp
from jax import lax
from jax.experimental import pallas as pl
from jax.experimental.pallas import tpu as pltpu


_MASK_VALUE = -1e30  # large finite negative: avoids exp(-inf - -inf) NaNs


def _flash_fwd_kernel(q_ref, k_ref, v_ref, o_ref, m_sc, l_sc, acc_sc, *,
                      scale, causal, tq, tk, g, d):
    """One (batch, head-group, q-tile, kv-tile) online-softmax step.

    q_ref: (1, tq, g*d); k_ref/v_ref: (1, tk, g*d); o_ref: (1, tq, g*d).
    Scratch: m_sc/l_sc (g, tq, 1) f32, acc_sc (tq, g*d) f32.
    """
    qi = pl.program_id(2)
    ki = pl.program_id(3)

    @pl.when(ki == 0)
    def _():
        m_sc[...] = jnp.full(m_sc.shape, _MASK_VALUE, m_sc.dtype)
        l_sc[...] = jnp.zeros(l_sc.shape, l_sc.dtype)
        acc_sc[...] = jnp.zeros(acc_sc.shape, acc_sc.dtype)

    def compute_block(masked):
        # Fold softmax scale into q: tq*g*d muls instead of tq*tk per head.
        q = q_ref[0] * scale                     # (tq, g*d) bf16
        k = k_ref[0]                             # (tk, g*d)
        v = v_ref[0]                             # (tk, g*d)

        if masked:
            row = qi * tq + lax.broadcasted_iota(jnp.int32, (tq, tk), 0)
            col = ki * tk + lax.broadcasted_iota(jnp.int32, (tq, tk), 1)
            mask = col <= row

        for h in range(g):                       # small static unroll (g <= 8)
            sl = slice(h * d, (h + 1) * d)
            qh = q[:, sl]                        # (tq, d)
            kh = k[:, sl]                        # (tk, d)
            vh = v[:, sl]                        # (tk, d)

            # QK^T contracting last dims (no transpose); bf16 MXU, f32 accum.
            s = lax.dot_general(qh, kh, (((1,), (1,)), ((), ())),
                                preferred_element_type=jnp.float32)  # (tq, tk)
            if masked:
                s = jnp.where(mask, s, _MASK_VALUE)

            m_prev = m_sc[h]                                        # (tq, 1)
            m_new = jnp.maximum(m_prev, s.max(axis=-1, keepdims=True))
            alpha = jnp.exp(m_prev - m_new)
            p = jnp.exp(s - m_new)                                  # (tq, tk) f32

            l_sc[h] = alpha * l_sc[h] + p.sum(axis=-1, keepdims=True)
            m_sc[h] = m_new
            acc_sc[:, sl] = alpha * acc_sc[:, sl] + jnp.dot(
                p.astype(v.dtype), vh, preferred_element_type=jnp.float32)

    if causal:
        q_start = qi * tq
        k_start = ki * tk
        needed = k_start <= q_start + (tq - 1)          # not fully masked
        fully_visible = k_start + (tk - 1) <= q_start   # no mask needed

        @pl.when(fully_visible)
        def _():
            compute_block(False)

        @pl.when(jnp.logical_and(needed, jnp.logical_not(fully_visible)))
        def _():
            compute_block(True)
    else:
        compute_block(False)

    @pl.when(ki == pl.num_programs(3) - 1)
    def _():
        for h in range(g):
            sl = slice(h * d, (h + 1) * d)
            inv = pl.reciprocal(l_sc[h], approx=True)               # (tq, 1)
            o_ref[0, :, sl] = (acc_sc[:, sl] * inv).astype(o_ref.dtype)


def _pick_tile(s, target):
    """Largest divisor of s <= target that is a multiple of 16 (then 8), else s."""
    t = min(target, s)
    for align in (16, 8):
        c = (t // align) * align
        while c >= align:
            if s % c == 0:
                return c
            c -= align
    return s  # full-extent block is always a legal block shape


def _vmem_limit_bytes(tq, tk, lane_w, itemsize, g, d):
    blocks = (tq + tk + tk + tq) * lane_w * itemsize          # q, k, v, o blocks
    pipelined = 2 * blocks                                    # double buffering
    scratch = (2 * g * tq * 128 + tq * g * d) * 4             # m, l (lane-padded), acc
    need = pipelined + scratch + (4 << 20)
    return int(min(max(need, 32 << 20), 48 << 20))            # fits v7x's 64 MiB


def _flash_packed(packed, *, H, D, G, scale, causal, tq, tk):
    """packed: (B, S, 3*H*D) view (no HBM copy). Returns (B, S, H*D)."""
    B, S, _ = packed.shape
    lane_w = G * D
    ngrp = H // G
    nq, nk = S // tq, S // tk

    if causal:
        def kv_block(i, j):  # clamp so fully-masked steps repeat a block -> DMA elided
            return jnp.minimum(j, (i * tq + (tq - 1)) // tk)
    else:
        def kv_block(i, j):
            return j

    kernel = functools.partial(_flash_fwd_kernel, scale=scale, causal=causal,
                               tq=tq, tk=tk, g=G, d=D)
    limit = _vmem_limit_bytes(tq, tk, lane_w, packed.dtype.itemsize, G, D)

    return pl.pallas_call(
        kernel,
        out_shape=jax.ShapeDtypeStruct((B, S, H * D), packed.dtype),
        grid_spec=pltpu.PrefetchScalarGridSpec(
            num_scalar_prefetch=0,
            grid=(B, ngrp, nq, nk),
            in_specs=[
                pl.BlockSpec((1, tq, lane_w),
                             lambda b, g, i, j: (b, i, g)),                    # q lanes
                pl.BlockSpec((1, tk, lane_w),
                             lambda b, g, i, j: (b, kv_block(i, j), ngrp + g)),      # k
                pl.BlockSpec((1, tk, lane_w),
                             lambda b, g, i, j: (b, kv_block(i, j), 2 * ngrp + g)),  # v
            ],
            out_specs=pl.BlockSpec((1, tq, lane_w), lambda b, g, i, j: (b, i, g)),
            scratch_shapes=[
                pltpu.VMEM((G, tq, 1), jnp.float32),      # running max
                pltpu.VMEM((G, tq, 1), jnp.float32),      # running denom
                pltpu.VMEM((tq, lane_w), jnp.float32),    # output accumulator
            ],
        ),
        compiler_params=pltpu.CompilerParams(
            dimension_semantics=("parallel", "parallel", "parallel", "arbitrary"),
            vmem_limit_bytes=limit),
    )(packed, packed, packed)


def _flash_bhsd(q, k, v, *, scale, causal, tq, tk):
    """Fallback for odd head dims: q/k/v (B*H, S, D). Returns (B*H, S, D)."""
    BH, S, D = q.shape
    nq, nk = S // tq, S // tk

    if causal:
        def kv_block(i, j):
            return jnp.minimum(j, (i * tq + (tq - 1)) // tk)
    else:
        def kv_block(i, j):
            return j

    kernel = functools.partial(_flash_fwd_kernel, scale=scale, causal=causal,
                               tq=tq, tk=tk, g=1, d=D)
    limit = _vmem_limit_bytes(tq, tk, D, q.dtype.itemsize, 1, D)

    return pl.pallas_call(
        kernel,
        out_shape=jax.ShapeDtypeStruct((BH, S, D), q.dtype),
        grid_spec=pltpu.PrefetchScalarGridSpec(
            num_scalar_prefetch=0,
            grid=(BH, 1, nq, nk),
            in_specs=[
                pl.BlockSpec((1, tq, D), lambda b, g, i, j: (b, i, 0)),
                pl.BlockSpec((1, tk, D), lambda b, g, i, j: (b, kv_block(i, j), 0)),
                pl.BlockSpec((1, tk, D), lambda b, g, i, j: (b, kv_block(i, j), 0)),
            ],
            out_specs=pl.BlockSpec((1, tq, D), lambda b, g, i, j: (b, i, 0)),
            scratch_shapes=[
                pltpu.VMEM((1, tq, 1), jnp.float32),
                pltpu.VMEM((1, tq, 1), jnp.float32),
                pltpu.VMEM((tq, D), jnp.float32),
            ],
        ),
        compiler_params=pltpu.CompilerParams(
            dimension_semantics=("parallel", "parallel", "parallel", "arbitrary"),
            vmem_limit_bytes=limit),
    )(q, k, v)


class FlashAttention:
    """JAX/Pallas port of the PyTorch FlashAttention module (dense eval path)."""

    def __init__(self, softmax_scale=None, attention_dropout=0.0):
        self.softmax_scale = softmax_scale
        self.dropout_p = attention_dropout  # TODO(synk): dropout ignored (eval path only)

    def __call__(self, qkv, key_padding_mask=None, causal=False,
                 cu_seqlens=None, max_s=None, need_weights=False):
        assert not need_weights
        # TODO(synk): key_padding_mask / cu_seqlens (varlen) paths not ported.
        assert key_padding_mask is None and cu_seqlens is None
        assert qkv.dtype in (jnp.float16, jnp.bfloat16)

        orig_dtype = qkv.dtype
        if qkv.dtype == jnp.float16:
            # TPU MXU is bf16-native; compute in bf16, cast the output back.
            qkv = qkv.astype(jnp.bfloat16)

        B, S, three, H, D = qkv.shape
        assert three == 3
        scale = (self.softmax_scale if self.softmax_scale is not None
                 else 1.0 / math.sqrt(D))

        tq = _pick_tile(S, 256)
        tk = _pick_tile(S, 128)
        HD = H * D

        if D % 128 == 0:
            G = 1                      # one head per grid step, lane-dense D block
        elif (128 % D == 0) and (HD % 128 == 0):
            G = 128 // D               # pack G heads into one 128-lane block
        else:
            G = None

        if G is not None:
            packed = qkv.reshape(B, S, 3 * HD)   # free reshape, no HBM transpose
            out = _flash_packed(packed, H=H, D=D, G=G, scale=scale,
                                causal=causal, tq=tq, tk=tk)
            out = out.reshape(B, S, H, D)
        else:
            # TODO(synk): rare head dims pay three HBM transposes here; could be
            # read via a 5-D BlockSpec with head on the grid instead.
            q = jnp.transpose(qkv[:, :, 0], (0, 2, 1, 3)).reshape(B * H, S, D)
            k = jnp.transpose(qkv[:, :, 1], (0, 2, 1, 3)).reshape(B * H, S, D)
            v = jnp.transpose(qkv[:, :, 2], (0, 2, 1, 3)).reshape(B * H, S, D)
            out = _flash_bhsd(q, k, v, scale=scale, causal=causal, tq=tq, tk=tk)
            out = out.reshape(B, H, S, D).transpose(0, 2, 1, 3)

        return out.astype(orig_dtype), None


def _reference_attention(qkv, scale, causal):
    """Plain JAX reference for verification."""
    q = qkv[:, :, 0].astype(jnp.float32)   # (B, S, H, D)
    k = qkv[:, :, 1].astype(jnp.float32)
    v = qkv[:, :, 2].astype(jnp.float32)
    s = jnp.einsum("bqhd,bkhd->bhqk", q, k) * scale
    if causal:
        S = q.shape[1]
        mask = jnp.tril(jnp.ones((S, S), dtype=bool))
        s = jnp.where(mask[None, None], s, -jnp.inf)
    p = jax.nn.softmax(s, axis=-1)
    return jnp.einsum("bhqk,bkhd->bqhd", p, v)


def _check(attn, qkv, causal, tol=5e-2):
    B, S, _, H, D = qkv.shape
    out, weights = attn(qkv, causal=causal)
    out = jax.block_until_ready(out)
    assert weights is None
    assert out.shape == (B, S, H, D) and out.dtype == qkv.dtype
    ref = _reference_attention(qkv, scale=1.0 / math.sqrt(D), causal=causal)
    err = float(jnp.max(jnp.abs(out.astype(jnp.float32) - ref)))
    assert err < tol, f"max abs err {err} (causal={causal}, shape={qkv.shape})"


if __name__ == "__main__":
    key = jax.random.PRNGKey(0)
    k1, k2, k3 = jax.random.split(key, 3)
    attn = FlashAttention()

    # Grouped-head lane-dense path: D=32 -> 4 heads per 128-lane block.
    qkv = jax.random.normal(k1, (2, 128, 3, 4, 32), jnp.float32).astype(jnp.bfloat16)
    _check(attn, qkv, causal=False)
    _check(attn, qkv, causal=True)

    # Multi-tile causal: exercises unmasked / masked / DMA-elided KV blocks.
    qkv2 = jax.random.normal(k2, (1, 512, 3, 4, 32), jnp.float32).astype(jnp.bfloat16)
    _check(attn, qkv2, causal=True)

    # Per-head lane-dense path (D % 128 == 0).
    qkv3 = jax.random.normal(k3, (1, 256, 3, 2, 128), jnp.float32).astype(jnp.bfloat16)
    _check(attn, qkv3, causal=False)

    print("KERNEL_OK")
</pallas_src>

<mosaic_0001>
module attributes {stable_mosaic.version = 11 : i64} {
  func.func @_flash_fwd_kernel(%arg0: i32, %arg1: i32, %arg2: i32, %arg3: i32, %arg4: memref<1x128x128xbf16, #tpu.memory_space<vmem>>, %arg5: memref<1x128x128xbf16, #tpu.memory_space<vmem>>, %arg6: memref<1x128x128xbf16, #tpu.memory_space<vmem>>, %arg7: memref<1x128x128xbf16, #tpu.memory_space<vmem>>, %arg8: memref<4x128x1xf32, #tpu.memory_space<vmem>>, %arg9: memref<4x128x1xf32, #tpu.memory_space<vmem>>, %arg10: memref<128x128xf32, #tpu.memory_space<vmem>>) attributes {dimension_semantics = [#tpu.dimension_semantics<parallel>, #tpu.dimension_semantics<parallel>, #tpu.dimension_semantics<parallel>, #tpu.dimension_semantics<arbitrary>], iteration_bounds = array<i64: 2, 1, 1, 1>, scalar_prefetch = 0 : i64, scratch_operands = 3 : i64, tpu.core_type = #tpu.core_type<tc>, window_params = [{transform_indices = @transform_0, window_bounds = array<i64: 1, 128, 128>}, {transform_indices = @transform_1, window_bounds = array<i64: 1, 128, 128>}, {transform_indices = @transform_2, window_bounds = array<i64: 1, 128, 128>}, {transform_indices = @transform_3, window_bounds = array<i64: 1, 128, 128>}]} {
    %c0_i32 = arith.constant 0 : i32
    %0 = arith.cmpi eq, %arg3, %c0_i32 : i32
    %1 = arith.extui %0 : i1 to i32
    %c0_i32_0 = arith.constant 0 : i32
    %2 = arith.cmpi ne, %1, %c0_i32_0 : i32
    scf.if %2 {
      %cst_85 = arith.constant -1.000000e+30 : f32
      %146 = vector.broadcast %cst_85 : f32 to vector<4x128x1xf32>
      %c0_86 = arith.constant 0 : index
      %c0_87 = arith.constant 0 : index
      %c0_88 = arith.constant 0 : index
      %147 = vector.load %arg8[%c0_86, %c0_87, %c0_88] : memref<4x128x1xf32, #tpu.memory_space<vmem>>, vector<4x128x1xf32>
      tpu.vector_store %arg8[%c0_86, %c0_87, %c0_88], %146 {strides = array<i32>} : memref<4x128x1xf32, #tpu.memory_space<vmem>>, vector<4x128x1xf32>,
      %cst_89 = arith.constant 0.000000e+00 : f32
      %148 = vector.broadcast %cst_89 : f32 to vector<4x128x1xf32>
      %c0_90 = arith.constant 0 : index
      %c0_91 = arith.constant 0 : index
      %c0_92 = arith.constant 0 : index
      %149 = vector.load %arg9[%c0_90, %c0_91, %c0_92] : memref<4x128x1xf32, #tpu.memory_space<vmem>>, vector<4x128x1xf32>
      tpu.vector_store %arg9[%c0_90, %c0_91, %c0_92], %148 {strides = array<i32>} : memref<4x128x1xf32, #tpu.memory_space<vmem>>, vector<4x128x1xf32>,
      %cst_93 = arith.constant 0.000000e+00 : f32
      %150 = vector.broadcast %cst_93 : f32 to vector<128x128xf32>
      %c0_94 = arith.constant 0 : index
      %c0_95 = arith.constant 0 : index
      %151 = vector.load %arg10[%c0_94, %c0_95] : memref<128x128xf32, #tpu.memory_space<vmem>>, vector<128x128xf32>
      tpu.vector_store %arg10[%c0_94, %c0_95], %150 {strides = array<i32>} : memref<128x128xf32, #tpu.memory_space<vmem>>, vector<128x128xf32>,
    } else {
    }
    %c0 = arith.constant 0 : index
    %c0_1 = arith.constant 0 : index
    %c0_2 = arith.constant 0 : index
    %3 = vector.load %arg4[%c0, %c0_1, %c0_2] : memref<1x128x128xbf16, #tpu.memory_space<vmem>>, vector<1x128x128xbf16>
    %4 = vector.shape_cast %3 : vector<1x128x128xbf16> to vector<128x128xbf16>
    %cst = arith.constant 1.767580e-01 : bf16
    %5 = vector.broadcast %cst : bf16 to vector<128x128xbf16>
    %6 = arith.mulf %4, %5 : vector<128x128xbf16>
    %c0_3 = arith.constant 0 : index
    %c0_4 = arith.constant 0 : index
    %c0_5 = arith.constant 0 : index
    %7 = vector.load %arg5[%c0_3, %c0_4, %c0_5] : memref<1x128x128xbf16, #tpu.memory_space<vmem>>, vector<1x128x128xbf16>
    %8 = vector.shape_cast %7 : vector<1x128x128xbf16> to vector<128x128xbf16>
    %c0_6 = arith.constant 0 : index
    %c0_7 = arith.constant 0 : index
    %c0_8 = arith.constant 0 : index
    %9 = vector.load %arg6[%c0_6, %c0_7, %c0_8] : memref<1x128x128xbf16, #tpu.memory_space<vmem>>, vector<1x128x128xbf16>
    %10 = vector.shape_cast %9 : vector<1x128x128xbf16> to vector<128x128xbf16>
    %11 = vector.extract_strided_slice %6 {offsets = [0, 0], sizes = [128, 32], strides = [1, 1]} : vector<128x128xbf16> to vector<128x32xbf16>
    %12 = vector.extract_strided_slice %8 {offsets = [0, 0], sizes = [128, 32], strides = [1, 1]} : vector<128x128xbf16> to vector<128x32xbf16>
    %13 = vector.extract_strided_slice %10 {offsets = [0, 0], sizes = [128, 32], strides = [1, 1]} : vector<128x128xbf16> to vector<128x32xbf16>
    %cst_9 = arith.constant dense<0.000000e+00> : vector<128x128xf32>
    %14 = tpu.matmul %11, %12, %cst_9 {dimension_numbers = #tpu.dot_dimension_numbers<[1], [1], [0], [0], [0, 0, 1, 0], [], []>} : vector<128x32xbf16>, vector<128x32xbf16>, vector<128x128xf32> -> vector<128x128xf32>
    %c0_10 = arith.constant 0 : index
    %c0_11 = arith.constant 0 : index
    %c0_12 = arith.constant 0 : index
    %15 = vector.load %arg8[%c0_10, %c0_11, %c0_12] : memref<4x128x1xf32, #tpu.memory_space<vmem>>, vector<1x128x1xf32>
    %16 = vector.shape_cast %15 : vector<1x128x1xf32> to vector<128x1xf32>
    %cst_13 = arith.constant dense<0xFF800000> : vector<128xf32>
    %17 = vector.multi_reduction <maximumf>, %14, %cst_13 [1] : vector<128x128xf32> to vector<128xf32>
    %18 = vector.shape_cast %17 : vector<128xf32> to vector<128x1xf32>
    %19 = arith.maximumf %16, %18 : vector<128x1xf32>
    %20 = arith.subf %16, %19 : vector<128x1xf32>
    %21 = math.exp %20 : vector<128x1xf32>
    %22 = vector.broadcast %19 : vector<128x1xf32> to vector<128x128xf32>
    %23 = arith.subf %14, %22 : vector<128x128xf32>
    %24 = math.exp %23 : vector<128x128xf32>
    %c0_14 = arith.constant 0 : index
    %c0_15 = arith.constant 0 : index
    %c0_16 = arith.constant 0 : index
    %25 = vector.load %arg9[%c0_14, %c0_15, %c0_16] : memref<4x128x1xf32, #tpu.memory_space<vmem>>, vector<1x128x1xf32>
    %26 = vector.shape_cast %25 : vector<1x128x1xf32> to vector<128x1xf32>
    %27 = arith.mulf %21, %26 : vector<128x1xf32>
    %cst_17 = arith.constant dense<0.000000e+00> : vector<128xf32>
    %28 = vector.multi_reduction <add>, %24, %cst_17 [1] : vector<128x128xf32> to vector<128xf32>
    %29 = vector.shape_cast %28 : vector<128xf32> to vector<128x1xf32>
    %30 = arith.addf %27, %29 : vector<128x1xf32>
    %c0_18 = arith.constant 0 : index
    %c0_19 = arith.constant 0 : index
    %c0_20 = arith.constant 0 : index
    %31 = vector.load %arg9[%c0_18, %c0_19, %c0_20] : memref<4x128x1xf32, #tpu.memory_space<vmem>>, vector<1x128x1xf32>
    %32 = vector.shape_cast %31 : vector<1x128x1xf32> to vector<128x1xf32>
    %33 = vector.shape_cast %30 : vector<128x1xf32> to vector<1x128x1xf32>
    tpu.vector_store %arg9[%c0_18, %c0_19, %c0_20], %33 {strides = array<i32>} : memref<4x128x1xf32, #tpu.memory_space<vmem>>, vector<1x128x1xf32>,
    %c0_21 = arith.constant 0 : index
    %c0_22 = arith.constant 0 : index
    %c0_23 = arith.constant 0 : index
    %34 = vector.load %arg8[%c0_21, %c0_22, %c0_23] : memref<4x128x1xf32, #tpu.memory_space<vmem>>, vector<1x128x1xf32>
    %35 = vector.shape_cast %34 : vector<1x128x1xf32> to vector<128x1xf32>
    %36 = vector.shape_cast %19 : vector<128x1xf32> to vector<1x128x1xf32>
    tpu.vector_store %arg8[%c0_21, %c0_22, %c0_23], %36 {strides = array<i32>} : memref<4x128x1xf32, #tpu.memory_space<vmem>>, vector<1x128x1xf32>,
    %c0_24 = arith.constant 0 : index
    %c0_25 = arith.constant 0 : index
    %37 = vector.load %arg10[%c0_24, %c0_25] : memref<128x128xf32, #tpu.memory_space<vmem>>, vector<128x32xf32>
    %38 = vector.broadcast %21 : vector<128x1xf32> to vector<128x32xf32>
    %39 = arith.mulf %38, %37 : vector<128x32xf32>
    %40 = arith.truncf %24 : vector<128x128xf32> to vector<128x128xbf16>
    %cst_26 = arith.constant dense<0.000000e+00> : vector<128x32xf32>
    %41 = tpu.matmul %40, %13, %cst_26 {dimension_numbers = #tpu.dot_dimension_numbers<[1], [0], [0], [1], [0, 0, 1, 1], [], []>} : vector<128x128xbf16>, vector<128x32xbf16>, vector<128x32xf32> -> vector<128x32xf32>
    %42 = arith.addf %39, %41 : vector<128x32xf32>
    %c0_27 = arith.constant 0 : index
    %c0_28 = arith.constant 0 : index
    %43 = vector.load %arg10[%c0_27, %c0_28] : memref<128x128xf32, #tpu.memory_space<vmem>>, vector<128x32xf32>
    tpu.vector_store %arg10[%c0_27, %c0_28], %42 {strides = array<i32>} : memref<128x128xf32, #tpu.memory_space<vmem>>, vector<128x32xf32>,
    %44 = vector.extract_strided_slice %6 {offsets = [0, 32], sizes = [128, 32], strides = [1, 1]} : vector<128x128xbf16> to vector<128x32xbf16>
    %45 = vector.extract_strided_slice %8 {offsets = [0, 32], sizes = [128, 32], strides = [1, 1]} : vector<128x128xbf16> to vector<128x32xbf16>
    %46 = vector.extract_strided_slice %10 {offsets = [0, 32], sizes = [128, 32], strides = [1, 1]} : vector<128x128xbf16> to vector<128x32xbf16>
    %cst_29 = arith.constant dense<0.000000e+00> : vector<128x128xf32>
    %47 = tpu.matmul %44, %45, %cst_29 {dimension_numbers = #tpu.dot_dimension_numbers<[1], [1], [0], [0], [0, 0, 1, 0], [], []>} : vector<128x32xbf16>, vector<128x32xbf16>, vector<128x128xf32> -> vector<128x128xf32>
    %c1 = arith.constant 1 : index
    %c0_30 = arith.constant 0 : index
    %c0_31 = arith.constant 0 : index
    %48 = vector.load %arg8[%c1, %c0_30, %c0_31] : memref<4x128x1xf32, #tpu.memory_space<vmem>>, vector<1x128x1xf32>
    %49 = vector.shape_cast %48 : vector<1x128x1xf32> to vector<128x1xf32>
    %cst_32 = arith.constant dense<0xFF800000> : vector<128xf32>
    %50 = vector.multi_reduction <maximumf>, %47, %cst_32 [1] : vector<128x128xf32> to vector<128xf32>
    %51 = vector.shape_cast %50 : vector<128xf32> to vector<128x1xf32>
    %52 = arith.maximumf %49, %51 : vector<128x1xf32>
    %53 = arith.subf %49, %52 : vector<128x1xf32>
    %54 = math.exp %53 : vector<128x1xf32>
    %55 = vector.broadcast %52 : vector<128x1xf32> to vector<128x128xf32>
    %56 = arith.subf %47, %55 : vector<128x128xf32>
    %57 = math.exp %56 : vector<128x128xf32>
    %c1_33 = arith.constant 1 : index
    %c0_34 = arith.constant 0 : index
    %c0_35 = arith.constant 0 : index
    %58 = vector.load %arg9[%c1_33, %c0_34, %c0_35] : memref<4x128x1xf32, #tpu.memory_space<vmem>>, vector<1x128x1xf32>
    %59 = vector.shape_cast %58 : vector<1x128x1xf32> to vector<128x1xf32>
    %60 = arith.mulf %54, %59 : vector<128x1xf32>
    %cst_36 = arith.constant dense<0.000000e+00> : vector<128xf32>
    %61 = vector.multi_reduction <add>, %57, %cst_36 [1] : vector<128x128xf32> to vector<128xf32>
    %62 = vector.shape_cast %61 : vector<128xf32> to vector<128x1xf32>
    %63 = arith.addf %60, %62 : vector<128x1xf32>
    %c1_37 = arith.constant 1 : index
    %c0_38 = arith.constant 0 : index
    %c0_39 = arith.constant 0 : index
    %64 = vector.load %arg9[%c1_37, %c0_38, %c0_39] : memref<4x128x1xf32, #tpu.memory_space<vmem>>, vector<1x128x1xf32>
    %65 = vector.shape_cast %64 : vector<1x128x1xf32> to vector<128x1xf32>
    %66 = vector.shape_cast %63 : vector<128x1xf32> to vector<1x128x1xf32>
    tpu.vector_store %arg9[%c1_37, %c0_38, %c0_39], %66 {strides = array<i32>} : memref<4x128x1xf32, #tpu.memory_space<vmem>>, vector<1x128x1xf32>,
    %c1_40 = arith.constant 1 : index
    %c0_41 = arith.constant 0 : index
    %c0_42 = arith.constant 0 : index
    %67 = vector.load %arg8[%c1_40, %c0_41, %c0_42] : memref<4x128x1xf32, #tpu.memory_space<vmem>>, vector<1x128x1xf32>
    %68 = vector.shape_cast %67 : vector<1x128x1xf32> to vector<128x1xf32>
    %69 = vector.shape_cast %52 : vector<128x1xf32> to vector<1x128x1xf32>
    tpu.vector_store %arg8[%c1_40, %c0_41, %c0_42], %69 {strides = array<i32>} : memref<4x128x1xf32, #tpu.memory_space<vmem>>, vector<1x128x1xf32>,
    %c0_43 = arith.constant 0 : index
    %c32 = arith.constant 32 : index
    %70 = vector.load %arg10[%c0_43, %c32] : memref<128x128xf32, #tpu.memory_space<vmem>>, vector<128x32xf32>
    %71 = vector.broadcast %54 : vector<128x1xf32> to vector<128x32xf32>
    %72 = arith.mulf %71, %70 : vector<128x32xf32>
    %73 = arith.truncf %57 : vector<128x128xf32> to vector<128x128xbf16>
    %cst_44 = arith.constant dense<0.000000e+00> : vector<128x32xf32>
    %74 = tpu.matmul %73, %46, %cst_44 {dimension_numbers = #tpu.dot_dimension_numbers<[1], [0], [0], [1], [0, 0, 1, 1], [], []>} : vector<128x128xbf16>, vector<128x32xbf16>, vector<128x32xf32> -> vector<128x32xf32>
    %75 = arith.addf %72, %74 : vector<128x32xf32>
    %c0_45 = arith.constant 0 : index
    %c32_46 = arith.constant 32 : index
    %76 = vector.load %arg10[%c0_45, %c32_46] : memref<128x128xf32, #tpu.memory_space<vmem>>, vector<128x32xf32>
    tpu.vector_store %arg10[%c0_45, %c32_46], %75 {strides = array<i32>} : memref<128x128xf32, #tpu.memory_space<vmem>>, vector<128x32xf32>,
    %77 = vector.extract_strided_slice %6 {offsets = [0, 64], sizes = [128, 32], strides = [1, 1]} : vector<128x128xbf16> to vector<128x32xbf16>
    %78 = vector.extract_strided_slice %8 {offsets = [0, 64], sizes = [128, 32], strides = [1, 1]} : vector<128x128xbf16> to vector<128x32xbf16>
    %79 = vector.extract_strided_slice %10 {offsets = [0, 64], sizes = [128, 32], strides = [1, 1]} : vector<128x128xbf16> to vector<128x32xbf16>
    %cst_47 = arith.constant dense<0.000000e+00> : vector<128x128xf32>
    %80 = tpu.matmul %77, %78, %cst_47 {dimension_numbers = #tpu.dot_dimension_numbers<[1], [1], [0], [0], [0, 0, 1, 0], [], []>} : vector<128x32xbf16>, vector<128x32xbf16>, vector<128x128xf32> -> vector<128x128xf32>
    %c2 = arith.constant 2 : index
    %c0_48 = arith.constant 0 : index
    %c0_49 = arith.constant 0 : index
    %81 = vector.load %arg8[%c2, %c0_48, %c0_49] : memref<4x128x1xf32, #tpu.memory_space<vmem>>, vector<1x128x1xf32>
    %82 = vector.shape_cast %81 : vector<1x128x1xf32> to vector<128x1xf32>
    %cst_50 = arith.constant dense<0xFF800000> : vector<128xf32>
    %83 = vector.multi_reduction <maximumf>, %80, %cst_50 [1] : vector<128x128xf32> to vector<128xf32>
    %84 = vector.shape_cast %83 : vector<128xf32> to vector<128x1xf32>
    %85 = arith.maximumf %82, %84 : vector<128x1xf32>
    %86 = arith.subf %82, %85 : vector<128x1xf32>
    %87 = math.exp %86 : vector<128x1xf32>
    %88 = vector.broadcast %85 : vector<128x1xf32> to vector<128x128xf32>
    %89 = arith.subf %80, %88 : vector<128x128xf32>
    %90 = math.exp %89 : vector<128x128xf32>
    %c2_51 = arith.constant 2 : index
    %c0_52 = arith.constant 0 : index
    %c0_53 = arith.constant 0 : index
    %91 = vector.load %arg9[%c2_51, %c0_52, %c0_53] : memref<4x128x1xf32, #tpu.memory_space<vmem>>, vector<1x128x1xf32>
    %92 = vector.shape_cast %91 : vector<1x128x1xf32> to vector<128x1xf32>
    %93 = arith.mulf %87, %92 : vector<128x1xf32>
    %cst_54 = arith.constant dense<0.000000e+00> : vector<128xf32>
    %94 = vector.multi_reduction <add>, %90, %cst_54 [1] : vector<128x128xf32> to vector<128xf32>
    %95 = vector.shape_cast %94 : vector<128xf32> to vector<128x1xf32>
    %96 = arith.addf %93, %95 : vector<128x1xf32>
    %c2_55 = arith.constant 2 : index
    %c0_56 = arith.constant 0 : index
    %c0_57 = arith.constant 0 : index
    %97 = vector.load %arg9[%c2_55, %c0_56, %c0_57] : memref<4x128x1xf32, #tpu.memory_space<vmem>>, vector<1x128x1xf32>
    %98 = vector.shape_cast %97 : vector<1x128x1xf32> to vector<128x1xf32>
    %99 = vector.shape_cast %96 : vector<128x1xf32> to vector<1x128x1xf32>
    tpu.vector_store %arg9[%c2_55, %c0_56, %c0_57], %99 {strides = array<i32>} : memref<4x128x1xf32, #tpu.memory_space<vmem>>, vector<1x128x1xf32>,
    %c2_58 = arith.constant 2 : index
    %c0_59 = arith.constant 0 : index
    %c0_60 = arith.constant 0 : index
    %100 = vector.load %arg8[%c2_58, %c0_59, %c0_60] : memref<4x128x1xf32, #tpu.memory_space<vmem>>, vector<1x128x1xf32>
    %101 = vector.shape_cast %100 : vector<1x128x1xf32> to vector<128x1xf32>
    %102 = vector.shape_cast %85 : vector<128x1xf32> to vector<1x128x1xf32>
    tpu.vector_store %arg8[%c2_58, %c0_59, %c0_60], %102 {strides = array<i32>} : memref<4x128x1xf32, #tpu.memory_space<vmem>>, vector<1x128x1xf32>,
    %c0_61 = arith.constant 0 : index
    %c64 = arith.constant 64 : index
    %103 = vector.load %arg10[%c0_61, %c64] : memref<128x128xf32, #tpu.memory_space<vmem>>, vector<128x32xf32>
    %104 = vector.broadcast %87 : vector<128x1xf32> to vector<128x32xf32>
    %105 = arith.mulf %104, %103 : vector<128x32xf32>
    %106 = arith.truncf %90 : vector<128x128xf32> to vector<128x128xbf16>
    %cst_62 = arith.constant dense<0.000000e+00> : vector<128x32xf32>
    %107 = tpu.matmul %106, %79, %cst_62 {dimension_numbers = #tpu.dot_dimension_numbers<[1], [0], [0], [1], [0, 0, 1, 1], [], []>} : vector<128x128xbf16>, vector<128x32xbf16>, vector<128x32xf32> -> vector<128x32xf32>
    %108 = arith.addf %105, %107 : vector<128x32xf32>
    %c0_63 = arith.constant 0 : index
    %c64_64 = arith.constant 64 : index
    %109 = vector.load %arg10[%c0_63, %c64_64] : memref<128x128xf32, #tpu.memory_space<vmem>>, vector<128x32xf32>
    tpu.vector_store %arg10[%c0_63, %c64_64], %108 {strides = array<i32>} : memref<128x128xf32, #tpu.memory_space<vmem>>, vector<128x32xf32>,
    %110 = vector.extract_strided_slice %6 {offsets = [0, 96], sizes = [128, 32], strides = [1, 1]} : vector<128x128xbf16> to vector<128x32xbf16>
    %111 = vector.extract_strided_slice %8 {offsets = [0, 96], sizes = [128, 32], strides = [1, 1]} : vector<128x128xbf16> to vector<128x32xbf16>
    %112 = vector.extract_strided_slice %10 {offsets = [0, 96], sizes = [128, 32], strides = [1, 1]} : vector<128x128xbf16> to vector<128x32xbf16>
    %cst_65 = arith.constant dense<0.000000e+00> : vector<128x128xf32>
    %113 = tpu.matmul %110, %111, %cst_65 {dimension_numbers = #tpu.dot_dimension_numbers<[1], [1], [0], [0], [0, 0, 1, 0], [], []>} : vector<128x32xbf16>, vector<128x32xbf16>, vector<128x128xf32> -> vector<128x128xf32>
    %c3 = arith.constant 3 : index
    %c0_66 = arith.constant 0 : index
    %c0_67 = arith.constant 0 : index
    %114 = vector.load %arg8[%c3, %c0_66, %c0_67] : memref<4x128x1xf32, #tpu.memory_space<vmem>>, vector<1x128x1xf32>
    %115 = vector.shape_cast %114 : vector<1x128x1xf32> to vector<128x1xf32>
    %cst_68 = arith.constant dense<0xFF800000> : vector<128xf32>
    %116 = vector.multi_reduction <maximumf>, %113, %cst_68 [1] : vector<128x128xf32> to vector<128xf32>
    %117 = vector.shape_cast %116 : vector<128xf32> to vector<128x1xf32>
    %118 = arith.maximumf %115, %117 : vector<128x1xf32>
    %119 = arith.subf %115, %118 : vector<128x1xf32>
    %120 = math.exp %119 : vector<128x1xf32>
    %121 = vector.broadcast %118 : vector<128x1xf32> to vector<128x128xf32>
    %122 = arith.subf %113, %121 : vector<128x128xf32>
    %123 = math.exp %122 : vector<128x128xf32>
    %c3_69 = arith.constant 3 : index
    %c0_70 = arith.constant 0 : index
    %c0_71 = arith.constant 0 : index
    %124 = vector.load %arg9[%c3_69, %c0_70, %c0_71] : memref<4x128x1xf32, #tpu.memory_space<vmem>>, vector<1x128x1xf32>
    %125 = vector.shape_cast %124 : vector<1x128x1xf32> to vector<128x1xf32>
    %126 = arith.mulf %120, %125 : vector<128x1xf32>
    %cst_72 = arith.constant dense<0.000000e+00> : vector<128xf32>
    %127 = vector.multi_reduction <add>, %123, %cst_72 [1] : vector<128x128xf32> to vector<128xf32>
    %128 = vector.shape_cast %127 : vector<128xf32> to vector<128x1xf32>
    %129 = arith.addf %126, %128 : vector<128x1xf32>
    %c3_73 = arith.constant 3 : index
    %c0_74 = arith.constant 0 : index
    %c0_75 = arith.constant 0 : index
    %130 = vector.load %arg9[%c3_73, %c0_74, %c0_75] : memref<4x128x1xf32, #tpu.memory_space<vmem>>, vector<1x128x1xf32>
    %131 = vector.shape_cast %130 : vector<1x128x1xf32> to vector<128x1xf32>
    %132 = vector.shape_cast %129 : vector<128x1xf32> to vector<1x128x1xf32>
    tpu.vector_store %arg9[%c3_73, %c0_74, %c0_75], %132 {strides = array<i32>} : memref<4x128x1xf32, #tpu.memory_space<vmem>>, vector<1x128x1xf32>,
    %c3_76 = arith.constant 3 : index
    %c0_77 = arith.constant 0 : index
    %c0_78 = arith.constant 0 : index
    %133 = vector.load %arg8[%c3_76, %c0_77, %c0_78] : memref<4x128x1xf32, #tpu.memory_space<vmem>>, vector<1x128x1xf32>
    %134 = vector.shape_cast %133 : vector<1x128x1xf32> to vector<128x1xf32>
    %135 = vector.shape_cast %118 : vector<128x1xf32> to vector<1x128x1xf32>
    tpu.vector_store %arg8[%c3_76, %c0_77, %c0_78], %135 {strides = array<i32>} : memref<4x128x1xf32, #tpu.memory_space<vmem>>, vector<1x128x1xf32>,
    %c0_79 = arith.constant 0 : index
    %c96 = arith.constant 96 : index
    %136 = vector.load %arg10[%c0_79, %c96] : memref<128x128xf32, #tpu.memory_space<vmem>>, vector<128x32xf32>
    %137 = vector.broadcast %120 : vector<128x1xf32> to vector<128x32xf32>
    %138 = arith.mulf %137, %136 : vector<128x32xf32>
    %139 = arith.truncf %123 : vector<128x128xf32> to vector<128x128xbf16>
    %cst_80 = arith.constant dense<0.000000e+00> : vector<128x32xf32>
    %140 = tpu.matmul %139, %112, %cst_80 {dimension_numbers = #tpu.dot_dimension_numbers<[1], [0], [0], [1], [0, 0, 1, 1], [], []>} : vector<128x128xbf16>, vector<128x32xbf16>, vector<128x32xf32> -> vector<128x32xf32>
    %141 = arith.addf %138, %140 : vector<128x32xf32>
    %c0_81 = arith.constant 0 : index
    %c96_82 = arith.constant 96 : index
    %142 = vector.load %arg10[%c0_81, %c96_82] : memref<128x128xf32, #tpu.memory_space<vmem>>, vector<128x32xf32>
    tpu.vector_store %arg10[%c0_81, %c96_82], %141 {strides = array<i32>} : memref<128x128xf32, #tpu.memory_space<vmem>>, vector<128x32xf32>,
    %c0_i32_83 = arith.constant 0 : i32
    %143 = arith.cmpi eq, %arg3, %c0_i32_83 : i32
    %144 = arith.extui %143 : i1 to i32
    %c0_i32_84 = arith.constant 0 : i32
    %145 = arith.cmpi ne, %144, %c0_i32_84 : i32
    scf.if %145 {
      %c0_85 = arith.constant 0 : index
      %c0_86 = arith.constant 0 : index
      %c0_87 = arith.constant 0 : index
      %146 = vector.load %arg9[%c0_85, %c0_86, %c0_87] : memref<4x128x1xf32, #tpu.memory_space<vmem>>, vector<1x128x1xf32>
      %147 = vector.shape_cast %146 : vector<1x128x1xf32> to vector<128x1xf32>
      %148 = tpu.reciprocal %147 {approx = true} : vector<128x1xf32> -> vector<128x1xf32>
      %c0_88 = arith.constant 0 : index
      %c0_89 = arith.constant 0 : index
      %149 = vector.load %arg10[%c0_88, %c0_89] : memref<128x128xf32, #tpu.memory_space<vmem>>, vector<128x32xf32>
      %150 = vector.broadcast %148 : vector<128x1xf32> to vector<128x32xf32>
      %151 = arith.mulf %149, %150 : vector<128x32xf32>
      %152 = arith.truncf %151 : vector<128x32xf32> to vector<128x32xbf16>
      %c0_90 = arith.constant 0 : index
      %c0_91 = arith.constant 0 : index
      %c0_92 = arith.constant 0 : index
      %153 = vector.load %arg7[%c0_90, %c0_91, %c0_92] : memref<1x128x128xbf16, #tpu.memory_space<vmem>>, vector<1x128x32xbf16>
      %154 = vector.shape_cast %153 : vector<1x128x32xbf16> to vector<128x32xbf16>
      %155 = vector.shape_cast %152 : vector<128x32xbf16> to vector<1x128x32xbf16>
      tpu.vector_store %arg7[%c0_90, %c0_91, %c0_92], %155 {strides = array<i32>} : memref<1x128x128xbf16, #tpu.memory_space<vmem>>, vector<1x128x32xbf16>,
      %c1_93 = arith.constant 1 : index
      %c0_94 = arith.constant 0 : index
      %c0_95 = arith.constant 0 : index
      %156 = vector.load %arg9[%c1_93, %c0_94, %c0_95] : memref<4x128x1xf32, #tpu.memory_space<vmem>>, vector<1x128x1xf32>
      %157 = vector.shape_cast %156 : vector<1x128x1xf32> to vector<128x1xf32>
      %158 = tpu.reciprocal %157 {approx = true} : vector<128x1xf32> -> vector<128x1xf32>
      %c0_96 = arith.constant 0 : index
      %c32_97 = arith.constant 32 : index
      %159 = vector.load %arg10[%c0_96, %c32_97] : memref<128x128xf32, #tpu.memory_space<vmem>>, vector<128x32xf32>
      %160 = vector.broadcast %158 : vector<128x1xf32> to vector<128x32xf32>
      %161 = arith.mulf %159, %160 : vector<128x32xf32>
      %162 = arith.truncf %161 : vector<128x32xf32> to vector<128x32xbf16>
      %c0_98 = arith.constant 0 : index
      %c0_99 = arith.constant 0 : index
      %c32_100 = arith.constant 32 : index
      %163 = vector.load %arg7[%c0_98, %c0_99, %c32_100] : memref<1x128x128xbf16, #tpu.memory_space<vmem>>, vector<1x128x32xbf16>
      %164 = vector.shape_cast %163 : vector<1x128x32xbf16> to vector<128x32xbf16>
      %165 = vector.shape_cast %162 : vector<128x32xbf16> to vector<1x128x32xbf16>
      tpu.vector_store %arg7[%c0_98, %c0_99, %c32_100], %165 {strides = array<i32>} : memref<1x128x128xbf16, #tpu.memory_space<vmem>>, vector<1x128x32xbf16>,
      %c2_101 = arith.constant 2 : index
      %c0_102 = arith.constant 0 : index
      %c0_103 = arith.constant 0 : index
      %166 = vector.load %arg9[%c2_101, %c0_102, %c0_103] : memref<4x128x1xf32, #tpu.memory_space<vmem>>, vector<1x128x1xf32>
      %167 = vector.shape_cast %166 : vector<1x128x1xf32> to vector<128x1xf32>
      %168 = tpu.reciprocal %167 {approx = true} : vector<128x1xf32> -> vector<128x1xf32>
      %c0_104 = arith.constant 0 : index
      %c64_105 = arith.constant 64 : index
      %169 = vector.load %arg10[%c0_104, %c64_105] : memref<128x128xf32, #tpu.memory_space<vmem>>, vector<128x32xf32>
      %170 = vector.broadcast %168 : vector<128x1xf32> to vector<128x32xf32>
      %171 = arith.mulf %169, %170 : vector<128x32xf32>
      %172 = arith.truncf %171 : vector<128x32xf32> to vector<128x32xbf16>
      %c0_106 = arith.constant 0 : index
      %c0_107 = arith.constant 0 : index
      %c64_108 = arith.constant 64 : index
      %173 = vector.load %arg7[%c0_106, %c0_107, %c64_108] : memref<1x128x128xbf16, #tpu.memory_space<vmem>>, vector<1x128x32xbf16>
      %174 = vector.shape_cast %173 : vector<1x128x32xbf16> to vector<128x32xbf16>
      %175 = vector.shape_cast %172 : vector<128x32xbf16> to vector<1x128x32xbf16>
      tpu.vector_store %arg7[%c0_106, %c0_107, %c64_108], %175 {strides = array<i32>} : memref<1x128x128xbf16, #tpu.memory_space<vmem>>, vector<1x128x32xbf16>,
      %c3_109 = arith.constant 3 : index
      %c0_110 = arith.constant 0 : index
      %c0_111 = arith.constant 0 : index
      %176 = vector.load %arg9[%c3_109, %c0_110, %c0_111] : memref<4x128x1xf32, #tpu.memory_space<vmem>>, vector<1x128x1xf32>
      %177 = vector.shape_cast %176 : vector<1x128x1xf32> to vector<128x1xf32>
      %178 = tpu.reciprocal %177 {approx = true} : vector<128x1xf32> -> vector<128x1xf32>
      %c0_112 = arith.constant 0 : index
      %c96_113 = arith.constant 96 : index
      %179 = vector.load %arg10[%c0_112, %c96_113] : memref<128x128xf32, #tpu.memory_space<vmem>>, vector<128x32xf32>
      %180 = vector.broadcast %178 : vector<128x1xf32> to vector<128x32xf32>
      %181 = arith.mulf %179, %180 : vector<128x32xf32>
      %182 = arith.truncf %181 : vector<128x32xf32> to vector<128x32xbf16>
      %c0_114 = arith.constant 0 : index
      %c0_115 = arith.constant 0 : index
      %c96_116 = arith.constant 96 : index
      %183 = vector.load %arg7[%c0_114, %c0_115, %c96_116] : memref<1x128x128xbf16, #tpu.memory_space<vmem>>, vector<1x128x32xbf16>
      %184 = vector.shape_cast %183 : vector<1x128x32xbf16> to vector<128x32xbf16>
      %185 = vector.shape_cast %182 : vector<128x32xbf16> to vector<1x128x32xbf16>
      tpu.vector_store %arg7[%c0_114, %c0_115, %c96_116], %185 {strides = array<i32>} : memref<1x128x128xbf16, #tpu.memory_space<vmem>>, vector<1x128x32xbf16>,
    } else {
    }
    return
  }
  func.func @transform_0(%arg0: i32, %arg1: i32, %arg2: i32, %arg3: i32) -> (i32, i32, i32) {
    %c0_i32 = arith.constant 0 : i32
    return %arg0, %arg2, %arg1 : i32, i32, i32
  }
  func.func @transform_1(%arg0: i32, %arg1: i32, %arg2: i32, %arg3: i32) -> (i32, i32, i32) {
    %c1_i32 = arith.constant 1 : i32
    %0 = arith.addi %c1_i32, %arg1 : i32
    %c0_i32 = arith.constant 0 : i32
    return %arg0, %arg3, %0 : i32, i32, i32
  }
  func.func @transform_2(%arg0: i32, %arg1: i32, %arg2: i32, %arg3: i32) -> (i32, i32, i32) {
    %c2_i32 = arith.constant 2 : i32
    %0 = arith.addi %c2_i32, %arg1 : i32
    %c0_i32 = arith.constant 0 : i32
    return %arg0, %arg3, %0 : i32, i32, i32
  }
  func.func @transform_3(%arg0: i32, %arg1: i32, %arg2: i32, %arg3: i32) -> (i32, i32, i32) {
    %c0_i32 = arith.constant 0 : i32
    return %arg0, %arg2, %arg1 : i32, i32, i32
  }
}

</mosaic_0001>

<bundles_post_ra>
// kernel: tpu_custom_call.1
= control target key start
LH: loop header
LB: loop body
LE: loop exit
PB: predicated region body
PF: predicated region fallthrough
CT: control target
= control target key end

     0   :  { %s9278_s0 = inlined_call_operand.hbm [shape: bf16[2,128,384], index: 0, kind: input, shape index: {}]   ;;  %s9279_s1 = inlined_call_operand.hbm [shape: bf16[2,128,384], index: 1, kind: input, shape index: {}]   ;;  %s9280_s2 = inlined_call_operand.hbm [shape: bf16[2,128,384], index: 2, kind: input, shape index: {}]   ;;  %s9281_s3 = inlined_call_operand.hbm [shape: bf16[2,128,128], index: 3, kind: output, shape index: {}]  }
   0x1   :  { %9304 = sst [smem:[#allocation45_spill]] %s9279_s1 }
   0x2   :  { %8 = vsyncpa [#allocation6], 0 }
   0x3   :  { %10 = vsyncpa [#allocation6 + $0x1], 0 }
   0x4   :  { %11 = vsyncpa [#allocation9], 0 }
   0x5   :  { %13 = vsyncpa [#allocation9 + $0x1], 0 }
   0x6   :  { %14 = vsyncpa [#allocation7], 0 }
   0x7   :  { %16 = vsyncpa [#allocation7 + $0x1], 0  ;;  %s6448_s12 = smov 0   ;;  %s6450_s13 = smov 0  }
   0x8   :  { %s6452_s14 = smov 0   ;;  %s6454_s15 = smov 0  }
   0x9   :  { %s6456_s16 = smov 0   ;;  %s6458_s17 = smov 0  }
   0xa LB: > { %9305 = sst [smem:[#allocation15_spill]] %s6408_s16  ;;  %s6479_s18 = sadd.s32 4294967295, %s6412_s17   ;;  %s6412_s17 = sphi %s6458_s17, %s22_s17   ;;  %s6408_s16 = sphi %s6456_s16, %s9458_s16   ;;  %s6404_s15 = sphi %s6454_s15, %s9457_s15   ;;  %s6400_s14 = sphi %s6452_s14, %s9461_s14   ;;  %s6396_s13 = sphi %s6450_s13, %s9460_s13   ;;  %s6392_s12 = sphi %s6448_s12, %s9459_s12  }
   0xb   : > { %s5099_s19 = sadd.s32 4294967294, %s6412_s17   ;;  %s48_s20 = sadd.s32 1, %s6408_s16 }
   0xc   : > { %s59_s21 = sadd.s32 1, %s6400_s14  ;;  %p50_p0 = scmp.ge.s32.totalorder %s48_s20, 2 }
   0xd   : > { %p66_p1 = scmp.ne.s32.totalorder %s6400_s14, %s6396_s13  ;;  %p67_p2 = scmp.eq.s32.totalorder %s6412_s17, 0 }
   0xe   : > { %p72_p3 = scmp.ne.s32.totalorder %s6396_s13, %s6392_s12  ;;  %s9463_s20 = smov (%p50_p0, %s48_s20), 0 }
   0xf   : > { %9306 = sst [smem:[#allocation16_spill]] %s9463_s20  ;;  %p6491_p4 = por %p67_p2, %p66_p1 }
  0x10   : > { %p73_p5 = scmp.eq.s32.totalorder %s6479_s18, 0  ;;  %s52_s23 = ssub.s32 %s6408_s16, %s9463_s20 }
  0x11   : > { %p164_p6 = scmp.eq.s32.totalorder %s6479_s18, 1  ;;  %p57_p7 = scmp.eq.s32.totalorder %s52_s23, 0 }
  0x12   : > { %p6499_p8 = por %p73_p5, %p72_p3  ;;  %p170_p10 = scmp.eq.s32.totalorder %s5099_s19, 1 }
  0x13   : > { %p6503_p9 = por %p164_p6, %p66_p1  ;;  %p5101_p12 = scmp.ge.s32.totalorder %s6412_s17, 2 }
  0x14   : > { %s6508_s26 = scalar_select %p57_p7, %s6400_s14, %s59_s21  }
  0x15   : > { %p6510_p11 = por %p170_p10, %p72_p3  ;;  %p5742_p13 = scmp.lt.s32.totalorder %s6412_s17, 2 }
  0x16   : > { %9310 = sst [smem:[#allocation17_spill]] %s6508_s26  ;;  %s9282_s28 = sand.u32 1, %s6400_s14  }
  0x17   : > { %s9311_s27 = scalar_select %p6510_p11, 1, 0 }
  0x18   : > { %s6519_s29 = sshll.u32 %s9282_s28, 6  ;;  %s6522_s30 = smul.u32 3072, %s6408_s16 }
  0x19   : > { %9312 = sst [smem:[#allocation18_spill]] %s9311_s27  ;;  %p6526_p0 = pnand %p5742_p13, %p6491_p4 }
  0x1a   : > { %s215_s5 = sand.u32 1, %s6412_s17   ;;  %s9314_s1 = sld [smem:[#allocation45_spill]] }
  0x1b   : > { %s219_s9 = scalar_lea.vmem [#allocation8], %s6519_s29  ;;  %s6536_s19 = scalar_lea.sflag [#allocation9], %s215_s5 }
  0x1c   : > { %s231_s10 = sshll.u32 %s219_s9, 4  ;;  %p6244_p1 = pneg %p6526_p0  ;;  %s232_s10 = int_to_ptr.vmem [resolvable:$true] %s231_s10 }
  0x1d   : > { %s6255_s21 = scalar_lea.vmem %s232_s10, 1024  ;;  %s6414_s22 = smov [#allocation8]  }
  0x1e   : > { %p6256_p2 = scmp.ne.s32.totalorder %s232_s10, %s6255_s21  ;;  %s6260_s23 = sshll.u32 %s6414_s22, 4  ;;  %s6261_s23 = int_to_ptr.vmem [resolvable:$false] %s6260_s23 }
  0x1f   : > { %s6262_s28 = scalar_lea.vmem %s6261_s23, 2048  ;;  %p6263_p5 = scmp.lt.s32.totalorder %s232_s10, %s6261_s23 }
  0x20   : > { %s4997_s8 = scalar_lea.hbm %s9314_s1, %s6522_s30  ;;  %p6258_p3 = pnand %p6256_p2, %p6244_p1 }
  0x21   : > { %s4998_s11 = scalar_lea.hbm %s4997_s8, 64  ;;  %p6264_p6 = scmp.lt.s32.totalorder %s6262_s28, %s6255_s21 }
  0x22   : > { %p6259_p4 = pneg %p6258_p3 }
  0x23   : > { %p6265_p7 = por %p6264_p6, %p6263_p5 }
  0x25   : > { %p6266_p10 = pnand %p6265_p7, %p6259_p4 }
  0x27   : > { %6269 = shalt.err (!%p6266_p10)
}
  0x28   : > { %s9286_s6 = smov 192   ;;  %s6416_s5 = smov 64  }
  0x29   : > { %s6417_s7 = smov 4   ;;  %p5108_p13 = scmp.ge.s32.totalorder %s6412_s17, 1 }
  0x2a   : > { %5734 = dma.hbm_to_vmem [thread:$0]  (!%p6526_p0), %s4998_s11, 1024, %s232_s10, %s6536_s19, %s9286_s6, %s6416_s5, %s6417_s7  }
  0x2b   : > { %p265_p2 = scmp.lt.s32.totalorder %s6412_s17, 3  ;;  %s204_s21 = scalar_lea.hbm %s9278_s0, %s6522_s30 }
  0x2c   : > { %s194_s22 = scalar_lea.vmem [#allocation5], %s6519_s29  ;;  %s5007_s16 = scalar_lea.hbm %s9280_s2, %s6522_s30 }
  0x2d   : > { %p6551_p3 = pnand %p5108_p13, %p265_p2  ;;  %s205_s23 = sshll.u32 %s194_s22, 4  ;;  %s206_s23 = int_to_ptr.vmem [resolvable:$true] %s205_s23 }
  0x2e   : > { %s9316_s26 = sand.u32 1, %s6400_s14   ;;  %s6284_s10 = scalar_lea.vmem %s206_s23, 1024 }
  0x2f   : > { %s191_s27 = scalar_lea.sflag [#allocation6], %s9316_s26  ;;  %p6285_p4 = scmp.ne.s32.totalorder %s206_s23, %s6284_s10 }
  0x30   : > { %s6418_s11 = smov [#allocation5]  }
  0x31   : > { %p6287_p5 = pnand %p6285_p4, %p6244_p1  ;;  %s6289_s6 = sshll.u32 %s6418_s11, 4  ;;  %s6290_s6 = int_to_ptr.vmem [resolvable:$false] %s6289_s6 }
  0x32   : > { %s6291_s8 = scalar_lea.vmem %s6290_s6, 2048  ;;  %p6292_p7 = scmp.lt.s32.totalorder %s206_s23, %s6290_s6 }
  0x33   : > { %p6288_p6 = pneg %p6287_p5  ;;  %p6293_p10 = scmp.lt.s32.totalorder %s6291_s8, %s6284_s10 }
  0x35   : > { %p6294_p13 = por %p6293_p10, %p6292_p7 }
  0x37   : > { %p6295_p2 = pnand %p6294_p13, %p6288_p6 }
  0x39   : > { %6298 = shalt.err (!%p6295_p2)
}
  0x3a   : > { %s9317_s1 = smov 192   ;;  %s5008_s20 = scalar_lea.hbm %s5007_s16, 128 }
  0x3b   : > { %5731 = dma.hbm_to_vmem [thread:$0]  (!%p6526_p0), %s204_s21, 1024, %s206_s23, %s191_s27, %s9317_s1, %s6416_s5, %s6417_s7  }
  0x3c   : > { %s245_s26 = scalar_lea.vmem [#allocation10], %s6519_s29  ;;  %s6419_s6 = smov [#allocation10]  }
  0x3d   : > { %s257_s30 = sshll.u32 %s245_s26, 4  ;;  %s6317_s22 = sshll.u32 %s6419_s6, 4  ;;  %s258_s30 = int_to_ptr.vmem [resolvable:$true] %s257_s30  ;;  %s6318_s22 = int_to_ptr.vmem [resolvable:$false] %s6317_s22 }
  0x3e   : > { %s6312_s9 = scalar_lea.vmem %s258_s30, 1024  ;;  %s6319_s10 = scalar_lea.vmem %s6318_s22, 2048 }
  0x3f   : > { %p6313_p4 = scmp.ne.s32.totalorder %s258_s30, %s6312_s9  ;;  %p6320_p6 = scmp.lt.s32.totalorder %s258_s30, %s6318_s22 }
  0x40   : > { %p6321_p10 = scmp.lt.s32.totalorder %s6319_s10, %s6312_s9 }
  0x41   : > { %p6315_p5 = pnand %p6313_p4, %p6244_p1 }
  0x42   : > { %p6322_p13 = por %p6321_p10, %p6320_p6 }
  0x43   : > { %p6316_p7 = pneg %p6315_p5 }
  0x45   : > { %p6323_p2 = pnand %p6322_p13, %p6316_p7 }
  0x47   : > { %6326 = shalt.err (!%p6323_p2)
}
  0x48   : > { %5737 = dma.hbm_to_vmem [thread:$0]  (!%p6526_p0), %s5008_s20, 1024, %s258_s30, %s6536_s19, %s9317_s1, %s6416_s5, %s6417_s7  }
  0x49   : > { %269 = sbr.rel (%p6551_p3) target bundleno = 2817 (0xb01), region = 32 }
  0x4e   : > { %s6587_s16 = sand.u32 1, %s6396_s13  }
  0x4f   : > { %s6590_s27 = sshll.u32 %s6587_s16, 6  ;;  %s272_s29 = scalar_lea.sflag [#allocation6], %s6587_s16 }
  0x50   : > { %s6594_s21 = scalar_lea.vmem [#allocation5], %s6590_s27 }
  0x51   : > { %6379 = dma.done.wait (%p6499_p8), %s272_s29, 1024  }
  0x52   : > { %6381 = vsyncadd (%p6499_p8), %s272_s29, 4294966272  ;;  %s280_s4 = sand.u32 1, %s6479_s18   ;;  %s6602_s5 = scalar_lea.vmem [#allocation8], %s6590_s27 }
  0x53   : > { %s281_s19 = scalar_lea.sflag [#allocation9], %s280_s4 }
  0x54   : > { %6383 = dma.done.wait (%p6499_p8), %s281_s19, 2048  }
  0x55   : > { %6385 = vsyncadd (%p6499_p8), %s281_s19, 4294965248  ;;  %vm627_vm0 = vcmask 261120   ;;  %v6609_v0 = vld [vmem:[%s6602_s5 + $0x38] sm:$0xff]   ;;  %v6612_v1 = vld [vmem:[%s6602_s5 + $0x30] sm:$0xff]   ;;  %vm338_vm1 = vcmask 7168   ;;  %s7033_s18 = scalar_lea.vmem [#allocation10], %s6590_s27 }
  0x56   : > { %5687 = vmatprep.subr.msk.bf16.mxu0 %vm627_vm0, %v6609_v0  ;;  %v674_v2 = vsel %vm627_vm0, %v6609_v0, 0  ;;  %v671_v3 = vsel %vm627_vm0, %v6612_v1, 0  ;;  %v6623_v4 = vld [vmem:[%s6602_s5 + $0x28] sm:$0xff]   ;;  %v483_v5 = vld [vmem:[%s6594_s21] sm:$0xf]  ;;  %v6643_v13 = vld [vmem:[%s6602_s5 + $0x18] sm:$0xff]  }
  0x57   : > { %5432 = vmatpush3.bf16.xpose.msra.mxu0 %v674_v2  ;;  %v484_v6 = vld [vmem:[%s6594_s21 + $0x4] sm:$0xf]  ;;  %v499_v7 = vmul.bf16 1043676725, %v483_v5  ;;  %v668_v10 = vsel %vm627_vm0, %v6623_v4, 0  ;;  %v662_v14 = vsel %vm627_vm0, %v6643_v13, 0 }
  0x58   : > { %5688 = vmatprep.subr.msk.bf16.mxu0 %vm627_vm0, %v6612_v1  ;;  %v500_v8 = vmul.bf16 1043676725, %v484_v6  ;;  %v6636_v11 = vld [vmem:[%s6602_s5 + $0x20] sm:$0xff]   ;;  %v6650_v15 = vld [vmem:[%s6602_s5 + $0x10] sm:$0xff]   ;;  %v6657_v17 = vld [vmem:[%s6602_s5 + $0x8] sm:$0xff]   ;;  %v6421_v2 = vmov 0  }
  0x59   : > { %v665_v12 = vsel %vm627_vm0, %v6636_v11, 0  ;;  %v659_v16 = vsel %vm627_vm0, %v6650_v15, 0  ;;  %v656_v18 = vsel %vm627_vm0, %v6657_v17, 0  ;;  %v6664_v19 = vld [vmem:[%s6602_s5] sm:$0xff]   ;;  %v485_v20 = vld [vmem:[%s6594_s21 + $0x8] sm:$0xf]  ;;  %5803 = vset.pattern.permute.xlu1 %v6421_v2  ;;  %5802 = vset.pattern.permute.xlu0 %v6421_v2 }
  0x5a   : > { %v6627_v9 = vcombine.low %v499_v7, %v500_v8  ;;  %v486_v21 = vld [vmem:[%s6594_s21 + $0xc] sm:$0xf]  ;;  %v653_v22 = vsel %vm627_vm0, %v6664_v19, 0  ;;  %v487_v23 = vld [vmem:[%s6594_s21 + $0x10] sm:$0xf]  ;;  %s6423_s24 = smov 96  }
  0x5b   : > { %v488_v24 = vld [vmem:[%s6594_s21 + $0x14] sm:$0xf]  ;;  %v501_v25 = vmul.bf16 1043676725, %v485_v20  ;;  %v502_v26 = vmul.bf16 1043676725, %v486_v21 }
  0x5c   : > { %5447 = vmatprep.mubr.msk.bf16.mxu0 %vm627_vm0, %v6627_v9  ;;  %v503_v27 = vmul.bf16 1043676725, %v487_v23  ;;  %v504_v28 = vmul.bf16 1043676725, %v488_v24  ;;  %v489_v31 = vld [vmem:[%s6594_s21 + $0x18] sm:$0xf] }
  0x5d   : > { %v6674_v29 = vcombine.low %v501_v25, %v502_v26  ;;  %v490_v32 = vld [vmem:[%s6594_s21 + $0x1c] sm:$0xf]  ;;  %v491_v33 = vld [vmem:[%s6594_s21 + $0x20] sm:$0xf]  ;;  %v492_v34 = vld [vmem:[%s6594_s21 + $0x24] sm:$0xf] }
  0x5e   : > { %v6676_v30 = vcombine.low %v503_v27, %v504_v28  ;;  %v505_v35 = vmul.bf16 1043676725, %v489_v31  ;;  %v506_v36 = vmul.bf16 1043676725, %v490_v32  ;;  %v507_v37 = vmul.bf16 1043676725, %v491_v33 }
  0x5f   : > { %5434 = vmatpush3.bf16.xpose.msra.mxu0 %v671_v3  ;;  %v508_v38 = vmul.bf16 1043676725, %v492_v34  ;;  %v493_v41 = vld [vmem:[%s6594_s21 + $0x28] sm:$0xf]  ;;  %v494_v42 = vld [vmem:[%s6594_s21 + $0x2c] sm:$0xf] }
  0x60   : > { %5689 = vmatprep.subr.msk.bf16.mxu0 %vm627_vm0, %v6623_v4  ;;  %v6686_v39 = vcombine.low %v505_v35, %v506_v36  ;;  %v495_v43 = vld [vmem:[%s6594_s21 + $0x30] sm:$0xf]  ;;  %v496_v44 = vld [vmem:[%s6594_s21 + $0x34] sm:$0xf]  ;;  %v509_v45 = vmul.bf16 1043676725, %v493_v41 }
  0x61   : > { %v6688_v40 = vcombine.low %v507_v37, %v508_v38  ;;  %v510_v46 = vmul.bf16 1043676725, %v494_v42  ;;  %v511_v47 = vmul.bf16 1043676725, %v495_v43  ;;  %v512_v48 = vmul.bf16 1043676725, %v496_v44 }
  0x62   : > { %v497_v51 = vld [vmem:[%s6594_s21 + $0x38] sm:$0xf]  ;;  %v498_v52 = vld [vmem:[%s6594_s21 + $0x3c] sm:$0xf]  ;;  %v6420_v56 = vmov -1e+30  }
  0x63   : > { %v6698_v49 = vcombine.low %v509_v45, %v510_v46  ;;  %v6700_v50 = vcombine.low %v511_v47, %v512_v48  ;;  %v513_v53 = vmul.bf16 1043676725, %v497_v51  ;;  %v514_v54 = vmul.bf16 1043676725, %v498_v52  ;;  %341 = vst.msk [vmem:[#allocation2 + $0x10] sm:$0xff] %vm338_vm1, %v6420_v56  ;;  %339 = vst.msk [vmem:[#allocation2] sm:$0xff] %vm338_vm1, %v6420_v56 }
  0x64   : > { %340 = vst.msk [vmem:[#allocation2 + $0x8] sm:$0xff] %vm338_vm1, %v6420_v56  ;;  %342 = vst.msk [vmem:[#allocation2 + $0x18] sm:$0xff] %vm338_vm1, %v6420_v56  ;;  %v7036_v20 = vld [vmem:[%s7033_s18 + $0x38] sm:$0xff]   ;;  %v7041_v21 = vld [vmem:[%s7033_s18 + $0x30] sm:$0xff]   ;;  %s6424_s7 = smov 64   ;;  %s6425_s28 = smov 32  }
  0x65   : > { %9318 = vst [vmem:[#allocation19_spill] sm:$0xff] %v6698_v49  ;;  %9319 = vst [vmem:[#allocation20_spill] sm:$0xff] %v6700_v50  ;;  %v6708_v55 = vcombine.low %v513_v53, %v514_v54  ;;  %5463 = vmatprep.subr.bf16.mxu1 %v7036_v20  ;;  %v5815_v23 = vld [vmem:[%s7033_s18 + $0x20] sm:$0xff]   ;;  %v5816_v24 = vld [vmem:[%s7033_s18 + $0x18] sm:$0xff]   ;;  %vm2275_vm2 = vcmask 523520   ;;  %vm3144_vm3 = vcmask 785920  }
  0x66   : > { %343 = vst.msk [vmem:[#allocation2 + $0x20] sm:$0xff] %vm338_vm1, %v6420_v56  ;;  %344 = vst.msk [vmem:[#allocation2 + $0x28] sm:$0xff] %vm338_vm1, %v6420_v56  ;;  %5464 = vmatpush3.bf16.msra.mxu1 %v7036_v20  ;;  %v5817_v31 = vld [vmem:[%s7033_s18 + $0x10] sm:$0xff]   ;;  %v5818_v38 = vld [vmem:[%s7033_s18 + $0x8] sm:$0xff]   ;;  %vm4013_vm4 = vcmask 1048320   ;;  %vm4241_vm5 = vcmask 257024  }
  0x67   : > { %5436 = vmatpush3.bf16.xpose.msra.mxu0 %v668_v10  ;;  %345 = vst.msk [vmem:[#allocation2 + $0x30] sm:$0xff] %vm338_vm1, %v6420_v56  ;;  %346 = vst.msk [vmem:[#allocation2 + $0x38] sm:$0xff] %vm338_vm1, %v6420_v56  ;;  %5465 = vmatprep.subr.bf16.mxu1 %v7041_v21  ;;  %v7086_v45 = vld [vmem:[%s7033_s18] sm:$0xff]   ;;  %vm4466_vm6 = vcmask 519424   ;;  %vm4691_vm7 = vcmask 781824   ;;  %vm4916_vm8 = vcmask 1044224  }
  0x68   : > { %5690 = vmatprep.subr.msk.bf16.mxu0 %vm627_vm0, %v6636_v11  ;;  %347 = vst.msk [vmem:[#allocation2 + $0x40] sm:$0xff] %vm338_vm1, %v6420_v56  ;;  %348 = vst.msk [vmem:[#allocation2 + $0x48] sm:$0xff] %vm338_vm1, %v6420_v56  ;;  %s8999_s23 = scalar_lea.vmem [#allocation11], %s6590_s27  ;;  %s5302_s11 = sshll.u32 %s6404_s15, 10 }
  0x69   : > { %349 = vst.msk [vmem:[#allocation2 + $0x50] sm:$0xff] %vm338_vm1, %v6420_v56  ;;  %350 = vst.msk [vmem:[#allocation2 + $0x58] sm:$0xff] %vm338_vm1, %v6420_v56  ;;  %s4950_s8 = sshll.u32 %s8999_s23, 4  ;;  %s9216_s20 = scalar_lea.hbm %s9281_s3, %s5302_s11  ;;  %s9222_s8 = int_to_ptr.vmem [resolvable:$true] %s4950_s8 }
  0x6a   : > { %351 = vst.msk [vmem:[#allocation2 + $0x60] sm:$0xff] %vm338_vm1, %v6420_v56  ;;  %352 = vst.msk [vmem:[#allocation2 + $0x68] sm:$0xff] %vm338_vm1, %v6420_v56  ;;  %5466 = vmatpush3.bf16.msra.mxu1 %v7041_v21  ;;  %v7048_v25 = vld [vmem:[#allocation2 + $0x10] sm:$0xff]  ;;  %v7050_v27 = vld [vmem:[#allocation2] sm:$0xff]  ;;  %s4934_s26 = scalar_lea.sflag [#allocation7], %s6587_s16  ;;  %s6328_s30 = scalar_lea.vmem %s9222_s8, 1024 }
  0x6b   : > { %353 = vst.msk [vmem:[#allocation2 + $0x70] sm:$0xff] %vm338_vm1, %v6420_v56  ;;  %354 = vst.msk [vmem:[#allocation2 + $0x78] sm:$0xff] %vm338_vm1, %v6420_v56  ;;  %v7056_v33 = vld [vmem:[#allocation2 + $0x18] sm:$0xff]  ;;  %v7064_v36 = vld [vmem:[#allocation2 + $0x8] sm:$0xff]  ;;  %p6329_p8 = scmp.ne.s32.totalorder %s9222_s8, %s6328_s30  ;;  %s6426_s9 = smov [#allocation11]  }
  0x6c   : > { %355 = vst.msk [vmem:[#allocation2 + $0x80] sm:$0xff] %vm338_vm1, %v6420_v56  ;;  %356 = vst.msk [vmem:[#allocation2 + $0x88] sm:$0xff] %vm338_vm1, %v6420_v56  ;;  %s6332_s6 = sshll.u32 %s6426_s9, 4  ;;  %s6333_s6 = int_to_ptr.vmem [resolvable:$false] %s6332_s6 }
  0x6d   : > { %357 = vst.msk [vmem:[#allocation2 + $0x90] sm:$0xff] %vm338_vm1, %v6420_v56  ;;  %358 = vst.msk [vmem:[#allocation2 + $0x98] sm:$0xff] %vm338_vm1, %v6420_v56  ;;  %v7094_v52 = vld [vmem:[#allocation2 + $0x20] sm:$0xff]  ;;  %v7105_v2 = vld [vmem:[#allocation2 + $0x28] sm:$0xff]  ;;  %p6330_p0 = pnand %p6329_p8, %p6503_p9  ;;  %s6334_s22 = scalar_lea.vmem %s6333_s6, 2048 }
  0x6e   : > { %359 = vst.msk [vmem:[#allocation2 + $0xa0] sm:$0xff] %vm338_vm1, %v6420_v56  ;;  %360 = vst.msk [vmem:[#allocation2 + $0xa8] sm:$0xff] %vm338_vm1, %v6420_v56  ;;  %v7080_v44 = vld [vmem:[#allocation2 + $0x30] sm:$0xff]  ;;  %v7088_v47 = vld [vmem:[#allocation2 + $0x38] sm:$0xff]  ;;  %p6335_p3 = scmp.lt.s32.totalorder %s9222_s8, %s6333_s6  ;;  %p6336_p4 = scmp.lt.s32.totalorder %s6334_s22, %s6328_s30 }
  0x6f   : > { %5438 = vmatpush3.bf16.xpose.msra.mxu0 %v665_v12  ;;  %361 = vst.msk [vmem:[#allocation2 + $0xb0] sm:$0xff] %vm338_vm1, %v6420_v56  ;;  %362 = vst.msk [vmem:[#allocation2 + $0xb8] sm:$0xff] %vm338_vm1, %v6420_v56  ;;  %v6422_v12 = vmov 0.0   ;;  %p6331_p1 = pneg %p6330_p0 }
  0x70   : > { %5691 = vmatprep.subr.msk.bf16.mxu0 %vm627_vm0, %v6643_v13  ;;  %363 = vst.msk [vmem:[#allocation2 + $0xc0] sm:$0xff] %vm338_vm1, %v6420_v56  ;;  %364 = vst.msk [vmem:[#allocation2 + $0xc8] sm:$0xff] %vm338_vm1, %v6420_v56  ;;  %p6337_p5 = por %p6336_p4, %p6335_p3 }
  0x71   : > { %365 = vst.msk [vmem:[#allocation2 + $0xd0] sm:$0xff] %vm338_vm1, %v6420_v56  ;;  %366 = vst.msk [vmem:[#allocation2 + $0xd8] sm:$0xff] %vm338_vm1, %v6420_v56 }
  0x72   : > { %367 = vst.msk [vmem:[#allocation2 + $0xe0] sm:$0xff] %vm338_vm1, %v6420_v56  ;;  %368 = vst.msk [vmem:[#allocation2 + $0xe8] sm:$0xff] %vm338_vm1, %v6420_v56  ;;  %p6338_p7 = pnand %p6337_p5, %p6331_p1 }
  0x73   : > { %369 = vst.msk [vmem:[#allocation2 + $0xf0] sm:$0xff] %vm338_vm1, %v6420_v56  ;;  %370 = vst.msk [vmem:[#allocation2 + $0xf8] sm:$0xff] %vm338_vm1, %v6420_v56 }
  0x74   : > { %371 = vst.msk [vmem:[#allocation2 + $0x100] sm:$0xff] %vm338_vm1, %v6420_v56  ;;  %372 = vst.msk [vmem:[#allocation2 + $0x108] sm:$0xff] %vm338_vm1, %v6420_v56 }
  0x75   : > { %373 = vst.msk [vmem:[#allocation2 + $0x110] sm:$0xff] %vm338_vm1, %v6420_v56  ;;  %374 = vst.msk [vmem:[#allocation2 + $0x118] sm:$0xff] %vm338_vm1, %v6420_v56 }
  0x76   : > { %375 = vst.msk [vmem:[#allocation2 + $0x120] sm:$0xff] %vm338_vm1, %v6420_v56  ;;  %376 = vst.msk [vmem:[#allocation2 + $0x128] sm:$0xff] %vm338_vm1, %v6420_v56 }
  0x77   : > { %5440 = vmatpush3.bf16.xpose.msra.mxu0 %v662_v14  ;;  %377 = vst.msk [vmem:[#allocation2 + $0x130] sm:$0xff] %vm338_vm1, %v6420_v56  ;;  %378 = vst.msk [vmem:[#allocation2 + $0x138] sm:$0xff] %vm338_vm1, %v6420_v56 }
  0x78   : > { %5692 = vmatprep.subr.msk.bf16.mxu0 %vm627_vm0, %v6650_v15  ;;  %379 = vst.msk [vmem:[#allocation2 + $0x140] sm:$0xff] %vm338_vm1, %v6420_v56  ;;  %380 = vst.msk [vmem:[#allocation2 + $0x148] sm:$0xff] %vm338_vm1, %v6420_v56 }
  0x79   : > { %381 = vst.msk [vmem:[#allocation2 + $0x150] sm:$0xff] %vm338_vm1, %v6420_v56  ;;  %382 = vst.msk [vmem:[#allocation2 + $0x158] sm:$0xff] %vm338_vm1, %v6420_v56 }
  0x7a   : > { %383 = vst.msk [vmem:[#allocation2 + $0x160] sm:$0xff] %vm338_vm1, %v6420_v56  ;;  %384 = vst.msk [vmem:[#allocation2 + $0x168] sm:$0xff] %vm338_vm1, %v6420_v56 }
  0x7b   : > { %385 = vst.msk [vmem:[#allocation2 + $0x170] sm:$0xff] %vm338_vm1, %v6420_v56  ;;  %386 = vst.msk [vmem:[#allocation2 + $0x178] sm:$0xff] %vm338_vm1, %v6420_v56 }
  0x7c   : > { %387 = vst.msk [vmem:[#allocation2 + $0x180] sm:$0xff] %vm338_vm1, %v6420_v56  ;;  %388 = vst.msk [vmem:[#allocation2 + $0x188] sm:$0xff] %vm338_vm1, %v6420_v56 }
  0x7d   : > { %389 = vst.msk [vmem:[#allocation2 + $0x190] sm:$0xff] %vm338_vm1, %v6420_v56  ;;  %390 = vst.msk [vmem:[#allocation2 + $0x198] sm:$0xff] %vm338_vm1, %v6420_v56 }
  0x7e   : > { %391 = vst.msk [vmem:[#allocation2 + $0x1a0] sm:$0xff] %vm338_vm1, %v6420_v56  ;;  %392 = vst.msk [vmem:[#allocation2 + $0x1a8] sm:$0xff] %vm338_vm1, %v6420_v56 }
  0x7f   : > { %5442 = vmatpush3.bf16.xpose.msra.mxu0 %v659_v16  ;;  %393 = vst.msk [vmem:[#allocation2 + $0x1b0] sm:$0xff] %vm338_vm1, %v6420_v56  ;;  %394 = vst.msk [vmem:[#allocation2 + $0x1b8] sm:$0xff] %vm338_vm1, %v6420_v56 }
  0x80   : > { %5693 = vmatprep.subr.msk.bf16.mxu0 %vm627_vm0, %v6657_v17  ;;  %395 = vst.msk [vmem:[#allocation2 + $0x1c0] sm:$0xff] %vm338_vm1, %v6420_v56  ;;  %396 = vst.msk [vmem:[#allocation2 + $0x1c8] sm:$0xff] %vm338_vm1, %v6420_v56 }
  0x81   : > { %397 = vst.msk [vmem:[#allocation2 + $0x1d0] sm:$0xff] %vm338_vm1, %v6420_v56  ;;  %398 = vst.msk [vmem:[#allocation2 + $0x1d8] sm:$0xff] %vm338_vm1, %v6420_v56 }
  0x82   : > { %399 = vst.msk [vmem:[#allocation2 + $0x1e0] sm:$0xff] %vm338_vm1, %v6420_v56  ;;  %400 = vst.msk [vmem:[#allocation2 + $0x1e8] sm:$0xff] %vm338_vm1, %v6420_v56 }
  0x83   : > { %401 = vst.msk [vmem:[#allocation2 + $0x1f0] sm:$0xff] %vm338_vm1, %v6420_v56  ;;  %402 = vst.msk [vmem:[#allocation2 + $0x1f8] sm:$0xff] %vm338_vm1, %v6420_v56 }
  0x84   : > { %467 = vst [vmem:[#allocation4] sm:$0xff] %v6422_v12  ;;  %403 = vst.msk [vmem:[#allocation3] sm:$0xff] %vm338_vm1, %v6422_v12 }
  0x85   : > { %404 = vst.msk [vmem:[#allocation3 + $0x8] sm:$0xff] %vm338_vm1, %v6422_v12  ;;  %405 = vst.msk [vmem:[#allocation3 + $0x10] sm:$0xff] %vm338_vm1, %v6422_v12 }
  0x86   : > { %406 = vst.msk [vmem:[#allocation3 + $0x18] sm:$0xff] %vm338_vm1, %v6422_v12  ;;  %407 = vst.msk [vmem:[#allocation3 + $0x20] sm:$0xff] %vm338_vm1, %v6422_v12 }
  0x87   : > { %5444 = vmatpush3.bf16.xpose.msra.mxu0 %v656_v18  ;;  %408 = vst.msk [vmem:[#allocation3 + $0x28] sm:$0xff] %vm338_vm1, %v6422_v12  ;;  %409 = vst.msk [vmem:[#allocation3 + $0x30] sm:$0xff] %vm338_vm1, %v6422_v12 }
  0x88   : > { %5694 = vmatprep.subr.msk.bf16.mxu0 %vm627_vm0, %v6664_v19  ;;  %410 = vst.msk [vmem:[#allocation3 + $0x38] sm:$0xff] %vm338_vm1, %v6422_v12  ;;  %411 = vst.msk [vmem:[#allocation3 + $0x40] sm:$0xff] %vm338_vm1, %v6422_v12 }
  0x89   : > { %412 = vst.msk [vmem:[#allocation3 + $0x48] sm:$0xff] %vm338_vm1, %v6422_v12  ;;  %413 = vst.msk [vmem:[#allocation3 + $0x50] sm:$0xff] %vm338_vm1, %v6422_v12 }
  0x8a   : > { %414 = vst.msk [vmem:[#allocation3 + $0x58] sm:$0xff] %vm338_vm1, %v6422_v12  ;;  %415 = vst.msk [vmem:[#allocation3 + $0x60] sm:$0xff] %vm338_vm1, %v6422_v12 }
  0x8b   : > { %416 = vst.msk [vmem:[#allocation3 + $0x68] sm:$0xff] %vm338_vm1, %v6422_v12  ;;  %417 = vst.msk [vmem:[#allocation3 + $0x70] sm:$0xff] %vm338_vm1, %v6422_v12 }
  0x8c   : > { %418 = vst.msk [vmem:[#allocation3 + $0x78] sm:$0xff] %vm338_vm1, %v6422_v12  ;;  %419 = vst.msk [vmem:[#allocation3 + $0x80] sm:$0xff] %vm338_vm1, %v6422_v12 }
  0x8d   : > { %420 = vst.msk [vmem:[#allocation3 + $0x88] sm:$0xff] %vm338_vm1, %v6422_v12  ;;  %421 = vst.msk [vmem:[#allocation3 + $0x90] sm:$0xff] %vm338_vm1, %v6422_v12 }
  0x8e   : > { %422 = vst.msk [vmem:[#allocation3 + $0x98] sm:$0xff] %vm338_vm1, %v6422_v12  ;;  %423 = vst.msk [vmem:[#allocation3 + $0xa0] sm:$0xff] %vm338_vm1, %v6422_v12 }
  0x8f   : > { %5446 = vmatpush3.bf16.xpose.msra.mxu0 %v653_v22  ;;  %424 = vst.msk [vmem:[#allocation3 + $0xa8] sm:$0xff] %vm338_vm1, %v6422_v12  ;;  %425 = vst.msk [vmem:[#allocation3 + $0xb0] sm:$0xff] %vm338_vm1, %v6422_v12  ;;  %v5814_v22 = vld [vmem:[%s7033_s18 + $0x28] sm:$0xff]  }
  0x90   : > { %426 = vst.msk [vmem:[#allocation3 + $0xb8] sm:$0xff] %vm338_vm1, %v6422_v12  ;;  %427 = vst.msk [vmem:[#allocation3 + $0xc0] sm:$0xff] %vm338_vm1, %v6422_v12  ;;  %5467 = vmatprep.subr.bf16.mxu1 %v5814_v22 }
  0x91   : > { %428 = vst.msk [vmem:[#allocation3 + $0xc8] sm:$0xff] %vm338_vm1, %v6422_v12  ;;  %429 = vst.msk [vmem:[#allocation3 + $0xd0] sm:$0xff] %vm338_vm1, %v6422_v12  ;;  %5468 = vmatpush3.bf16.msra.mxu1 %v5814_v22 }
  0x92   : > { %430 = vst.msk [vmem:[#allocation3 + $0xd8] sm:$0xff] %vm338_vm1, %v6422_v12  ;;  %431 = vst.msk [vmem:[#allocation3 + $0xe0] sm:$0xff] %vm338_vm1, %v6422_v12  ;;  %5469 = vmatprep.subr.bf16.mxu1 %v5815_v23 }
  0x93   : > { %432 = vst.msk [vmem:[#allocation3 + $0xe8] sm:$0xff] %vm338_vm1, %v6422_v12  ;;  %433 = vst.msk [vmem:[#allocation3 + $0xf0] sm:$0xff] %vm338_vm1, %v6422_v12 }
  0x94   : > { %434 = vst.msk [vmem:[#allocation3 + $0xf8] sm:$0xff] %vm338_vm1, %v6422_v12  ;;  %435 = vst.msk [vmem:[#allocation3 + $0x100] sm:$0xff] %vm338_vm1, %v6422_v12 }
  0x95   : > { %436 = vst.msk [vmem:[#allocation3 + $0x108] sm:$0xff] %vm338_vm1, %v6422_v12  ;;  %437 = vst.msk [vmem:[#allocation3 + $0x110] sm:$0xff] %vm338_vm1, %v6422_v12  ;;  %5470 = vmatpush3.bf16.msra.mxu1 %v5815_v23 }
  0x96   : > { %5448 = vmatmul.mubr.msk.bf16.vlgmr.msra.gmra.mxu0 %vm627_vm0, %v6674_v29  ;;  %438 = vst.msk [vmem:[#allocation3 + $0x118] sm:$0xff] %vm338_vm1, %v6422_v12  ;;  %439 = vst.msk [vmem:[#allocation3 + $0x120] sm:$0xff] %vm338_vm1, %v6422_v12  ;;  %5471 = vmatprep.subr.bf16.mxu1 %v5816_v24 }
  0x97   : > { %5451 = vmatprep.mubr.msk.bf16.mxu0 %vm627_vm0, %v6676_v30  ;;  %440 = vst.msk [vmem:[#allocation3 + $0x128] sm:$0xff] %vm338_vm1, %v6422_v12  ;;  %441 = vst.msk [vmem:[#allocation3 + $0x130] sm:$0xff] %vm338_vm1, %v6422_v12 }
  0x98   : > { %442 = vst.msk [vmem:[#allocation3 + $0x138] sm:$0xff] %vm338_vm1, %v6422_v12  ;;  %443 = vst.msk [vmem:[#allocation3 + $0x140] sm:$0xff] %vm338_vm1, %v6422_v12 }
  0x99   : > { %444 = vst.msk [vmem:[#allocation3 + $0x148] sm:$0xff] %vm338_vm1, %v6422_v12  ;;  %445 = vst.msk [vmem:[#allocation3 + $0x150] sm:$0xff] %vm338_vm1, %v6422_v12  ;;  %5472 = vmatpush3.bf16.msra.mxu1 %v5816_v24  ;;  %v7115_v24 = vld [vmem:[#allocation2 + $0x50] sm:$0xff] }
  0x9a   : > { %446 = vst.msk [vmem:[#allocation3 + $0x158] sm:$0xff] %vm338_vm1, %v6422_v12  ;;  %447 = vst.msk [vmem:[#allocation3 + $0x160] sm:$0xff] %vm338_vm1, %v6422_v12  ;;  %5473 = vmatprep.subr.bf16.mxu1 %v5817_v31 }
  0x9b   : > { %448 = vst.msk [vmem:[#allocation3 + $0x168] sm:$0xff] %vm338_vm1, %v6422_v12  ;;  %449 = vst.msk [vmem:[#allocation3 + $0x170] sm:$0xff] %vm338_vm1, %v6422_v12 }
  0x9c   : > { %450 = vst.msk [vmem:[#allocation3 + $0x178] sm:$0xff] %vm338_vm1, %v6422_v12  ;;  %451 = vst.msk [vmem:[#allocation3 + $0x180] sm:$0xff] %vm338_vm1, %v6422_v12 }
  0x9d   : > { %452 = vst.msk [vmem:[#allocation3 + $0x188] sm:$0xff] %vm338_vm1, %v6422_v12  ;;  %453 = vst.msk [vmem:[#allocation3 + $0x190] sm:$0xff] %vm338_vm1, %v6422_v12  ;;  %5474 = vmatpush3.bf16.msra.mxu1 %v5817_v31 }
  0x9e   : > { %5452 = vmatmul.mubr.msk.bf16.gmra.mxu0 %vm627_vm0, %v6686_v39  ;;  %454 = vst.msk [vmem:[#allocation3 + $0x198] sm:$0xff] %vm338_vm1, %v6422_v12  ;;  %455 = vst.msk [vmem:[#allocation3 + $0x1a0] sm:$0xff] %vm338_vm1, %v6422_v12  ;;  %5475 = vmatprep.subr.bf16.mxu1 %v5818_v38 }
  0x9f   : > { %5455 = vmatprep.mubr.msk.bf16.mxu0 %vm627_vm0, %v6688_v40  ;;  %456 = vst.msk [vmem:[#allocation3 + $0x1a8] sm:$0xff] %vm338_vm1, %v6422_v12  ;;  %457 = vst.msk [vmem:[#allocation3 + $0x1b0] sm:$0xff] %vm338_vm1, %v6422_v12 }
  0xa0   : > { %458 = vst.msk [vmem:[#allocation3 + $0x1b8] sm:$0xff] %vm338_vm1, %v6422_v12  ;;  %459 = vst.msk [vmem:[#allocation3 + $0x1c0] sm:$0xff] %vm338_vm1, %v6422_v12 }
  0xa1   : > { %460 = vst.msk [vmem:[#allocation3 + $0x1c8] sm:$0xff] %vm338_vm1, %v6422_v12  ;;  %461 = vst.msk [vmem:[#allocation3 + $0x1d0] sm:$0xff] %vm338_vm1, %v6422_v12  ;;  %5476 = vmatpush3.bf16.msra.mxu1 %v5818_v38  ;;  %v7168_v38 = vld [vmem:[#allocation2 + $0x78] sm:$0xff] }
  0xa2   : > { %462 = vst.msk [vmem:[#allocation3 + $0x1d8] sm:$0xff] %vm338_vm1, %v6422_v12  ;;  %463 = vst.msk [vmem:[#allocation3 + $0x1e0] sm:$0xff] %vm338_vm1, %v6422_v12  ;;  %5477 = vmatprep.subr.bf16.mxu1 %v7086_v45 }
  0xa3   : > { %464 = vst.msk [vmem:[#allocation3 + $0x1e8] sm:$0xff] %vm338_vm1, %v6422_v12  ;;  %465 = vst.msk [vmem:[#allocation3 + $0x1f0] sm:$0xff] %vm338_vm1, %v6422_v12 }
  0xa4   : > { %466 = vst.msk [vmem:[#allocation3 + $0x1f8] sm:$0xff] %vm338_vm1, %v6422_v12  ;;  %468 = vst [vmem:[#allocation4 + $0x8] sm:$0xff] %v6422_v12 }
  0xa5   : > { %469 = vst [vmem:[#allocation4 + $0x10] sm:$0xff] %v6422_v12  ;;  %470 = vst [vmem:[#allocation4 + $0x18] sm:$0xff] %v6422_v12  ;;  %5478 = vmatpush3.bf16.msra.mxu1 %v7086_v45 }
  0xa6   : > { %5456 = vmatmul.mubr.msk.bf16.gmra.mxu0 %vm627_vm0, %v6698_v49  ;;  %471 = vst [vmem:[#allocation4 + $0x20] sm:$0xff] %v6422_v12  ;;  %472 = vst [vmem:[#allocation4 + $0x28] sm:$0xff] %v6422_v12 }
  0xa7   : > { %5459 = vmatprep.mubr.msk.bf16.mxu0 %vm627_vm0, %v6700_v50  ;;  %473 = vst [vmem:[#allocation4 + $0x30] sm:$0xff] %v6422_v12  ;;  %474 = vst [vmem:[#allocation4 + $0x38] sm:$0xff] %v6422_v12 }
  0xa8   : > { %475 = vst [vmem:[#allocation4 + $0x40] sm:$0xff] %v6422_v12  ;;  %476 = vst [vmem:[#allocation4 + $0x48] sm:$0xff] %v6422_v12 }
  0xa9   : > { %477 = vst [vmem:[#allocation4 + $0x50] sm:$0xff] %v6422_v12  ;;  %478 = vst [vmem:[#allocation4 + $0x58] sm:$0xff] %v6422_v12 }
  0xaa   : > { %479 = vst [vmem:[#allocation4 + $0x60] sm:$0xff] %v6422_v12  ;;  %480 = vst [vmem:[#allocation4 + $0x68] sm:$0xff] %v6422_v12 }
  0xab   : > { %481 = vst [vmem:[#allocation4 + $0x70] sm:$0xff] %v6422_v12  ;;  %482 = vst [vmem:[#allocation4 + $0x78] sm:$0xff] %v6422_v12  ;;  %v7189_v12 = vld [vmem:[#allocation2 + $0x68] sm:$0xff] }
  0xac   : > { %9320 = vst [vmem:[#allocation21_spill] sm:$0xff] %v7041_v21  ;;  %9321 = vst [vmem:[#allocation22_spill] sm:$0xff] %v7086_v45 }
  0xae   : > { %5460 = vmatmul.mubr.msk.bf16.gmra.mxu0 %vm627_vm0, %v6708_v55 }
 0x156   : > { %v6840_v57 = vpop.f32.mrf.mxu0 }
 0x157   : > { %793 = vmax.xlane.f32.xlu1 %v6840_v57 }
 0x158   : > { %v6843_v58 = vpop.f32.mrf.mxu0 }
 0x159   : > { %789 = vmax.xlane.f32.xlu0 %v6843_v58 }
 0x15a   : > { %v6846_v59 = vpop.f32.mrf.mxu0 }
 0x15b   : > { %795 = vmax.xlane.f32.xlu1 %v6846_v59 }
 0x15c   : > { %v6849_v60 = vpop.f32.mrf.mxu0 }
 0x15d   : > { %791 = vmax.xlane.f32.xlu0 %v6849_v60 }
 0x15e   : > { %v6852_v61 = vpop.f32.mrf.mxu0 }
 0x160   : > { %v6854_v62 = vpop.f32.mrf.mxu0 }
 0x161   : > { %801 = vmax.xlane.f32.xlu0 %v6852_v61 }
 0x162   : > { %v6857_v63 = vpop.f32.mrf.mxu0 }
 0x163   : > { %803 = vmax.xlane.f32.xlu1 %v6857_v63 }
 0x164   : > { %v6860_v3 = vpop.f32.mrf.mxu0 }
 0x165   : > { %797 = vmax.xlane.f32.xlu0 %v6854_v62 }
 0x166   : > { %v6863_v5 = vpop.f32.mrf.mxu0 }
 0x167   : > { %799 = vmax.xlane.f32.xlu1 %v6860_v3 }
 0x168   : > { %v6866_v6 = vpop.f32.mrf.mxu0 }
 0x169   : > { %809 = vmax.xlane.f32.xlu0 %v6863_v5 }
 0x16a   : > { %v6869_v7 = vpop.f32.mrf.mxu0 }
 0x16b   : > { %811 = vmax.xlane.f32.xlu1 %v6869_v7 }
 0x16c   : > { %v6872_v8 = vpop.f32.mrf.mxu0 }
 0x16d   : > { %805 = vmax.xlane.f32.xlu0 %v6866_v6 }
 0x16e   : > { %v6875_v10 = vpop.f32.mrf.mxu0 }
 0x16f   : > { %807 = vmax.xlane.f32.xlu1 %v6872_v8 }
 0x170   : > { %v7022_v14 = vpop.f32.mrf.mxu0 }
 0x171   : > { %817 = vmax.xlane.f32.xlu0 %v6875_v10 }
 0x172   : > { %v7025_v16 = vpop.f32.mrf.mxu0 }
 0x173   : > { %819 = vmax.xlane.f32.xlu1 %v7025_v16 }
 0x174   : > { %v7028_v18 = vpop.f32.mrf.mxu0 }
 0x175   : > { %813 = vmax.xlane.f32.xlu0 %v7022_v14 }
 0x177   : > { %815 = vmax.xlane.f32.xlu1 %v7028_v18 }
 0x1e0   : > { %v794_v26 = vpop.xlane.xlu1 %793 }
 0x1e1   : > { %v7053_v28 = vmax.f32 %v7048_v25, %v794_v26 }
 0x1e2   : > { %v790_v32 = vpop.xlane.xlu0 %789 }
 0x1e3   : > { %1112 = vst.msk [vmem:[#allocation2 + $0x10] sm:$0xff] %vm338_vm1, %v7053_v28  ;;  %v7061_v34 = vmax.f32 %v7050_v27, %v790_v32  ;;  %897 = vperm.xlu1 %5803, %v7053_v28  }
 0x1e4   : > { %v796_v35 = vpop.xlane.xlu1 %795 }
 0x1e5   : > { %1110 = vst.msk [vmem:[#allocation2] sm:$0xff] %vm338_vm1, %v7061_v34  ;;  %v7069_v37 = vmax.f32 %v7056_v33, %v796_v35  ;;  %887 = vperm.xlu0 %5802, %v7061_v34   ;;  %v7126_v35 = vld [vmem:[#allocation2 + $0x58] sm:$0xff] }
 0x1e6   : > { %v792_v41 = vpop.xlane.xlu0 %791 }
 0x1e7   : > { %1113 = vst.msk [vmem:[#allocation2 + $0x18] sm:$0xff] %vm338_vm1, %v7069_v37  ;;  %v7078_v43 = vmax.f32 %v7064_v36, %v792_v41 }
 0x1e9   : > { %1111 = vst.msk [vmem:[#allocation2 + $0x8] sm:$0xff] %vm338_vm1, %v7078_v43  ;;  %892 = vperm.xlu1 %5803, %v7078_v43  }
 0x1ea   : > { %v802_v46 = vpop.xlane.xlu0 %801 }
 0x1eb   : > { %v7091_v48 = vmax.f32 %v7080_v44, %v802_v46 }
 0x1ec   : > { %v804_v51 = vpop.xlane.xlu1 %803 }
 0x1ed   : > { %1116 = vst.msk [vmem:[#allocation2 + $0x30] sm:$0xff] %vm338_vm1, %v7091_v48  ;;  %v7102_v54 = vmax.f32 %v7088_v47, %v804_v51  ;;  %902 = vperm.xlu1 %5803, %v7069_v37   ;;  %v7135_v51 = vld [vmem:[#allocation2 + $0x40] sm:$0xff] }
 0x1ee   : > { %v798_v56 = vpop.xlane.xlu0 %797 }
 0x1ef   : > { %1117 = vst.msk [vmem:[#allocation2 + $0x38] sm:$0xff] %vm338_vm1, %v7102_v54  ;;  %v7112_v22 = vmax.f32 %v7094_v52, %v798_v56  ;;  %922 = vperm.xlu0 %5802, %v7102_v54  }
 0x1f0   : > { %v800_v23 = vpop.xlane.xlu1 %799 }
 0x1f1   : > { %1114 = vst.msk [vmem:[#allocation2 + $0x20] sm:$0xff] %vm338_vm1, %v7112_v22  ;;  %v7122_v31 = vmax.f32 %v7105_v2, %v800_v23  ;;  %1453 = vrot.lane.b32.xlu1 %v6609_v0, %s6423_s24 }
 0x1f2   : > { %v810_v32 = vpop.xlane.xlu0 %809 }
 0x1f3   : > { %1115 = vst.msk [vmem:[#allocation2 + $0x28] sm:$0xff] %vm338_vm1, %v7122_v31  ;;  %v7133_v41 = vmax.f32 %v7115_v24, %v810_v32  ;;  %v7147_v32 = vld [vmem:[#allocation2 + $0x48] sm:$0xff] }
 0x1f4   : > { %v812_v46 = vpop.xlane.xlu1 %811  ;;  %9322 = vst [vmem:[#allocation23_spill] sm:$0xff] %v7147_v32 }
 0x1f5   : > { %1120 = vst.msk [vmem:[#allocation2 + $0x50] sm:$0xff] %vm338_vm1, %v7133_v41  ;;  %v7142_v0 = vmax.f32 %v7126_v35, %v812_v46  ;;  %1451 = vrot.lane.b32.xlu1 %v6612_v1, %s6423_s24  ;;  %937 = vperm.xlu0 %5802, %v7133_v41   ;;  %v7156_v46 = vld [vmem:[#allocation2 + $0x70] sm:$0xff] }
 0x1f6   : > { %v806_v23 = vpop.xlane.xlu0 %805 }
 0x1f7   : > { %1121 = vst.msk [vmem:[#allocation2 + $0x58] sm:$0xff] %vm338_vm1, %v7142_v0  ;;  %v7154_v56 = vmax.f32 %v7135_v51, %v806_v23 }
 0x1f8   : > { %v808_v26 = vpop.xlane.xlu1 %807 }
 0x1f9   : > { %1118 = vst.msk [vmem:[#allocation2 + $0x40] sm:$0xff] %vm338_vm1, %v7154_v56  ;;  %v7163_v53 = vmax.f32 %v7147_v32, %v808_v26  ;;  %1449 = vrot.lane.b32.xlu1 %v6623_v4, %s6423_s24  ;;  %927 = vperm.xlu0 %5802, %v7154_v56   ;;  %v7177_v26 = vld [vmem:[#allocation2 + $0x60] sm:$0xff] }
 0x1fa   : > { %v818_v23 = vpop.xlane.xlu0 %817 }
 0x1fb   : > { %1119 = vst.msk [vmem:[#allocation2 + $0x48] sm:$0xff] %vm338_vm1, %v7163_v53  ;;  %v7175_v1 = vmax.f32 %v7156_v46, %v818_v23 }
 0x1fc   : > { %v820_v42 = vpop.xlane.xlu1 %819 }
 0x1fd   : > { %v7180_v45 = vmax.f32 %v7168_v38, %v820_v42  ;;  %917 = vperm.xlu1 %5803, %v7091_v48   ;;  %1447 = vrot.lane.b32.xlu0 %v6636_v11, %s6423_s24  ;;  %1124 = vst.msk [vmem:[#allocation2 + $0x70] sm:$0xff] %vm338_vm1, %v7175_v1 }
 0x1fe   : > { %v814_v23 = vpop.xlane.xlu0 %813 }
 0x1ff   : > { %1125 = vst.msk [vmem:[#allocation2 + $0x78] sm:$0xff] %vm338_vm1, %v7180_v45  ;;  %v7196_v42 = vmax.f32 %v7177_v26, %v814_v23  ;;  %v839_v23 = vsub.f32 %v7048_v25, %v7053_v28 }
 0x200   : > { %v816_v32 = vpop.xlane.xlu1 %815 }
 0x201   : > { %v7199_v11 = vmax.f32 %v7189_v12, %v816_v32  ;;  %907 = vperm.xlu1 %5803, %v7112_v22   ;;  %1122 = vst.msk [vmem:[#allocation2 + $0x60] sm:$0xff] %vm338_vm1, %v7196_v42  ;;  %v837_v32 = vsub.f32 %v7050_v27, %v7061_v34  ;;  %v857_v21 = vmul.f32 1.442695, %v839_v23 }
 0x203   : > { %1123 = vst.msk [vmem:[#allocation2 + $0x68] sm:$0xff] %vm338_vm1, %v7199_v11  ;;  %952 = vperm.xlu0 %5802, %v7199_v11   ;;  %v853_v4 = vmul.f32 1.442695, %v837_v32 }
 0x205   : > { %912 = vperm.xlu1 %5803, %v7122_v31   ;;  %5820 = vpow2.f32 %v853_v4 }
 0x206   : > { %5822 = vpow2.f32 %v857_v21 }
 0x207   : > { %962 = vperm.xlu0 %5802, %v7180_v45  }
 0x209   : > { %942 = vperm.xlu1 %5803, %v7142_v0  }
 0x20b   : > { %1443 = vrot.lane.b32.xlu0 %v6650_v15, %s6423_s24  ;;  %v838_v15 = vsub.f32 %v7064_v36, %v7078_v43 }
 0x20d   : > { %932 = vperm.xlu1 %5803, %v7163_v53  }
 0x20f   : > { %1439 = vrot.lane.b32.xlu0 %v6664_v19, %s6423_s24  ;;  %v855_v19 = vmul.f32 1.442695, %v838_v15 }
 0x211   : > { %957 = vperm.xlu1 %5803, %v7175_v1   ;;  %5824 = vpow2.f32 %v855_v19 }
 0x212   : > { %v7241_v21 = vpop.eup %5820 }
 0x213   : > { %1425 = vrot.lane.b32.xlu0 %v6674_v29, %s6423_s24 }
 0x215   : > { %947 = vperm.xlu1 %5803, %v7196_v42  }
 0x217   : > { %1429 = vrot.lane.b32.xlu0 %v6686_v39, %s6423_s24 }
 0x219   : > { %1445 = vrot.lane.b32.xlu1 %v6643_v13, %s6423_s24  ;;  %v7246_v13 = vpop.eup %5822 }
 0x21b   : > { %1433 = vrot.lane.b32.xlu0 %v6698_v49, %s6423_s24 }
 0x21d   : > { %1441 = vrot.lane.b32.xlu1 %v6657_v17, %s6423_s24 }
 0x21e   : > { %v7253_v17 = vpop.eup %5824 }
 0x21f   : > { %1437 = vrot.lane.b32.xlu0 %v6708_v55, %s6423_s24 }
 0x221   : > { %1423 = vrot.lane.b32.xlu1 %v6627_v9, %s6423_s24 }
 0x223   : > { %1144 = vperm.xlu0 %5802, %v7241_v21  }
 0x225   : > { %1427 = vrot.lane.b32.xlu1 %v6676_v30, %s6423_s24 }
 0x227   : > { %1154 = vperm.xlu0 %5802, %v7246_v13  }
 0x229   : > { %1431 = vrot.lane.b32.xlu1 %v6688_v40, %s6423_s24 }
 0x22d   : > { %1435 = vrot.lane.b32.xlu1 %v6700_v50, %s6423_s24 }
 0x231   : > { %1149 = vperm.xlu1 %5803, %v7253_v17  }
 0x235   : > { %2088 = vrot.lane.b32.xlu1 %v7036_v20, %s6423_s24 }
 0x25e   : > { %v898_v25 = vpop.permute.xlu1 %897 }
 0x25f   : > { %v967_v27 = vsub.f32 %v6840_v57, %v898_v25 }
 0x260   : > { %v888_v28 = vpop.permute.xlu0 %887 }
 0x261   : > { %v985_v34 = vmul.f32 1.442695, %v967_v27  ;;  %v965_v36 = vsub.f32 %v6843_v58, %v888_v28 }
 0x263   : > { %5826 = vpow2.f32 %v985_v34  ;;  %v981_v43 = vmul.f32 1.442695, %v965_v36 }
 0x264   : > { %v893_v4 = vpop.permute.xlu1 %892 }
 0x265   : > { %5828 = vpow2.f32 %v981_v43  ;;  %v966_v32 = vsub.f32 %v6849_v60, %v893_v4 }
 0x267   : > { %v983_v23 = vmul.f32 1.442695, %v966_v32 }
 0x268   : > { %v903_v15 = vpop.permute.xlu1 %902 }
 0x269   : > { %5830 = vpow2.f32 %v983_v23  ;;  %v968_v19 = vsub.f32 %v6846_v59, %v903_v15 }
 0x26a   : > { %v923_v50 = vpop.permute.xlu0 %922 }
 0x26b   : > { %v987_v20 = vmul.f32 1.442695, %v968_v19  ;;  %v972_v49 = vsub.f32 %v6857_v63, %v923_v50 }
 0x26c   : > { %v1454_v57 = vpop.permute.xlu1 %1453 }
 0x26d   : > { %5832 = vpow2.f32 %v987_v20  ;;  %v995_v25 = vmul.f32 1.442695, %v972_v49  ;;  %5695 = vmatprep.subr.msk.bf16.mxu1 %vm627_vm0, %v1454_v57 }
 0x26f   : > { %5834 = vpow2.f32 %v995_v25  ;;  %v1501_v25 = vsel %vm627_vm0, %v1454_v57, 0 }
 0x270   : > { %v5827_v58 = vpop.eup %5826  ;;  %v1452_v27 = vpop.permute.xlu1 %1451 }
 0x271   : > { %v938_v28 = vpop.permute.xlu0 %937  ;;  %1049 = vadd.xlane.f32.xlu0 %v5827_v58 }
 0x272   : > { %v5829_v60 = vpop.eup %5828  ;;  %v975_v15 = vsub.f32 %v6863_v5, %v938_v28 }
 0x273   : > { %1045 = vadd.xlane.f32.xlu1 %v5829_v60 }
 0x274   : > { %v1450_v34 = vpop.permute.xlu1 %1449 }
 0x275   : > { %v928_v36 = vpop.permute.xlu0 %927 }
 0x276   : > { %v5831_v43 = vpop.eup %5830  ;;  %v973_v5 = vsub.f32 %v6866_v6, %v928_v36 }
 0x277   : > { %1047 = vadd.xlane.f32.xlu0 %v5831_v43  ;;  %v1238_v59 = vpack.c.bf16 %v5831_v43, %v5829_v60 }
 0x278   : > { %v918_v4 = vpop.permute.xlu1 %917 }
 0x279   : > { %v971_v50 = vsub.f32 %v6852_v61, %v918_v4  ;;  %5479 = vmatprep.mubr.bf16.mxu1 %v1238_v59  ;;  %v7265_v63 = vpop.permute.xlu0 %1447  ;;  %v1001_v59 = vmul.f32 1.442695, %v975_v15 }
 0x27a   : > { %v5833_v49 = vpop.eup %5832 }
 0x27b   : > { %v993_v32 = vmul.f32 1.442695, %v971_v50  ;;  %1051 = vadd.xlane.f32.xlu1 %v5833_v49  ;;  %v1239_v23 = vpack.c.bf16 %v5833_v49, %v5827_v58  ;;  %v1498_v49 = vsel %vm627_vm0, %v1452_v27, 0 }
 0x27c   : > { %v908_v19 = vpop.permute.xlu1 %907  ;;  %v5835_v60 = vpop.eup %5834 }
 0x27d   : > { %5836 = vpow2.f32 %v993_v32  ;;  %v969_v20 = vsub.f32 %v6854_v62, %v908_v19  ;;  %5480 = vmatmul.mubr.bf16.vlgmr.msra.gmra.mxu1 %v1239_v23  ;;  %v997_v32 = vmul.f32 1.442695, %v973_v5 }
 0x27e   : > { %5496 = vmatpush3.bf16.xpose.msra.mxu1 %v1501_v25  ;;  %v953_v61 = vpop.permute.xlu0 %952 }
 0x27f   : > { %v989_v43 = vmul.f32 1.442695, %v969_v20  ;;  %5696 = vmatprep.subr.msk.bf16.mxu1 %vm627_vm0, %v1452_v27  ;;  %1059 = vadd.xlane.f32.xlu1 %v5835_v60  ;;  %v978_v20 = vsub.f32 %v7028_v18, %v953_v61 }
 0x280   : > { %v913_v4 = vpop.permute.xlu1 %912 }
 0x281   : > { %5838 = vpow2.f32 %v989_v43  ;;  %v970_v58 = vsub.f32 %v6860_v3, %v913_v4  ;;  %v1495_v43 = vsel %vm627_vm0, %v1450_v34, 0 }
 0x282   : > { %5840 = vpow2.f32 %v1001_v59  ;;  %v963_v50 = vpop.permute.xlu0 %962 }
 0x283   : > { %v991_v28 = vmul.f32 1.442695, %v970_v58  ;;  %v980_v15 = vsub.f32 %v7025_v16, %v963_v50 }
 0x284   : > { %v943_v62 = vpop.permute.xlu1 %942 }
 0x285   : > { %5842 = vpow2.f32 %v991_v28  ;;  %v976_v57 = vsub.f32 %v6869_v7, %v943_v62  ;;  %v1011_v7 = vmul.f32 1.442695, %v980_v15  ;;  %v1492_v28 = vsel %vm627_vm0, %v7265_v63, 0 }
 0x286   : > { %5498 = vmatpush3.bf16.xpose.msra.mxu1 %v1498_v49 }
 0x287   : > { %v1003_v23 = vmul.f32 1.442695, %v976_v57  ;;  %5697 = vmatprep.subr.msk.bf16.mxu1 %vm627_vm0, %v1450_v34 }
 0x288   : > { %v933_v19 = vpop.permute.xlu1 %932 }
 0x289   : > { %5844 = vpow2.f32 %v1003_v23  ;;  %v974_v3 = vsub.f32 %v6872_v8, %v933_v19  ;;  %v1007_v8 = vmul.f32 1.442695, %v978_v20 }
 0x28a   : > { %v5837_v6 = vpop.eup %5836  ;;  %5846 = vpow2.f32 %v997_v32 }
 0x28b   : > { %v999_v36 = vmul.f32 1.442695, %v974_v3  ;;  %1057 = vadd.xlane.f32.xlu0 %v5837_v6  ;;  %v1241_v62 = vpack.c.bf16 %v5835_v60, %v5837_v6  ;;  %v1444_v60 = vpop.permute.xlu0 %1443 }
 0x28c   : > { %v958_v25 = vpop.permute.xlu1 %957 }
 0x28d   : > { %5848 = vpow2.f32 %v999_v36  ;;  %v979_v27 = vsub.f32 %v6875_v10, %v958_v25  ;;  %v1486_v25 = vsel %vm627_vm0, %v1444_v60, 0 }
 0x28e   : > { %v5839_v59 = vpop.eup %5838  ;;  %5500 = vmatpush3.bf16.xpose.msra.mxu1 %v1495_v43  ;;  %5850 = vpow2.f32 %v1011_v7 }
 0x28f   : > { %v1009_v16 = vmul.f32 1.442695, %v979_v27  ;;  %5698 = vmatprep.subr.msk.bf16.mxu1 %vm627_vm0, %v7265_v63  ;;  %1053 = vadd.xlane.f32.xlu0 %v5839_v59  ;;  %v5841_v58 = vpop.eup %5840 }
 0x290   : > { %v948_v4 = vpop.permute.xlu1 %947 }
 0x291   : > { %5852 = vpow2.f32 %v1009_v16  ;;  %v977_v18 = vsub.f32 %v7022_v14, %v948_v4  ;;  %v1440_v4 = vpop.permute.xlu0 %1439 }
 0x292   : > { %v5843_v61 = vpop.eup %5842  ;;  %5854 = vpow2.f32 %v1007_v8 }
 0x293   : > { %v1005_v5 = vmul.f32 1.442695, %v977_v18  ;;  %1055 = vadd.xlane.f32.xlu1 %v5843_v61  ;;  %1065 = vadd.xlane.f32.xlu0 %v5841_v58  ;;  %v1240_v10 = vpack.c.bf16 %v5843_v61, %v5839_v59  ;;  %v1480_v18 = vsel %vm627_vm0, %v1440_v4, 0 }
 0x294   : > { %v1446_v34 = vpop.permute.xlu1 %1445 }
 0x295   : > { %5856 = vpow2.f32 %v1005_v5  ;;  %5483 = vmatprep.mubr.bf16.mxu1 %v1240_v10  ;;  %v1489_v23 = vsel %vm627_vm0, %v1446_v34, 0  ;;  %v1426_v61 = vpop.permute.xlu0 %1425 }
 0x296   : > { %v5845_v50 = vpop.eup %5844  ;;  %5502 = vmatpush3.bf16.xpose.msra.mxu1 %v1492_v28  ;;  %v9323_v28 = vsub.f32 %v7056_v33, %v7069_v37  ;;  %v1014_v37 = vld [vmem:[#allocation3 + $0x8] sm:$0xff] }
 0x297   : > { %v5847_v57 = vpop.eup %5846  ;;  %5484 = vmatmul.mubr.bf16.gmra.mxu1 %v1241_v62  ;;  %1067 = vadd.xlane.f32.xlu1 %v5845_v50  ;;  %v1243_v3 = vpack.c.bf16 %v5845_v50, %v5841_v58 }
 0x298   : > { %1061 = vadd.xlane.f32.xlu0 %v5847_v57  ;;  %v1442_v14 = vpop.permute.xlu1 %1441  ;;  %5699 = vmatprep.subr.msk.bf16.mxu1 %vm627_vm0, %v1446_v34  ;;  %v859_v62 = vmul.f32 1.442695, %v9323_v28  ;;  %v1019_v28 = vld [vmem:[#allocation3 + $0x30] sm:$0xff] }
 0x299   : > { %v1483_v16 = vsel %vm627_vm0, %v1442_v14, 0  ;;  %v1430_v5 = vpop.permute.xlu0 %1429 }
 0x29a   : > { %v5849_v49 = vpop.eup %5848  ;;  %5858 = vpow2.f32 %v859_v62 }
 0x29b   : > { %1063 = vadd.xlane.f32.xlu1 %v5849_v49  ;;  %v1242_v32 = vpack.c.bf16 %v5849_v49, %v5847_v57  ;;  %v5851_v19 = vpop.eup %5850  ;;  %v9324_v57 = vsub.f32 %v7088_v47, %v7102_v54  ;;  %v9325_v47 = vsub.f32 %v7080_v44, %v7091_v48 }
 0x29c   : > { %v1424_v15 = vpop.permute.xlu1 %1423 }
 0x29d   : > { %5487 = vmatprep.mubr.bf16.mxu1 %v1242_v32  ;;  %v1434_v10 = vpop.permute.xlu0 %1433  ;;  %v1015_v32 = vld [vmem:[#allocation3 + $0x10] sm:$0xff]  ;;  %v865_v54 = vmul.f32 1.442695, %v9325_v47 }
 0x29e   : > { %v5853_v63 = vpop.eup %5852  ;;  %5504 = vmatpush3.bf16.xpose.msra.mxu1 %v1489_v23  ;;  %v1013_v23 = vld [vmem:[#allocation3] sm:$0xff] }
 0x29f   : > { %5488 = vmatmul.mubr.bf16.gmra.mxu1 %v1243_v3  ;;  %1075 = vadd.xlane.f32.xlu1 %v5851_v19  ;;  %v5855_v36 = vpop.eup %5854  ;;  %v1245_v43 = vpack.c.bf16 %v5851_v19, %v5853_v63 }
 0x2a0   : > { %1073 = vadd.xlane.f32.xlu0 %v5853_v63  ;;  %v1428_v6 = vpop.permute.xlu1 %1427  ;;  %5700 = vmatprep.subr.msk.bf16.mxu1 %vm627_vm0, %v1444_v60  ;;  %v1029_v63 = vmul.f32 %v7241_v21, %v1013_v23  ;;  %v9326_v21 = vsub.f32 %v7094_v52, %v7112_v22 }
 0x2a1   : > { %v1438_v34 = vpop.permute.xlu0 %1437 }
 0x2a2   : > { %v5857_v20 = vpop.eup %5856 }
 0x2a3   : > { %1071 = vadd.xlane.f32.xlu1 %v5855_v36  ;;  %v1244_v7 = vpack.c.bf16 %v5855_v36, %v5857_v20 }
 0x2a4   : > { %1069 = vadd.xlane.f32.xlu0 %v5857_v20  ;;  %v1432_v27 = vpop.permute.xlu1 %1431  ;;  %v1016_v20 = vld [vmem:[#allocation3 + $0x18] sm:$0xff] }
 0x2a5   : > { %5491 = vmatprep.mubr.bf16.mxu1 %v1244_v7  ;;  %v7307_v50 = vpop.permute.xlu0 %1144 }
 0x2a6   : > { %5506 = vmatpush3.bf16.xpose.msra.mxu1 %v1486_v25  ;;  %v861_v25 = vmul.f32 1.442695, %v9326_v21 }
 0x2a7   : > { %5492 = vmatmul.mubr.bf16.gmra.mxu1 %v1245_v43  ;;  %5701 = vmatprep.subr.msk.bf16.mxu1 %vm627_vm0, %v1442_v14  ;;  %v867_v14 = vmul.f32 1.442695, %v9324_v57  ;;  %v7322_v36 = vpop.eup %5858  ;;  %v1020_v43 = vld [vmem:[#allocation3 + $0x38] sm:$0xff] }
 0x2a8   : > { %v1436_v59 = vpop.permute.xlu1 %1435  ;;  %5511 = vmatprep.mubr.msk.bf16.mxu1 %vm627_vm0, %v1424_v15  ;;  %v1031_v15 = vmul.f32 %v7246_v13, %v1015_v32 }
 0x2a9   : > { %v7312_v49 = vpop.permute.xlu0 %1154  ;;  %5860 = vpow2.f32 %v867_v14 }
 0x2aa   : > { %5862 = vpow2.f32 %v865_v54 }
 0x2ab   : > { %5864 = vpow2.f32 %v861_v25 }
 0x2ac   : > { %v7293_v8 = vpop.permute.xlu1 %1149 }
 0x2ae   : > { %5508 = vmatpush3.bf16.xpose.msra.mxu1 %v1483_v16 }
 0x2af   : > { %5702 = vmatprep.subr.msk.bf16.mxu1 %vm627_vm0, %v1440_v4  ;;  %v9328_v4 = vsub.f32 %v7115_v24, %v7133_v41  ;;  %v9331_v24 = vld [vmem:[#allocation23_spill] sm:$0xff] }
 0x2b0   : > { %v2089_v58 = vpop.permute.xlu1 %2088  ;;  %v9332_v41 = vsub.f32 %v9331_v24, %v7163_v53  ;;  %v1017_v53 = vld [vmem:[#allocation3 + $0x20] sm:$0xff] }
 0x2b1   : > { %5527 = vmatprep.subr.bf16.mxu0 %v2089_v58 }
 0x2b2   : > { %5528 = vmatpush3.bf16.msra.mxu0 %v2089_v58  ;;  %v873_v58 = vmul.f32 1.442695, %v9328_v4 }
 0x2b6   : > { %5510 = vmatpush3.bf16.xpose.msra.mxu1 %v1480_v18  ;;  %v7329_v44 = vpop.eup %5860 }
 0x2b7   : > { %v1036_v52 = vmul.f32 %v7329_v44, %v1020_v43 }
 0x2bd   : > { %5512 = vmatmul.mubr.msk.bf16.vlgmr.msra.gmra.mxu1 %vm627_vm0, %v1426_v61  ;;  %v9329_v61 = vsub.f32 %v7126_v35, %v7142_v0  ;;  %v9333_v35 = vsub.f32 %v7168_v38, %v7180_v45 }
 0x2be   : > { %5515 = vmatprep.mubr.msk.bf16.mxu1 %vm627_vm0, %v1428_v6  ;;  %v1030_v6 = vmul.f32 %v7253_v17, %v1014_v37  ;;  %v9327_v17 = vsub.f32 %v7105_v2, %v7122_v31  ;;  %v9330_v2 = vsub.f32 %v7135_v51, %v7154_v56  ;;  %v9334_v51 = vsub.f32 %v7156_v46, %v7175_v1 }
 0x2bf   : > { %v883_v0 = vmul.f32 1.442695, %v9333_v35  ;;  %v9336_v46 = vsub.f32 %v7177_v26, %v7196_v42 }
 0x2c0   : > { %v863_v16 = vmul.f32 1.442695, %v9327_v17  ;;  %v869_v31 = vmul.f32 1.442695, %v9330_v2  ;;  %v881_v56 = vmul.f32 1.442695, %v9334_v51 }
 0x2c1   : > { %v877_v1 = vmul.f32 1.442695, %v9336_v46 }
 0x2c2   : > { %5866 = vpow2.f32 %v863_v16 }
 0x2c3   : > { %5868 = vpow2.f32 %v873_v58 }
 0x2c5   : > { %5516 = vmatmul.mubr.msk.bf16.gmra.mxu1 %vm627_vm0, %v1430_v5  ;;  %v875_v5 = vmul.f32 1.442695, %v9329_v61  ;;  %v1027_v61 = vld [vmem:[#allocation3 + $0x70] sm:$0xff] }
 0x2c6   : > { %5519 = vmatprep.mubr.msk.bf16.mxu1 %vm627_vm0, %v1432_v27  ;;  %v1032_v27 = vmul.f32 %v7322_v36, %v1016_v20  ;;  %v1021_v20 = vld [vmem:[#allocation3 + $0x40] sm:$0xff] }
 0x2c7   : > { %5870 = vpow2.f32 %v875_v5 }
 0x2c8   : > { %5872 = vpow2.f32 %v869_v31 }
 0x2cd   : > { %5520 = vmatmul.mubr.msk.bf16.gmra.mxu1 %vm627_vm0, %v1434_v10  ;;  %v871_v10 = vmul.f32 1.442695, %v9332_v41  ;;  %v1026_v41 = vld [vmem:[#allocation3 + $0x68] sm:$0xff] }
 0x2ce   : > { %5523 = vmatprep.mubr.msk.bf16.mxu1 %vm627_vm0, %v1436_v59 }
 0x2cf   : > { %5874 = vpow2.f32 %v871_v10 }
 0x2d0   : > { %5876 = vpow2.f32 %v883_v0  ;;  %v1025_v0 = vld [vmem:[#allocation3 + $0x60] sm:$0xff] }
 0x2d1   : > { %5878 = vpow2.f32 %v881_v56 }
 0x2d5   : > { %5524 = vmatmul.mubr.msk.bf16.gmra.mxu1 %vm627_vm0, %v1438_v34  ;;  %v7349_v34 = vpop.eup %5862 }
 0x2d6   : > { %v1035_v62 = vmul.f32 %v7349_v34, %v1019_v28  ;;  %v7355_v57 = vpop.eup %5864 }
 0x2d7   : > { %v7360_v23 = vpop.eup %5866  ;;  %v1033_v45 = vmul.f32 %v7355_v57, %v1017_v53 }
 0x2d8   : > { %v7367_v38 = vpop.eup %5868 }
 0x2fa   : > { %v1050_v19 = vpop.xlane.xlu0 %1049 }
 0x2fb   : > { %v1079_v3 = vadd.f32 %v1050_v19, %v1031_v15  ;;  %v9335_v15 = vsub.f32 %v7189_v12, %v7199_v11 }
 0x2fc   : > { %v1046_v33 = vpop.xlane.xlu1 %1045 }
 0x2fd   : > { %1096 = vst.msk [vmem:[#allocation3 + $0x10] sm:$0xff] %vm338_vm1, %v1079_v3  ;;  %v1077_v60 = vadd.f32 %v1046_v33, %v1029_v63  ;;  %v879_v19 = vmul.f32 1.442695, %v9335_v15  ;;  %v1018_v63 = vld [vmem:[#allocation3 + $0x28] sm:$0xff]  ;;  %v1023_v33 = vld [vmem:[#allocation3 + $0x50] sm:$0xff] }
 0x2fe   : > { %v1034_v12 = vmul.f32 %v7360_v23, %v1018_v63  ;;  %v1039_v11 = vmul.f32 %v7367_v38, %v1023_v33 }
 0x2ff   : > { %1094 = vst.msk [vmem:[#allocation3] sm:$0xff] %vm338_vm1, %v1077_v60  ;;  %5880 = vpow2.f32 %v879_v19  ;;  %v7375_v60 = vpop.eup %5870  ;;  %v7405_v19 = vld [vmem:[#allocation4] sm:$0xff] }
 0x300   : > { %v1048_v13 = vpop.xlane.xlu0 %1047  ;;  %5882 = vpow2.f32 %v877_v1  ;;  %9337 = vst [vmem:[#allocation23_spill] sm:$0xff] %v7405_v19  ;;  %v1222_v1 = vmul.f32 %v7405_v19, %v7307_v50 }
 0x301   : > { %v1078_v7 = vadd.f32 %v1048_v13, %v1030_v6  ;;  %v1024_v6 = vld [vmem:[#allocation3 + $0x58] sm:$0xff]  ;;  %v7377_v13 = vpop.eup %5872 }
 0x302   : > { %v7382_v21 = vpop.eup %5874 }
 0x303   : > { %1095 = vst.msk [vmem:[#allocation3 + $0x8] sm:$0xff] %vm338_vm1, %v1078_v7  ;;  %v1040_v7 = vmul.f32 %v7375_v60, %v1024_v6  ;;  %v7387_v4 = vpop.eup %5876 }
 0x304   : > { %v1052_v48 = vpop.xlane.xlu1 %1051 }
 0x305   : > { %v1080_v59 = vadd.f32 %v1052_v48, %v1032_v27  ;;  %v1037_v27 = vmul.f32 %v7377_v13, %v1021_v20  ;;  %v1022_v48 = vld [vmem:[#allocation3 + $0x48] sm:$0xff] }
 0x306   : > { %v1038_v16 = vmul.f32 %v7382_v21, %v1022_v48 }
 0x307   : > { %1097 = vst.msk [vmem:[#allocation3 + $0x18] sm:$0xff] %vm338_vm1, %v1080_v59 }
 0x308   : > { %v1060_v22 = vpop.xlane.xlu1 %1059 }
 0x309   : > { %v1084_v18 = vadd.f32 %v1060_v22, %v1036_v52  ;;  %v1028_v52 = vld [vmem:[#allocation3 + $0x78] sm:$0xff]  ;;  %v7390_v22 = vpop.eup %5878 }
 0x30a   : > { %v1044_v5 = vmul.f32 %v7387_v4, %v1028_v52  ;;  %v1043_v24 = vmul.f32 %v7390_v22, %v1027_v61 }
 0x30b   : > { %1101 = vst.msk [vmem:[#allocation3 + $0x38] sm:$0xff] %vm338_vm1, %v1084_v18 }
 0x30c   : > { %v7394_v2 = vpop.eup %5880 }
 0x30d   : > { %v7397_v10 = vpop.eup %5882  ;;  %v1042_v51 = vmul.f32 %v7394_v2, %v1026_v41  ;;  %v9353_v41 = vld [vmem:[#allocation21_spill] sm:$0xff] }
 0x314   : > { %v1058_v14 = vpop.xlane.xlu0 %1057 }
 0x315   : > { %v1083_v32 = vadd.f32 %v1058_v14, %v1035_v62  ;;  %v1041_v14 = vmul.f32 %v7397_v10, %v1025_v0 }
 0x317   : > { %1100 = vst.msk [vmem:[#allocation3 + $0x30] sm:$0xff] %vm338_vm1, %v1083_v32 }
 0x318   : > { %v1054_v3 = vpop.xlane.xlu0 %1053 }
 0x319   : > { %v1081_v37 = vadd.f32 %v1054_v3, %v1033_v45  ;;  %v1224_v45 = vmul.f32 %v7405_v19, %v7312_v49 }
 0x31b   : > { %1098 = vst.msk [vmem:[#allocation3 + $0x20] sm:$0xff] %vm338_vm1, %v1081_v37 }
 0x31c   : > { %v1056_v47 = vpop.xlane.xlu1 %1055  ;;  %v1066_v54 = vpop.xlane.xlu0 %1065 }
 0x31d   : > { %v1082_v26 = vadd.f32 %v1056_v47, %v1034_v12  ;;  %v1087_v42 = vadd.f32 %v1066_v54, %v1039_v11  ;;  %v1223_v12 = vmul.f32 %v7405_v19, %v7293_v8 }
 0x31f   : > { %1099 = vst.msk [vmem:[#allocation3 + $0x28] sm:$0xff] %vm338_vm1, %v1082_v26  ;;  %1104 = vst.msk [vmem:[#allocation3 + $0x50] sm:$0xff] %vm338_vm1, %v1087_v42 }
 0x320   : > { %v1068_v25 = vpop.xlane.xlu1 %1067 }
 0x321   : > { %v1088_v43 = vadd.f32 %v1068_v25, %v1040_v7  ;;  %v1062_v59 = vpop.xlane.xlu0 %1061 }
 0x322   : > { %v1085_v17 = vadd.f32 %v1062_v59, %v1037_v27 }
 0x323   : > { %1105 = vst.msk [vmem:[#allocation3 + $0x58] sm:$0xff] %vm338_vm1, %v1088_v43 }
 0x324   : > { %1102 = vst.msk [vmem:[#allocation3 + $0x40] sm:$0xff] %vm338_vm1, %v1085_v17  ;;  %v1064_v58 = vpop.xlane.xlu1 %1063 }
 0x325   : > { %v1086_v18 = vadd.f32 %v1064_v58, %v1038_v16 }
 0x327   : > { %1103 = vst.msk [vmem:[#allocation3 + $0x48] sm:$0xff] %vm338_vm1, %v1086_v18 }
 0x328   : > { %v1076_v31 = vpop.xlane.xlu1 %1075 }
 0x329   : > { %v1092_v28 = vadd.f32 %v1076_v31, %v1044_v5  ;;  %v1074_v35 = vpop.xlane.xlu0 %1073 }
 0x32a   : > { %v1091_v62 = vadd.f32 %v1074_v35, %v1043_v24 }
 0x32b   : > { %1109 = vst.msk [vmem:[#allocation3 + $0x78] sm:$0xff] %vm338_vm1, %v1092_v28 }
 0x32c   : > { %1108 = vst.msk [vmem:[#allocation3 + $0x70] sm:$0xff] %vm338_vm1, %v1091_v62  ;;  %v1072_v56 = vpop.xlane.xlu1 %1071 }
 0x32d   : > { %v1090_v53 = vadd.f32 %v1072_v56, %v1042_v51  ;;  %v1070_v32 = vpop.xlane.xlu0 %1069  ;;  %v7492_v56 = vld [vmem:[#allocation2 + $0x90] sm:$0xff] }
 0x32e   : > { %v1089_v15 = vadd.f32 %v1070_v32, %v1041_v14 }
 0x32f   : > { %1107 = vst.msk [vmem:[#allocation3 + $0x68] sm:$0xff] %vm338_vm1, %v1090_v53  ;;  %v7494_v53 = vld [vmem:[#allocation2 + $0x80] sm:$0xff] }
 0x330   : > { %1106 = vst.msk [vmem:[#allocation3 + $0x60] sm:$0xff] %vm338_vm1, %v1089_v15 }
 0x33d   : > { %v5481_v46 = vpop.f32.mrf.mxu1 }
 0x33e   : > { %v1393_v3 = vadd.f32 %v5481_v46, %v1224_v45 }
 0x33f   : > { %v1328_v63 = vpop.f32.mrf.mxu1 }
 0x340   : > { %1409 = vst.msk [vmem:[#allocation4 + $0x10] sm:$0xff] %vm627_vm0, %v1393_v3  ;;  %v1391_v33 = vadd.f32 %v1328_v63, %v1222_v1  ;;  %v7507_v1 = vld [vmem:[#allocation2 + $0x98] sm:$0xff]  ;;  %v7509_v3 = vld [vmem:[#allocation2 + $0x88] sm:$0xff]  ;;  %v6207_v63 = vld [vmem:[%s7033_s18 + $0x10] sm:$0xff]  }
 0x341   : > { %v7412_v37 = vpop.f32.mrf.mxu1 }
 0x342   : > { %9338 = vst [vmem:[#allocation24_spill] sm:$0xff] %v7412_v37  ;;  %1407 = vst.msk [vmem:[#allocation4] sm:$0xff] %vm627_vm0, %v1391_v33 }
 0x343   : > { %v1331_v11 = vpop.f32.mrf.mxu1 }
 0x344   : > { %v1392_v47 = vadd.f32 %v1331_v11, %v1223_v12 }
 0x346   : > { %1408 = vst.msk [vmem:[#allocation4 + $0x8] sm:$0xff] %vm627_vm0, %v1392_v47 }
 0x357   : > { %v7418_v49 = vpop.f32.mrf.mxu1 }
 0x358   : > { %9339 = vst [vmem:[#allocation25_spill] sm:$0xff] %v7418_v49 }
 0x359   : > { %v7420_v54 = vpop.f32.mrf.mxu1 }
 0x35a   : > { %9340 = vst [vmem:[#allocation26_spill] sm:$0xff] %v7420_v54  ;;  %v6213_v54 = vld [vmem:[%s6602_s5 + $0x20] sm:$0xff]  }
 0x35b   : > { %v7422_v50 = vpop.f32.mrf.mxu1 }
 0x35c   : > { %9341 = vst [vmem:[#allocation27_spill] sm:$0xff] %v7422_v50  ;;  %v9359_v50 = vld [vmem:[#allocation22_spill] sm:$0xff] }
 0x35d   : > { %v7424_v6 = vpop.f32.mrf.mxu1 }
 0x35e   : > { %9342 = vst [vmem:[#allocation28_spill] sm:$0xff] %v7424_v6 }
 0x35f   : > { %v7426_v26 = vpop.f32.mrf.mxu1 }
 0x360   : > { %9343 = vst [vmem:[#allocation29_spill] sm:$0xff] %v7426_v26  ;;  %v6211_v26 = vld [vmem:[%s6602_s5 + $0x38] sm:$0xff]  }
 0x361   : > { %v7428_v42 = vpop.f32.mrf.mxu1 }
 0x362   : > { %9344 = vst [vmem:[#allocation30_spill] sm:$0xff] %v7428_v42  ;;  %v6212_v42 = vld [vmem:[%s6602_s5 + $0x28] sm:$0xff]  }
 0x363   : > { %v7430_v20 = vpop.f32.mrf.mxu1 }
 0x364   : > { %9345 = vst [vmem:[#allocation31_spill] sm:$0xff] %v7430_v20  ;;  %v6210_v20 = vld [vmem:[%s6602_s5 + $0x30] sm:$0xff]  }
 0x365   : > { %v7432_v8 = vpop.f32.mrf.mxu1 }
 0x366   : > { %9346 = vst [vmem:[#allocation32_spill] sm:$0xff] %v7432_v8  ;;  %v6208_v8 = vld [vmem:[%s7033_s18 + $0x18] sm:$0xff]  }
 0x367   : > { %v7434_v7 = vpop.f32.mrf.mxu1 }
 0x368   : > { %9347 = vst [vmem:[#allocation33_spill] sm:$0xff] %v7434_v7 }
 0x369   : > { %v7436_v25 = vpop.f32.mrf.mxu1 }
 0x36a   : > { %9348 = vst [vmem:[#allocation34_spill] sm:$0xff] %v7436_v25 }
 0x36b   : > { %v7438_v27 = vpop.f32.mrf.mxu1 }
 0x36c   : > { %9349 = vst [vmem:[#allocation35_spill] sm:$0xff] %v7438_v27 }
 0x36d   : > { %v7440_v48 = vpop.f32.mrf.mxu1 }
 0x36e   : > { %9350 = vst [vmem:[#allocation36_spill] sm:$0xff] %v7440_v48  ;;  %v6206_v48 = vld [vmem:[%s7033_s18 + $0x28] sm:$0xff]  }
 0x37d   : > { %v7442_v43 = vpop.f32.mrf.mxu1 }
 0x37e   : > { %1621 = vmax.xlane.f32.xlu0 %v7442_v43 }
 0x37f   : > { %v7445_v59 = vpop.f32.mrf.mxu1 }
 0x380   : > { %1617 = vmax.xlane.f32.xlu1 %v7445_v59 }
 0x381   : > { %v7448_v17 = vpop.f32.mrf.mxu1 }
 0x383   : > { %v7450_v16 = vpop.f32.mrf.mxu1 }
 0x384   : > { %1623 = vmax.xlane.f32.xlu1 %v7448_v17  ;;  %1619 = vmax.xlane.f32.xlu0 %v7450_v16 }
 0x385   : > { %v7454_v58 = vpop.f32.mrf.mxu1 }
 0x387   : > { %v7457_v52 = vpop.f32.mrf.mxu1 }
 0x388   : > { %1629 = vmax.xlane.f32.xlu1 %v7454_v58 }
 0x389   : > { %v7460_v18 = vpop.f32.mrf.mxu1 }
 0x38b   : > { %v7463_v61 = vpop.f32.mrf.mxu1 }
 0x38c   : > { %1625 = vmax.xlane.f32.xlu1 %v7457_v52 }
 0x38d   : > { %v7466_v5 = vpop.f32.mrf.mxu1 }
 0x38e   : > { %9351 = vst [vmem:[#allocation37_spill] sm:$0xff] %v7466_v5 }
 0x38f   : > { %v7468_v31 = vpop.f32.mrf.mxu1 }
 0x390   : > { %1631 = vmax.xlane.f32.xlu1 %v7460_v18  ;;  %9352 = vst [vmem:[#allocation38_spill] sm:$0xff] %v7468_v31 }
 0x391   : > { %v7471_v24 = vpop.f32.mrf.mxu1 }
 0x393   : > { %v7476_v28 = vpop.f32.mrf.mxu1 }
 0x394   : > { %1627 = vmax.xlane.f32.xlu1 %v7463_v61  ;;  %9354 = vst [vmem:[#allocation21_spill] sm:$0xff] %v7476_v28 }
 0x395   : > { %v7479_v35 = vpop.f32.mrf.mxu1 }
 0x396   : > { %9355 = vst [vmem:[#allocation39_spill] sm:$0xff] %v7479_v35 }
 0x397   : > { %v7482_v0 = vpop.f32.mrf.mxu1 }
 0x398   : > { %1637 = vmax.xlane.f32.xlu1 %v7466_v5  ;;  %9356 = vst [vmem:[#allocation40_spill] sm:$0xff] %v7482_v0 }
 0x399   : > { %v7485_v62 = vpop.f32.mrf.mxu1 }
 0x39a   : > { %2086 = vrot.lane.b32.xlu0 %v9353_v41, %s6423_s24  ;;  %9357 = vst [vmem:[#allocation41_spill] sm:$0xff] %v7485_v62  ;;  %v7522_v41 = vld [vmem:[#allocation2 + $0xb0] sm:$0xff] }
 0x39b   : > { %v7488_v51 = vpop.f32.mrf.mxu1 }
 0x39c   : > { %1633 = vmax.xlane.f32.xlu1 %v7468_v31  ;;  %9358 = vst [vmem:[#allocation42_spill] sm:$0xff] %v7488_v51  ;;  %v6215_v31 = vld [vmem:[%s6602_s5] sm:$0xff]  }
 0x3a0   : > { %1639 = vmax.xlane.f32.xlu1 %v7471_v24 }
 0x3a4   : > { %1645 = vmax.xlane.f32.xlu1 %v7479_v35 }
 0x3a8   : > { %1641 = vmax.xlane.f32.xlu1 %v7482_v0 }
 0x3ac   : > { %1647 = vmax.xlane.f32.xlu1 %v7485_v62 }
 0x3b0   : > { %1643 = vmax.xlane.f32.xlu1 %v7488_v51 }
 0x3b9   : > { %1635 = vmax.xlane.f32.xlu0 %v7476_v28 }
 0x407   : > { %v1622_v14 = vpop.xlane.xlu0 %1621 }
 0x408   : > { %v7497_v32 = vmax.f32 %v7492_v56, %v1622_v14  ;;  %v7537_v14 = vld [vmem:[#allocation2 + $0xa0] sm:$0xff] }
 0x409   : > { %v1618_v15 = vpop.xlane.xlu1 %1617 }
 0x40a   : > { %1940 = vst.msk [vmem:[#allocation2 + $0x90] sm:$0xff] %vm338_vm1, %v7497_v32  ;;  %v7504_v46 = vmax.f32 %v7494_v53, %v1618_v15  ;;  %1725 = vperm.xlu1 %5803, %v7497_v32   ;;  %v6205_v15 = vld [vmem:[%s7033_s18 + $0x20] sm:$0xff]  }
 0x40c   : > { %1938 = vst.msk [vmem:[#allocation2 + $0x80] sm:$0xff] %vm338_vm1, %v7504_v46 }
 0x40d   : > { %v1624_v33 = vpop.xlane.xlu1 %1623  ;;  %v1620_v12 = vpop.xlane.xlu0 %1619 }
 0x40e   : > { %v7516_v11 = vmax.f32 %v7507_v1, %v1624_v33  ;;  %v7519_v47 = vmax.f32 %v7509_v3, %v1620_v12  ;;  %1715 = vperm.xlu1 %5803, %v7504_v46  }
 0x410   : > { %1941 = vst.msk [vmem:[#allocation2 + $0x98] sm:$0xff] %vm338_vm1, %v7516_v11  ;;  %1939 = vst.msk [vmem:[#allocation2 + $0x88] sm:$0xff] %vm338_vm1, %v7519_v47  ;;  %1730 = vperm.xlu0 %5802, %v7516_v11  }
 0x411   : > { %v1630_v33 = vpop.xlane.xlu1 %1629  ;;  %v2087_v12 = vpop.permute.xlu0 %2086 }
 0x412   : > { %v7534_v45 = vmax.f32 %v7522_v41, %v1630_v33  ;;  %1720 = vperm.xlu1 %5803, %v7519_v47   ;;  %5529 = vmatprep.subr.bf16.mxu0 %v2087_v12 }
 0x413   : > { %5530 = vmatpush3.bf16.msra.mxu0 %v2087_v12  ;;  %v7550_v12 = vld [vmem:[#allocation2 + $0xb8] sm:$0xff] }
 0x414   : > { %1944 = vst.msk [vmem:[#allocation2 + $0xb0] sm:$0xff] %vm338_vm1, %v7534_v45  ;;  %2082 = vrot.lane.b32.xlu0 %v6205_v15, %s6423_s24 }
 0x415   : > { %v1626_v27 = vpop.xlane.xlu1 %1625 }
 0x416   : > { %v7546_v33 = vmax.f32 %v7537_v14, %v1626_v27  ;;  %2084 = vrot.lane.b32.xlu1 %v6206_v48, %s6423_s24  ;;  %v7563_v48 = vld [vmem:[#allocation2 + $0xa8] sm:$0xff] }
 0x418   : > { %1942 = vst.msk [vmem:[#allocation2 + $0xa0] sm:$0xff] %vm338_vm1, %v7546_v33  ;;  %2078 = vrot.lane.b32.xlu0 %v6207_v63, %s6423_s24 }
 0x419   : > { %v1632_v15 = vpop.xlane.xlu1 %1631 }
 0x41a   : > { %v7559_v27 = vmax.f32 %v7550_v12, %v1632_v15  ;;  %2080 = vrot.lane.b32.xlu1 %v6208_v8, %s6423_s24  ;;  %v6209_v15 = vld [vmem:[%s7033_s18 + $0x8] sm:$0xff]   ;;  %v7576_v8 = vld [vmem:[#allocation2 + $0xd0] sm:$0xff] }
 0x41c   : > { %1945 = vst.msk [vmem:[#allocation2 + $0xb8] sm:$0xff] %vm338_vm1, %v7559_v27  ;;  %2074 = vrot.lane.b32.xlu0 %v9359_v50, %s6423_s24 }
 0x41d   : > { %v1628_v63 = vpop.xlane.xlu1 %1627 }
 0x41e   : > { %v7572_v7 = vmax.f32 %v7563_v48, %v1628_v63  ;;  %2076 = vrot.lane.b32.xlu1 %v6209_v15, %s6423_s24  ;;  %v7589_v15 = vld [vmem:[#allocation2 + $0xc0] sm:$0xff] }
 0x420   : > { %1943 = vst.msk [vmem:[#allocation2 + $0xa8] sm:$0xff] %vm338_vm1, %v7572_v7  ;;  %2320 = vrot.lane.b32.xlu0 %v6210_v20, %s6424_s7 }
 0x421   : > { %v1638_v50 = vpop.xlane.xlu1 %1637 }
 0x422   : > { %v7585_v63 = vmax.f32 %v7576_v8, %v1638_v50  ;;  %2322 = vrot.lane.b32.xlu1 %v6211_v26, %s6424_s7  ;;  %v7601_v50 = vld [vmem:[#allocation2 + $0xd8] sm:$0xff] }
 0x424   : > { %1948 = vst.msk [vmem:[#allocation2 + $0xd0] sm:$0xff] %vm338_vm1, %v7585_v63  ;;  %1750 = vperm.xlu0 %5802, %v7559_v27  }
 0x425   : > { %v1634_v25 = vpop.xlane.xlu1 %1633 }
 0x426   : > { %v7597_v20 = vmax.f32 %v7589_v15, %v1634_v25  ;;  %2318 = vrot.lane.b32.xlu1 %v6212_v42, %s6424_s7  ;;  %v7612_v25 = vld [vmem:[#allocation2 + $0xf0] sm:$0xff] }
 0x428   : > { %1946 = vst.msk [vmem:[#allocation2 + $0xc0] sm:$0xff] %vm338_vm1, %v7597_v20  ;;  %1740 = vperm.xlu0 %5802, %v7572_v7  }
 0x429   : > { %v1640_v6 = vpop.xlane.xlu1 %1639 }
 0x42a   : > { %v7609_v37 = vmax.f32 %v7601_v50, %v1640_v6  ;;  %1745 = vperm.xlu1 %5803, %v7534_v45   ;;  %v7623_v6 = vld [vmem:[#allocation2 + $0xe0] sm:$0xff] }
 0x42c   : > { %1949 = vst.msk [vmem:[#allocation2 + $0xd8] sm:$0xff] %vm338_vm1, %v7609_v37  ;;  %1765 = vperm.xlu0 %5802, %v7585_v63  }
 0x42d   : > { %v1646_v26 = vpop.xlane.xlu1 %1645 }
 0x42e   : > { %v7620_v49 = vmax.f32 %v7612_v25, %v1646_v26  ;;  %1735 = vperm.xlu1 %5803, %v7546_v33   ;;  %v7634_v26 = vld [vmem:[#allocation2 + $0xf8] sm:$0xff] }
 0x430   : > { %1952 = vst.msk [vmem:[#allocation2 + $0xf0] sm:$0xff] %vm338_vm1, %v7620_v49  ;;  %1755 = vperm.xlu0 %5802, %v7597_v20  }
 0x431   : > { %v1642_v42 = vpop.xlane.xlu1 %1641 }
 0x432   : > { %v7631_v19 = vmax.f32 %v7623_v6, %v1642_v42  ;;  %1770 = vperm.xlu1 %5803, %v7609_v37   ;;  %v7645_v42 = vld [vmem:[#allocation2 + $0xe8] sm:$0xff] }
 0x434   : > { %1950 = vst.msk [vmem:[#allocation2 + $0xe0] sm:$0xff] %vm338_vm1, %v7631_v19  ;;  %2316 = vrot.lane.b32.xlu0 %v6213_v54, %s6424_s7 }
 0x435   : > { %v1648_v35 = vpop.xlane.xlu1 %1647 }
 0x436   : > { %v7643_v51 = vmax.f32 %v7634_v26, %v1648_v35  ;;  %v7660_v35 = vld [vmem:[#allocation2 + $0xc8] sm:$0xff] }
 0x438   : > { %1953 = vst.msk [vmem:[#allocation2 + $0xf8] sm:$0xff] %vm338_vm1, %v7643_v51 }
 0x439   : > { %v1644_v0 = vpop.xlane.xlu1 %1643 }
 0x43a   : > { %v7652_v62 = vmax.f32 %v7645_v42, %v1644_v0  ;;  %v6214_v0 = vld [vmem:[%s6602_s5 + $0x10] sm:$0xff]  }
 0x43c   : > { %1951 = vst.msk [vmem:[#allocation2 + $0xe8] sm:$0xff] %vm338_vm1, %v7652_v62  ;;  %1780 = vperm.xlu0 %5802, %v7652_v62  }
 0x440   : > { %1790 = vperm.xlu0 %5802, %v7643_v51  }
 0x442   : > { %v1636_v28 = vpop.xlane.xlu0 %1635 }
 0x443   : > { %v7663_v5 = vmax.f32 %v7660_v35, %v1636_v28  ;;  %v6216_v28 = vld [vmem:[%s6602_s5 + $0x18] sm:$0xff]  }
 0x444   : > { %2312 = vrot.lane.b32.xlu0 %v6214_v0, %s6424_s7  ;;  %v6217_v0 = vld [vmem:[%s6602_s5 + $0x8] sm:$0xff]  }
 0x445   : > { %1947 = vst.msk [vmem:[#allocation2 + $0xc8] sm:$0xff] %vm338_vm1, %v7663_v5  ;;  %1760 = vperm.xlu1 %5803, %v7663_v5  }
 0x448   : > { %2308 = vrot.lane.b32.xlu0 %v6215_v31, %s6424_s7 }
 0x449   : > { %1785 = vperm.xlu1 %5803, %v7620_v49  }
 0x44c   : > { %2294 = vrot.lane.b32.xlu0 %v6674_v29, %s6424_s7 }
 0x44d   : > { %1775 = vperm.xlu1 %5803, %v7631_v19  }
 0x450   : > { %1164 = vperm.xlu0 %5802, %v7355_v57   ;;  %v9360_v57 = vsub.f32 %v7509_v3, %v7519_v47 }
 0x451   : > { %2314 = vrot.lane.b32.xlu1 %v6216_v28, %s6424_s7 }
 0x452   : > { %v1683_v31 = vmul.f32 1.442695, %v9360_v57 }
 0x454   : > { %2298 = vrot.lane.b32.xlu0 %v6686_v39, %s6424_s7  ;;  %5884 = vpow2.f32 %v1683_v31 }
 0x455   : > { %2310 = vrot.lane.b32.xlu1 %v6217_v0, %s6424_s7  ;;  %v9363_v0 = vsub.f32 %v7522_v41, %v7534_v45 }
 0x457   : > { %v1693_v54 = vmul.f32 1.442695, %v9363_v0 }
 0x458   : > { %2300 = vrot.lane.b32.xlu0 %v6688_v40, %s6424_s7 }
 0x459   : > { %2292 = vrot.lane.b32.xlu1 %v6627_v9, %s6424_s7 }
 0x45c   : > { %1174 = vperm.xlu0 %5802, %v7349_v34   ;;  %v9361_v34 = vsub.f32 %v7537_v14, %v7546_v33  ;;  %v9369_v33 = vsub.f32 %v7492_v56, %v7497_v32 }
 0x45d   : > { %1159 = vperm.xlu1 %5803, %v7322_v36   ;;  %v9362_v36 = vld [vmem:[#allocation19_spill] sm:$0xff] }
 0x45e   : > { %v1689_v28 = vmul.f32 1.442695, %v9361_v34 }
 0x460   : > { %2306 = vrot.lane.b32.xlu0 %v6708_v55, %s6424_s7  ;;  %5886 = vpow2.f32 %v1689_v28 }
 0x461   : > { %2296 = vrot.lane.b32.xlu1 %v6676_v30, %s6424_s7  ;;  %5888 = vpow2.f32 %v1693_v54  ;;  %v7720_v47 = vpop.eup %5884 }
 0x464   : > { %1184 = vperm.xlu0 %5802, %v7377_v13   ;;  %v9364_v13 = vld [vmem:[#allocation20_spill] sm:$0xff] }
 0x465   : > { %1169 = vperm.xlu1 %5803, %v7360_v23   ;;  %v9365_v23 = vsub.f32 %v7576_v8, %v7585_v63  ;;  %v1685_v8 = vmul.f32 1.442695, %v9369_v33 }
 0x467   : > { %v1701_v3 = vmul.f32 1.442695, %v9365_v23 }
 0x468   : > { %1194 = vperm.xlu0 %5802, %v7367_v38   ;;  %v9366_v38 = vsub.f32 %v7589_v15, %v7597_v20 }
 0x469   : > { %2302 = vrot.lane.b32.xlu1 %v9362_v36, %s6424_s7  ;;  %5890 = vpow2.f32 %v1701_v3 }
 0x46a   : > { %v1697_v45 = vmul.f32 1.442695, %v9366_v38 }
 0x46c   : > { %1204 = vperm.xlu0 %5802, %v7397_v10   ;;  %v9367_v10 = vsub.f32 %v7494_v53, %v7504_v46  ;;  %5892 = vpow2.f32 %v1697_v45 }
 0x46d   : > { %2304 = vrot.lane.b32.xlu1 %v9364_v13, %s6424_s7  ;;  %v7730_v14 = vpop.eup %5886 }
 0x46e   : > { %v1681_v41 = vmul.f32 1.442695, %v9367_v10  ;;  %v7740_v46 = vpop.eup %5888 }
 0x470   : > { %1214 = vperm.xlu0 %5802, %v7390_v22   ;;  %v9368_v22 = vsub.f32 %v7612_v25, %v7620_v49  ;;  %5894 = vpow2.f32 %v1681_v41  ;;  %v9371_v49 = vsub.f32 %v7507_v1, %v7516_v11  ;;  %v9373_v1 = vsub.f32 %v7563_v48, %v7572_v7 }
 0x471   : > { %1179 = vperm.xlu1 %5803, %v7329_v44  }
 0x472   : > { %v1709_v44 = vmul.f32 1.442695, %v9368_v22  ;;  %v1687_v63 = vmul.f32 1.442695, %v9371_v49  ;;  %v1691_v11 = vmul.f32 1.442695, %v9373_v1 }
 0x474   : > { %1977 = vperm.xlu0 %5802, %v7720_v47   ;;  %5896 = vpow2.f32 %v1709_v44 }
 0x475   : > { %1189 = vperm.xlu1 %5803, %v7382_v21   ;;  %v9370_v21 = vsub.f32 %v7623_v6, %v7631_v19  ;;  %5898 = vpow2.f32 %v1685_v8  ;;  %v9375_v6 = vsub.f32 %v7660_v35, %v7663_v5 }
 0x476   : > { %v7747_v56 = vpop.eup %5890 }
 0x477   : > { %v1705_v53 = vmul.f32 1.442695, %v9370_v21  ;;  %v1699_v54 = vmul.f32 1.442695, %v9375_v6 }
 0x478   : > { %1992 = vperm.xlu0 %5802, %v7730_v14  }
 0x479   : > { %1199 = vperm.xlu1 %5803, %v7375_v60   ;;  %5900 = vpow2.f32 %v1705_v53  ;;  %v9372_v60 = vsub.f32 %v7550_v12, %v7559_v27  ;;  %v7754_v32 = vpop.eup %5892 }
 0x47a   : > { %5902 = vpow2.f32 %v1687_v63 }
 0x47b   : > { %v1695_v19 = vmul.f32 1.442695, %v9372_v60 }
 0x47c   : > { %2002 = vperm.xlu0 %5802, %v7740_v46  }
 0x47d   : > { %1209 = vperm.xlu1 %5803, %v7394_v2   ;;  %5904 = vpow2.f32 %v1695_v19  ;;  %v7759_v2 = vpop.eup %5894 }
 0x47e   : > { %5906 = vpow2.f32 %v1691_v11 }
 0x480   : > { %2022 = vperm.xlu0 %5802, %v7747_v56  }
 0x481   : > { %1219 = vperm.xlu1 %5803, %v7387_v4   ;;  %v7763_v12 = vpop.eup %5896  ;;  %v9374_v4 = vsub.f32 %v7601_v50, %v7609_v37 }
 0x482   : > { %v7768_v20 = vpop.eup %5898 }
 0x483   : > { %v1703_v27 = vmul.f32 1.442695, %v9374_v4 }
 0x484   : > { %2012 = vperm.xlu0 %5802, %v7754_v32  }
 0x485   : > { %v1726_v15 = vpop.permute.xlu1 %1725  ;;  %1972 = vperm.xlu1 %5803, %v7759_v2   ;;  %5908 = vpow2.f32 %v1703_v27 }
 0x486   : > { %v7773_v25 = vpop.eup %5900  ;;  %5910 = vpow2.f32 %v1699_v54  ;;  %v1795_v38 = vsub.f32 %v7442_v43, %v1726_v15 }
 0x487   : > { %v7778_v31 = vpop.eup %5902 }
 0x488   : > { %2042 = vperm.xlu0 %5802, %v7763_v12   ;;  %v1813_v41 = vmul.f32 1.442695, %v1795_v38 }
 0x489   : > { %v1716_v7 = vpop.permute.xlu1 %1715  ;;  %1982 = vperm.xlu1 %5803, %v7768_v20  }
 0x48a   : > { %v1793_v48 = vsub.f32 %v7445_v59, %v1716_v7  ;;  %v9376_v59 = vsub.f32 %v7634_v26, %v7643_v51  ;;  %v7786_v23 = vpop.eup %5904 }
 0x48b   : > { %v1731_v57 = vpop.permute.xlu0 %1730  ;;  %v7794_v45 = vpop.eup %5906 }
 0x48c   : > { %2032 = vperm.xlu0 %5802, %v7773_v25   ;;  %v1809_v37 = vmul.f32 1.442695, %v1793_v48  ;;  %v1711_v28 = vmul.f32 1.442695, %v9376_v59  ;;  %v1796_v5 = vsub.f32 %v7448_v17, %v1731_v57 }
 0x48d   : > { %v1721_v50 = vpop.permute.xlu1 %1720  ;;  %1987 = vperm.xlu1 %5803, %v7778_v31  }
 0x48e   : > { %v1794_v34 = vsub.f32 %v7450_v16, %v1721_v50  ;;  %5912 = vpow2.f32 %v1809_v37  ;;  %v9377_v16 = vsub.f32 %v7645_v42, %v7652_v62  ;;  %v1815_v10 = vmul.f32 1.442695, %v1796_v5 }
 0x48f   : > { %v2083_v0 = vpop.permute.xlu0 %2082 }
 0x490   : > { %v1811_v35 = vmul.f32 1.442695, %v1794_v34  ;;  %v1707_v51 = vmul.f32 1.442695, %v9377_v16 }
 0x491   : > { %v2085_v3 = vpop.permute.xlu1 %2084  ;;  %2007 = vperm.xlu1 %5803, %v7786_v23  }
 0x492   : > { %5914 = vpow2.f32 %v1811_v35  ;;  %5531 = vmatprep.subr.bf16.mxu0 %v2085_v3  ;;  %v7797_v22 = vpop.eup %5908 }
 0x493   : > { %5916 = vpow2.f32 %v1711_v28  ;;  %5532 = vmatpush3.bf16.msra.mxu0 %v2085_v3  ;;  %v2079_v26 = vpop.permute.xlu0 %2078  ;;  %v7800_v42 = vpop.eup %5910 }
 0x494   : > { %5533 = vmatprep.subr.bf16.mxu0 %v2083_v0  ;;  %5918 = vpow2.f32 %v1707_v51 }
 0x495   : > { %v2081_v17 = vpop.permute.xlu1 %2080  ;;  %1997 = vperm.xlu1 %5803, %v7794_v45   ;;  %5920 = vpow2.f32 %v1815_v10 }
 0x496   : > { %5922 = vpow2.f32 %v1813_v41 }
 0x497   : > { %5534 = vmatpush3.bf16.msra.mxu0 %v2083_v0  ;;  %v2075_v43 = vpop.permute.xlu0 %2074 }
 0x498   : > { %5535 = vmatprep.subr.bf16.mxu0 %v2081_v17 }
 0x499   : > { %v2077_v44 = vpop.permute.xlu1 %2076  ;;  %2027 = vperm.xlu1 %5803, %v7797_v22  }
 0x49b   : > { %5536 = vmatpush3.bf16.msra.mxu0 %v2081_v17  ;;  %v2321_v62 = vpop.permute.xlu0 %2320  ;;  %v5913_v8 = vpop.eup %5912  ;;  %v9378_v17 = vld [vmem:[#allocation38_spill] sm:$0xff] }
 0x49c   : > { %5537 = vmatprep.subr.bf16.mxu0 %v2079_v26 }
 0x49d   : > { %v2323_v33 = vpop.permute.xlu1 %2322  ;;  %2017 = vperm.xlu1 %5803, %v7800_v42  }
 0x49e   : > { %v2370_v34 = vsel %vm627_vm0, %v2323_v33, 0 }
 0x49f   : > { %v7803_v21 = vpop.eup %5914  ;;  %5538 = vmatpush3.bf16.msra.mxu0 %v2079_v26  ;;  %v1751_v53 = vpop.permute.xlu0 %1750 }
 0x4a0   : > { %v7805_v49 = vpop.eup %5916  ;;  %5539 = vmatprep.subr.bf16.mxu0 %v2077_v44  ;;  %v2066_v63 = vpack.c.bf16 %v7803_v21, %v5913_v8  ;;  %v1800_v60 = vsub.f32 %v7460_v18, %v1751_v53 }
 0x4a1   : > { %v2319_v19 = vpop.permute.xlu1 %2318  ;;  %2047 = vperm.xlu1 %5803, %v7805_v49   ;;  %v7810_v11 = vpop.eup %5918 }
 0x4a2   : > { %5543 = vmatprep.mubr.bf16.mxu0 %v2066_v63  ;;  %v5921_v4 = vpop.eup %5920  ;;  %v1823_v27 = vmul.f32 1.442695, %v1800_v60  ;;  %v2364_v26 = vsel %vm627_vm0, %v2319_v19, 0 }
 0x4a3   : > { %5540 = vmatpush3.bf16.msra.mxu0 %v2077_v44  ;;  %v1741_v1 = vpop.permute.xlu0 %1740  ;;  %v5923_v6 = vpop.eup %5922 }
 0x4a4   : > { %v1798_v15 = vsub.f32 %v7463_v61, %v1741_v1  ;;  %5541 = vmatprep.subr.bf16.mxu0 %v2075_v43  ;;  %v2067_v57 = vpack.c.bf16 %v5921_v4, %v5923_v6  ;;  %5924 = vpow2.f32 %v1823_v27 }
 0x4a5   : > { %v1746_v7 = vpop.permute.xlu1 %1745  ;;  %2037 = vperm.xlu1 %5803, %v7810_v11  }
 0x4a6   : > { %v1799_v48 = vsub.f32 %v7454_v58, %v1746_v7  ;;  %v1819_v54 = vmul.f32 1.442695, %v1798_v15  ;;  %v9381_v15 = vld [vmem:[#allocation21_spill] sm:$0xff] }
 0x4a7   : > { %5542 = vmatpush3.bf16.msra.mxu0 %v2075_v43  ;;  %v1766_v18 = vpop.permute.xlu0 %1765 }
 0x4a8   : > { %5703 = vmatprep.subr.msk.bf16.mxu0 %vm627_vm0, %v2323_v33  ;;  %v1821_v37 = vmul.f32 1.442695, %v1799_v48  ;;  %5926 = vpow2.f32 %v1819_v54  ;;  %v9382_v48 = vld [vmem:[#allocation42_spill] sm:$0xff] }
 0x4a9   : > { %v1736_v50 = vpop.permute.xlu1 %1735 }
 0x4aa   : > { %v1797_v61 = vsub.f32 %v7457_v52, %v1736_v50  ;;  %5544 = vmatmul.mubr.bf16.vlgmr.msra.gmra.mxu0 %v2067_v57  ;;  %5928 = vpow2.f32 %v1821_v37  ;;  %v2367_v52 = vsel %vm627_vm0, %v2321_v62, 0  ;;  %v9383_v50 = vld [vmem:[#allocation39_spill] sm:$0xff] }
 0x4ab   : > { %1878 = vadd.xlane.f32.xlu0 %v5923_v6  ;;  %5560 = vmatpush3.bf16.xpose.msra.mxu0 %v2370_v34  ;;  %v1756_v58 = vpop.permute.xlu0 %1755 }
 0x4ac   : > { %v1817_v59 = vmul.f32 1.442695, %v1797_v61  ;;  %5704 = vmatprep.subr.msk.bf16.mxu0 %vm627_vm0, %v2321_v62  ;;  %v1801_v41 = vsub.f32 %v9378_v17, %v1756_v58  ;;  %v9379_v62 = vld [vmem:[#allocation37_spill] sm:$0xff] }
 0x4ad   : > { %v1771_v28 = vpop.permute.xlu1 %1770  ;;  %v1803_v33 = vsub.f32 %v9379_v62, %v1766_v18 }
 0x4ae   : > { %5930 = vpow2.f32 %v1817_v59  ;;  %v1804_v0 = vsub.f32 %v7471_v24, %v1771_v28  ;;  %v1825_v63 = vmul.f32 1.442695, %v1801_v41 }
 0x4af   : > { %1874 = vadd.xlane.f32.xlu0 %v5913_v8  ;;  %v2317_v35 = vpop.permute.xlu0 %2316  ;;  %v1829_v27 = vmul.f32 1.442695, %v1803_v33 }
 0x4b0   : > { %v1831_v5 = vmul.f32 1.442695, %v1804_v0  ;;  %v2361_v7 = vsel %vm627_vm0, %v2317_v35, 0  ;;  %v9384_v0 = vld [vmem:[#allocation40_spill] sm:$0xff] }
 0x4b1   : > { %v5925_v3 = vpop.eup %5924 }
 0x4b2   : > { %5932 = vpow2.f32 %v1831_v5 }
 0x4b3   : > { %1880 = vadd.xlane.f32.xlu0 %v5921_v4  ;;  %5562 = vmatpush3.bf16.xpose.msra.mxu0 %v2367_v52  ;;  %5934 = vpow2.f32 %v1825_v63 }
 0x4b4   : > { %5705 = vmatprep.subr.msk.bf16.mxu0 %vm627_vm0, %v2319_v19  ;;  %v9380_v19 = vld [vmem:[#allocation41_spill] sm:$0xff] }
 0x4b5   : > { %v5927_v16 = vpop.eup %5926 }
 0x4b7   : > { %1888 = vadd.xlane.f32.xlu0 %v5925_v3  ;;  %v1781_v38 = vpop.permute.xlu0 %1780  ;;  %v5929_v51 = vpop.eup %5928 }
 0x4b8   : > { %v2069_v44 = vpack.c.bf16 %v5925_v3, %v5929_v51  ;;  %v1806_v6 = vsub.f32 %v9382_v48, %v1781_v38  ;;  %v9385_v3 = vld [vmem:[#allocation23_spill] sm:$0xff] }
 0x4ba   : > { %v1835_v34 = vmul.f32 1.442695, %v1806_v6  ;;  %v9387_v6 = vld [vmem:[#allocation25_spill] sm:$0xff] }
 0x4bb   : > { %v5931_v10 = vpop.eup %5930  ;;  %5564 = vmatpush3.bf16.xpose.msra.mxu0 %v2364_v26  ;;  %1884 = vadd.xlane.f32.xlu0 %v5927_v16  ;;  %v1791_v24 = vpop.permute.xlu0 %1790 }
 0x4bc   : > { %5706 = vmatprep.subr.msk.bf16.mxu0 %vm627_vm0, %v2317_v35  ;;  %v2068_v43 = vpack.c.bf16 %v5927_v16, %v5931_v10  ;;  %v1808_v1 = vsub.f32 %v9380_v19, %v1791_v24  ;;  %v9386_v24 = vld [vmem:[#allocation26_spill] sm:$0xff] }
 0x4be   : > { %5547 = vmatprep.mubr.bf16.mxu0 %v2068_v43  ;;  %v1839_v37 = vmul.f32 1.442695, %v1808_v1 }
 0x4bf   : > { %v5933_v8 = vpop.eup %5932  ;;  %5548 = vmatmul.mubr.bf16.gmra.mxu0 %v2069_v44  ;;  %v2313_v53 = vpop.permute.xlu0 %2312 }
 0x4c0   : > { %v1761_v60 = vpop.permute.xlu1 %1760  ;;  %1896 = vadd.xlane.f32.xlu0 %v5933_v8  ;;  %v5935_v43 = vpop.eup %5934  ;;  %v2355_v19 = vsel %vm627_vm0, %v2313_v53, 0 }
 0x4c1   : > { %v1802_v4 = vsub.f32 %v9381_v15, %v1761_v60 }
 0x4c3   : > { %v1827_v54 = vmul.f32 1.442695, %v1802_v4  ;;  %5566 = vmatpush3.bf16.xpose.msra.mxu0 %v2361_v7  ;;  %v7830_v57 = vpop.permute.xlu0 %2308 }
 0x4c4   : > { %v1786_v18 = vpop.permute.xlu1 %1785 }
 0x4c5   : > { %5936 = vpow2.f32 %v1827_v54  ;;  %v1807_v61 = vsub.f32 %v9383_v50, %v1786_v18  ;;  %v9388_v54 = vld [vmem:[#allocation24_spill] sm:$0xff] }
 0x4c6   : > { %5938 = vpow2.f32 %v1829_v27 }
 0x4c7   : > { %v7833_v59 = vpop.permute.xlu0 %2294  ;;  %v1837_v58 = vmul.f32 1.442695, %v1807_v61  ;;  %5940 = vpow2.f32 %v1839_v37 }
 0x4c8   : > { %v1776_v28 = vpop.permute.xlu1 %1775  ;;  %5942 = vpow2.f32 %v1835_v34 }
 0x4c9   : > { %v1805_v5 = vsub.f32 %v9384_v0, %v1776_v28  ;;  %1876 = vadd.xlane.f32.xlu1 %v7803_v21  ;;  %5944 = vpow2.f32 %v1837_v58 }
 0x4cb   : > { %v1833_v35 = vmul.f32 1.442695, %v1805_v5  ;;  %v1165_v52 = vpop.permute.xlu0 %1164 }
 0x4cc   : > { %v1226_v38 = vmul.f32 %v9385_v3, %v1165_v52  ;;  %v2315_v16 = vpop.permute.xlu1 %2314  ;;  %v9389_v52 = vld [vmem:[#allocation30_spill] sm:$0xff] }
 0x4cd   : > { %5946 = vpow2.f32 %v1833_v35  ;;  %1886 = vadd.xlane.f32.xlu1 %v5929_v51  ;;  %5707 = vmatprep.subr.msk.bf16.mxu0 %vm627_vm0, %v2315_v16  ;;  %v2358_v26 = vsel %vm627_vm0, %v2315_v16, 0  ;;  %v9390_v16 = vld [vmem:[#allocation28_spill] sm:$0xff] }
 0x4ce   : > { %v1395_v17 = vadd.f32 %v9386_v24, %v1226_v38  ;;  %5568 = vmatpush3.bf16.xpose.msra.mxu0 %v2358_v26 }
 0x4cf   : > { %v7841_v41 = vpop.permute.xlu0 %2298  ;;  %5708 = vmatprep.subr.msk.bf16.mxu0 %vm627_vm0, %v2313_v53 }
 0x4d0   : > { %1411 = vst.msk [vmem:[#allocation4 + $0x20] sm:$0xff] %vm627_vm0, %v1395_v17  ;;  %v2311_v21 = vpop.permute.xlu1 %2310 }
 0x4d1   : > { %1882 = vadd.xlane.f32.xlu1 %v5931_v10  ;;  %v2352_v58 = vsel %vm627_vm0, %v2311_v21, 0 }
 0x4d2   : > { %v5937_v44 = vpop.eup %5936 }
 0x4d3   : > { %v5939_v62 = vpop.eup %5938  ;;  %1892 = vadd.xlane.f32.xlu0 %v5937_v44  ;;  %v7845_v51 = vpop.permute.xlu0 %2300  ;;  %v2070_v33 = vpack.c.bf16 %v5937_v44, %v5935_v43  ;;  %v9391_v44 = vld [vmem:[#allocation29_spill] sm:$0xff] }
 0x4d4   : > { %v2293_v63 = vpop.permute.xlu1 %2292  ;;  %v2071_v60 = vpack.c.bf16 %v5933_v8, %v5939_v62  ;;  %v5941_v1 = vpop.eup %5940 }
 0x4d5   : > { %1894 = vadd.xlane.f32.xlu1 %v5939_v62  ;;  %5551 = vmatprep.mubr.bf16.mxu0 %v2070_v33  ;;  %v5943_v4 = vpop.eup %5942 }
 0x4d6   : > { %5552 = vmatmul.mubr.bf16.gmra.mxu0 %v2071_v60  ;;  %v5945_v7 = vpop.eup %5944 }
 0x4d7   : > { %1904 = vadd.xlane.f32.xlu0 %v5941_v1  ;;  %v1175_v15 = vpop.permute.xlu0 %1174  ;;  %5570 = vmatpush3.bf16.xpose.msra.mxu0 %v2355_v19  ;;  %v2073_v34 = vpack.c.bf16 %v5941_v1, %v5945_v7  ;;  %v9392_v19 = vld [vmem:[#allocation34_spill] sm:$0xff] }
 0x4d8   : > { %v1228_v10 = vmul.f32 %v9385_v3, %v1175_v15  ;;  %v1160_v27 = vpop.permute.xlu1 %1159  ;;  %5709 = vmatprep.subr.msk.bf16.mxu0 %vm627_vm0, %v2311_v21 }
 0x4d9   : > { %v1225_v48 = vmul.f32 %v9385_v3, %v1160_v27  ;;  %1890 = vadd.xlane.f32.xlu1 %v5935_v43  ;;  %v2349_v43 = vsel %vm627_vm0, %v7830_v57, 0  ;;  %v9393_v27 = vld [vmem:[#allocation33_spill] sm:$0xff] }
 0x4da   : > { %v5947_v8 = vpop.eup %5946  ;;  %v1397_v53 = vadd.f32 %v9387_v6, %v1228_v10 }
 0x4db   : > { %v1394_v18 = vadd.f32 %v9388_v54, %v1225_v48  ;;  %1900 = vadd.xlane.f32.xlu0 %v5943_v4  ;;  %v7853_v37 = vpop.permute.xlu0 %2306  ;;  %v2072_v50 = vpack.c.bf16 %v5943_v4, %v5947_v8  ;;  %v9394_v48 = vld [vmem:[#allocation27_spill] sm:$0xff]  ;;  %v9395_v54 = vld [vmem:[#allocation32_spill] sm:$0xff] }
 0x4dc   : > { %1413 = vst.msk [vmem:[#allocation4 + $0x30] sm:$0xff] %vm627_vm0, %v1397_v53  ;;  %v2297_v61 = vpop.permute.xlu1 %2296 }
 0x4dd   : > { %1410 = vst.msk [vmem:[#allocation4 + $0x18] sm:$0xff] %vm627_vm0, %v1394_v18  ;;  %1902 = vadd.xlane.f32.xlu1 %v5945_v7  ;;  %5555 = vmatprep.mubr.bf16.mxu0 %v2072_v50 }
 0x4de   : > { %5556 = vmatmul.mubr.bf16.gmra.mxu0 %v2073_v34 }
 0x4df   : > { %v1185_v28 = vpop.permute.xlu0 %1184  ;;  %5572 = vmatpush3.bf16.xpose.msra.mxu0 %v2352_v58  ;;  %5575 = vmatprep.mubr.msk.bf16.mxu0 %vm627_vm0, %v2293_v63 }
 0x4e0   : > { %v1230_v0 = vmul.f32 %v9385_v3, %v1185_v28  ;;  %v1170_v5 = vpop.permute.xlu1 %1169  ;;  %5710 = vmatprep.subr.msk.bf16.mxu0 %vm627_vm0, %v7830_v57 }
 0x4e1   : > { %v1227_v35 = vmul.f32 %v9385_v3, %v1170_v5  ;;  %1898 = vadd.xlane.f32.xlu1 %v5947_v8 }
 0x4e2   : > { %v1399_v38 = vadd.f32 %v9389_v52, %v1230_v0  ;;  %v9397_v0 = vld [vmem:[#allocation36_spill] sm:$0xff] }
 0x4e3   : > { %v1396_v26 = vadd.f32 %v9390_v16, %v1227_v35  ;;  %v1195_v24 = vpop.permute.xlu0 %1194 }
 0x4e4   : > { %1415 = vst.msk [vmem:[#allocation4 + $0x40] sm:$0xff] %vm627_vm0, %v1399_v38  ;;  %v1232_v17 = vmul.f32 %v9385_v3, %v1195_v24  ;;  %v2303_v21 = vpop.permute.xlu1 %2302 }
 0x4e5   : > { %1412 = vst.msk [vmem:[#allocation4 + $0x28] sm:$0xff] %vm627_vm0, %v1396_v26 }
 0x4e6   : > { %v1401_v62 = vadd.f32 %v9391_v44, %v1232_v17 }
 0x4e7   : > { %v1205_v33 = vpop.permute.xlu0 %1204  ;;  %5574 = vmatpush3.bf16.xpose.msra.mxu0 %v2349_v43 }
 0x4e8   : > { %1417 = vst.msk [vmem:[#allocation4 + $0x50] sm:$0xff] %vm627_vm0, %v1401_v62  ;;  %v1234_v63 = vmul.f32 %v9385_v3, %v1205_v33  ;;  %v2305_v60 = vpop.permute.xlu1 %2304  ;;  %v1844_v33 = vld [vmem:[#allocation3 + $0x90] sm:$0xff] }
 0x4ea   : > { %v1403_v1 = vadd.f32 %v9392_v19, %v1234_v63  ;;  %v1860_v63 = vmul.f32 %v7768_v20, %v1844_v33  ;;  %v1842_v19 = vld [vmem:[#allocation3 + $0x80] sm:$0xff]  ;;  %v1849_v20 = vld [vmem:[#allocation3 + $0xb8] sm:$0xff] }
 0x4eb   : > { %v1215_v15 = vpop.permute.xlu0 %1214 }
 0x4ec   : > { %1419 = vst.msk [vmem:[#allocation4 + $0x60] sm:$0xff] %vm627_vm0, %v1403_v1  ;;  %v1236_v4 = vmul.f32 %v9385_v3, %v1215_v15  ;;  %v1180_v10 = vpop.permute.xlu1 %1179 }
 0x4ed   : > { %v1229_v57 = vmul.f32 %v9385_v3, %v1180_v10 }
 0x4ee   : > { %v1405_v7 = vadd.f32 %v9393_v27, %v1236_v4  ;;  %5576 = vmatmul.mubr.msk.bf16.vlgmr.msra.gmra.mxu0 %vm627_vm0, %v7833_v59  ;;  %v9396_v59 = vld [vmem:[#allocation31_spill] sm:$0xff]  ;;  %v1858_v4 = vmul.f32 %v7759_v2, %v1842_v19 }
 0x4ef   : > { %v1398_v8 = vadd.f32 %v9394_v48, %v1229_v57  ;;  %5579 = vmatprep.mubr.msk.bf16.mxu0 %vm627_vm0, %v2297_v61  ;;  %v1845_v57 = vld [vmem:[#allocation3 + $0x98] sm:$0xff] }
 0x4f0   : > { %1421 = vst.msk [vmem:[#allocation4 + $0x70] sm:$0xff] %vm627_vm0, %v1405_v7  ;;  %v1190_v6 = vpop.permute.xlu1 %1189  ;;  %v1861_v7 = vmul.f32 %v7778_v31, %v1845_v57 }
 0x4f1   : > { %1414 = vst.msk [vmem:[#allocation4 + $0x38] sm:$0xff] %vm627_vm0, %v1398_v8  ;;  %v1231_v53 = vmul.f32 %v9385_v3, %v1190_v6 }
 0x4f3   : > { %v1400_v18 = vadd.f32 %v9395_v54, %v1231_v53  ;;  %v1865_v53 = vmul.f32 %v7786_v23, %v1849_v20 }
 0x4f4   : > { %v1200_v50 = vpop.permute.xlu1 %1199 }
 0x4f5   : > { %1416 = vst.msk [vmem:[#allocation4 + $0x48] sm:$0xff] %vm627_vm0, %v1400_v18  ;;  %v1233_v34 = vmul.f32 %v9385_v3, %v1200_v50  ;;  %v1847_v18 = vld [vmem:[#allocation3 + $0xa8] sm:$0xff] }
 0x4f6   : > { %5580 = vmatmul.mubr.msk.bf16.gmra.mxu0 %vm627_vm0, %v7841_v41  ;;  %v9398_v41 = vld [vmem:[#allocation35_spill] sm:$0xff] }
 0x4f7   : > { %v1402_v58 = vadd.f32 %v9396_v59, %v1233_v34  ;;  %5583 = vmatprep.mubr.msk.bf16.mxu0 %vm627_vm0, %v7845_v51  ;;  %v7904_v51 = vpop.permute.xlu0 %1977  ;;  %v1863_v34 = vmul.f32 %v7794_v45, %v1847_v18  ;;  %v1848_v45 = vld [vmem:[#allocation3 + $0xb0] sm:$0xff]  ;;  %v1855_v18 = vld [vmem:[#allocation3 + $0xe8] sm:$0xff] }
 0x4f8   : > { %v1210_v61 = vpop.permute.xlu1 %1209  ;;  %v1864_v33 = vmul.f32 %v7740_v46, %v1848_v45 }
 0x4f9   : > { %1418 = vst.msk [vmem:[#allocation4 + $0x58] sm:$0xff] %vm627_vm0, %v1402_v58  ;;  %v1235_v28 = vmul.f32 %v9385_v3, %v1210_v61  ;;  %v1853_v58 = vld [vmem:[#allocation3 + $0xd8] sm:$0xff] }
 0x4fb   : > { %v1404_v5 = vadd.f32 %v9397_v0, %v1235_v28  ;;  %v7906_v16 = vpop.permute.xlu0 %1992  ;;  %v1869_v28 = vmul.f32 %v7797_v22, %v1853_v58  ;;  %v1851_v22 = vld [vmem:[#allocation3 + $0xc8] sm:$0xff] }
 0x4fc   : > { %v1220_v35 = vpop.permute.xlu1 %1219 }
 0x4fd   : > { %1420 = vst.msk [vmem:[#allocation4 + $0x68] sm:$0xff] %vm627_vm0, %v1404_v5  ;;  %v1237_v52 = vmul.f32 %v9385_v3, %v1220_v35  ;;  %v1843_v35 = vld [vmem:[#allocation3 + $0x88] sm:$0xff] }
 0x4fe   : > { %5584 = vmatmul.mubr.msk.bf16.gmra.mxu0 %vm627_vm0, %v2303_v21 }
 0x4ff   : > { %v1406_v38 = vadd.f32 %v9398_v41, %v1237_v52  ;;  %5587 = vmatprep.mubr.msk.bf16.mxu0 %vm627_vm0, %v2305_v60  ;;  %v7908_v26 = vpop.permute.xlu0 %2002  ;;  %v1859_v52 = vmul.f32 %v7720_v47, %v1843_v35  ;;  %v1867_v47 = vmul.f32 %v7800_v42, %v1851_v22 }
 0x500   : > { %v7912_v3 = vpop.permute.xlu1 %1972 }
 0x501   : > { %1422 = vst.msk [vmem:[#allocation4 + $0x78] sm:$0xff] %vm627_vm0, %v1406_v38 }
 0x503   : > { %v7910_v24 = vpop.permute.xlu0 %2022 }
 0x504   : > { %v7916_v21 = vpop.permute.xlu1 %1982 }
 0x506   : > { %5588 = vmatmul.mubr.msk.bf16.gmra.mxu0 %vm627_vm0, %v7853_v37 }
 0x507   : > { %v7914_v17 = vpop.permute.xlu0 %2012 }
 0x508   : > { %v7920_v44 = vpop.permute.xlu1 %1987 }
 0x50b   : > { %v7918_v43 = vpop.permute.xlu0 %2042 }
 0x50c   : > { %v7924_v37 = vpop.permute.xlu1 %2007 }
 0x50f   : > { %v7922_v62 = vpop.permute.xlu0 %2032 }
 0x510   : > { %v7927_v15 = vpop.permute.xlu1 %1997 }
 0x514   : > { %v7933_v48 = vpop.permute.xlu1 %2027 }
 0x518   : > { %v7937_v2 = vpop.permute.xlu1 %2017 }
 0x51c   : > { %v7942_v61 = vpop.permute.xlu1 %2047 }
 0x520   : > { %v7946_v5 = vpop.permute.xlu1 %2037 }
 0x534   : > { %v1879_v60 = vpop.xlane.xlu0 %1878 }
 0x535   : > { %v1908_v1 = vadd.f32 %v1879_v60, %v1860_v63  ;;  %v1846_v60 = vld [vmem:[#allocation3 + $0xa0] sm:$0xff] }
 0x537   : > { %1924 = vst.msk [vmem:[#allocation3 + $0x90] sm:$0xff] %vm338_vm1, %v1908_v1  ;;  %v1862_v1 = vmul.f32 %v7730_v14, %v1846_v60 }
 0x538   : > { %v1875_v10 = vpop.xlane.xlu0 %1874 }
 0x539   : > { %v1906_v27 = vadd.f32 %v1875_v10, %v1858_v4  ;;  %v1852_v10 = vld [vmem:[#allocation3 + $0xd0] sm:$0xff] }
 0x53a   : > { %v1868_v46 = vmul.f32 %v7747_v56, %v1852_v10  ;;  %v1871_v56 = vmul.f32 %v7810_v11, %v1855_v18 }
 0x53b   : > { %1922 = vst.msk [vmem:[#allocation3 + $0x80] sm:$0xff] %vm338_vm1, %v1906_v27 }
 0x53c   : > { %v1881_v8 = vpop.xlane.xlu0 %1880 }
 0x53d   : > { %v1909_v6 = vadd.f32 %v1881_v8, %v1861_v7  ;;  %v1857_v7 = vld [vmem:[#allocation3 + $0xf8] sm:$0xff] }
 0x53f   : > { %1925 = vst.msk [vmem:[#allocation3 + $0x98] sm:$0xff] %vm338_vm1, %v1909_v6  ;;  %v1850_v6 = vld [vmem:[#allocation3 + $0xc0] sm:$0xff] }
 0x540   : > { %v1889_v54 = vpop.xlane.xlu0 %1888  ;;  %v1866_v42 = vmul.f32 %v7754_v32, %v1850_v6  ;;  %v1956_v6 = vld [vmem:[#allocation4 + $0x10] sm:$0xff] }
 0x541   : > { %v1913_v50 = vadd.f32 %v1889_v54, %v1865_v53  ;;  %v1873_v54 = vmul.f32 %v7805_v49, %v1857_v7 }
 0x543   : > { %1929 = vst.msk [vmem:[#allocation3 + $0xb8] sm:$0xff] %vm338_vm1, %v1913_v50 }
 0x544   : > { %v1885_v59 = vpop.xlane.xlu0 %1884 }
 0x545   : > { %v1911_v31 = vadd.f32 %v1885_v59, %v1863_v34  ;;  %v1856_v59 = vld [vmem:[#allocation3 + $0xf0] sm:$0xff] }
 0x546   : > { %v1872_v49 = vmul.f32 %v7763_v12, %v1856_v59 }
 0x547   : > { %1927 = vst.msk [vmem:[#allocation3 + $0xa8] sm:$0xff] %vm338_vm1, %v1911_v31 }
 0x549   : > { %v1897_v0 = vpop.xlane.xlu0 %1896 }
 0x54a   : > { %v1917_v23 = vadd.f32 %v1897_v0, %v1869_v28 }
 0x54c   : > { %1933 = vst.msk [vmem:[#allocation3 + $0xd8] sm:$0xff] %vm338_vm1, %v1917_v23  ;;  %v1854_v23 = vld [vmem:[#allocation3 + $0xe0] sm:$0xff] }
 0x54d   : > { %v1870_v32 = vmul.f32 %v7773_v25, %v1854_v23 }
 0x552   : > { %v1877_v41 = vpop.xlane.xlu1 %1876 }
 0x553   : > { %v1907_v38 = vadd.f32 %v1877_v41, %v1859_v52 }
 0x555   : > { %1923 = vst.msk [vmem:[#allocation3 + $0x88] sm:$0xff] %vm338_vm1, %v1907_v38 }
 0x556   : > { %v1887_v63 = vpop.xlane.xlu1 %1886 }
 0x557   : > { %v1912_v19 = vadd.f32 %v1887_v63, %v1864_v33 }
 0x559   : > { %1928 = vst.msk [vmem:[#allocation3 + $0xb0] sm:$0xff] %vm338_vm1, %v1912_v19 }
 0x55a   : > { %v1883_v4 = vpop.xlane.xlu1 %1882 }
 0x55b   : > { %v1910_v57 = vadd.f32 %v1883_v4, %v1862_v1 }
 0x55c   : > { %v1893_v27 = vpop.xlane.xlu0 %1892 }
 0x55d   : > { %1926 = vst.msk [vmem:[#allocation3 + $0xa0] sm:$0xff] %vm338_vm1, %v1910_v57  ;;  %v1915_v8 = vadd.f32 %v1893_v27, %v1867_v47 }
 0x55e   : > { %v1895_v20 = vpop.xlane.xlu1 %1894 }
 0x55f   : > { %1931 = vst.msk [vmem:[#allocation3 + $0xc8] sm:$0xff] %vm338_vm1, %v1915_v8  ;;  %v1916_v53 = vadd.f32 %v1895_v20, %v1868_v46 }
 0x560   : > { %v1905_v14 = vpop.xlane.xlu0 %1904 }
 0x561   : > { %1932 = vst.msk [vmem:[#allocation3 + $0xd0] sm:$0xff] %vm338_vm1, %v1916_v53  ;;  %v1921_v50 = vadd.f32 %v1905_v14, %v1873_v54  ;;  %v2052_v53 = vmul.f32 %v7916_v21, %v1956_v6  ;;  %v6218_v54 = vld [vmem:[%s7033_s18 + $0x30] sm:$0xff]  }
 0x562   : > { %v1891_v34 = vpop.xlane.xlu1 %1890 }
 0x563   : > { %1937 = vst.msk [vmem:[#allocation3 + $0xf8] sm:$0xff] %vm338_vm1, %v1921_v50  ;;  %v1914_v31 = vadd.f32 %v1891_v34, %v1866_v42  ;;  %v1954_v50 = vld [vmem:[#allocation4] sm:$0xff]  ;;  %v1957_v42 = vld [vmem:[#allocation4 + $0x18] sm:$0xff] }
 0x564   : > { %v1901_v58 = vpop.xlane.xlu0 %1900  ;;  %v2050_v34 = vmul.f32 %v7912_v3, %v1954_v50  ;;  %v2053_v59 = vmul.f32 %v7920_v44, %v1957_v42  ;;  %v1965_v50 = vld [vmem:[#allocation4 + $0x58] sm:$0xff] }
 0x565   : > { %1930 = vst.msk [vmem:[#allocation3 + $0xc0] sm:$0xff] %vm338_vm1, %v1914_v31  ;;  %v1919_v28 = vadd.f32 %v1901_v58, %v1871_v56  ;;  %v6219_v31 = vld [vmem:[%s7033_s18 + $0x38] sm:$0xff]  }
 0x566   : > { %v1903_v0 = vpop.xlane.xlu1 %1902 }
 0x567   : > { %1935 = vst.msk [vmem:[#allocation3 + $0xe8] sm:$0xff] %vm338_vm1, %v1919_v28  ;;  %v1920_v35 = vadd.f32 %v1903_v0, %v1872_v49  ;;  %v1955_v49 = vld [vmem:[#allocation4 + $0x8] sm:$0xff] }
 0x568   : > { %v2051_v0 = vmul.f32 %v7904_v51, %v1955_v49 }
 0x569   : > { %1936 = vst.msk [vmem:[#allocation3 + $0xf0] sm:$0xff] %vm338_vm1, %v1920_v35 }
 0x56a   : > { %v5545_v52 = vpop.f32.mrf.mxu0  ;;  %v1899_v41 = vpop.xlane.xlu1 %1898 }
 0x56b   : > { %v1918_v45 = vadd.f32 %v1899_v41, %v1870_v32  ;;  %2215 = vrot.lane.b32.xlu0 %v5545_v52, %s6425_s28  ;;  %v1960_v52 = vld [vmem:[#allocation4 + $0x30] sm:$0xff] }
 0x56c   : > { %v2132_v11 = vpop.f32.mrf.mxu0  ;;  %v2056_v41 = vmul.f32 %v7908_v26, %v1960_v52 }
 0x56d   : > { %1934 = vst.msk [vmem:[#allocation3 + $0xe0] sm:$0xff] %vm338_vm1, %v1918_v45 }
 0x56e   : > { %v5546_v38 = vpop.f32.mrf.mxu0 }
 0x56f   : > { %2217 = vrot.lane.b32.xlu1 %v5546_v38, %s6425_s28  ;;  %2211 = vrot.lane.b32.xlu0 %v2132_v11, %s6425_s28  ;;  %v1958_v38 = vld [vmem:[#allocation4 + $0x20] sm:$0xff] }
 0x570   : > { %v2135_v12 = vpop.f32.mrf.mxu0 }
 0x573   : > { %2213 = vrot.lane.b32.xlu1 %v2135_v12, %s6425_s28  ;;  %v1961_v12 = vld [vmem:[#allocation4 + $0x38] sm:$0xff] }
 0x57f   : > { %v5549_v33 = vpop.f32.mrf.mxu0 }
 0x580   : > { %2223 = vrot.lane.b32.xlu0 %v5549_v33, %s6425_s28  ;;  %v2054_v33 = vmul.f32 %v7906_v16, %v1958_v38 }
 0x581   : > { %v2148_v25 = vpop.f32.mrf.mxu0 }
 0x583   : > { %v5550_v63 = vpop.f32.mrf.mxu0 }
 0x584   : > { %2225 = vrot.lane.b32.xlu1 %v5550_v63, %s6425_s28  ;;  %2219 = vrot.lane.b32.xlu0 %v2148_v25, %s6425_s28  ;;  %v2057_v25 = vmul.f32 %v7924_v37, %v1961_v12 }
 0x585   : > { %v2151_v60 = vpop.f32.mrf.mxu0 }
 0x588   : > { %2221 = vrot.lane.b32.xlu1 %v2151_v60, %s6425_s28 }
 0x596   : > { %v5553_v19 = vpop.f32.mrf.mxu0 }
 0x597   : > { %2231 = vrot.lane.b32.xlu0 %v5553_v19, %s6425_s28 }
 0x598   : > { %v2164_v22 = vpop.f32.mrf.mxu0 }
 0x59a   : > { %v5554_v1 = vpop.f32.mrf.mxu0 }
 0x59b   : > { %2233 = vrot.lane.b32.xlu1 %v5554_v1, %s6425_s28  ;;  %2227 = vrot.lane.b32.xlu0 %v2164_v22, %s6425_s28 }
 0x59c   : > { %v2167_v4 = vpop.f32.mrf.mxu0 }
 0x59e   : > { %v5557_v10 = vpop.f32.mrf.mxu0 }
 0x59f   : > { %2229 = vrot.lane.b32.xlu1 %v2167_v4, %s6425_s28  ;;  %2239 = vrot.lane.b32.xlu0 %v5557_v10, %s6425_s28  ;;  %v1959_v4 = vld [vmem:[#allocation4 + $0x28] sm:$0xff] }
 0x5a0   : > { %v2180_v57 = vpop.f32.mrf.mxu0  ;;  %v2055_v26 = vmul.f32 %v7927_v15, %v1959_v4  ;;  %v8073_v4 = vld [vmem:[#allocation2 + $0x100] sm:$0xff] }
 0x5a2   : > { %v5558_v47 = vpop.f32.mrf.mxu0 }
 0x5a3   : > { %2235 = vrot.lane.b32.xlu0 %v2180_v57, %s6425_s28  ;;  %2241 = vrot.lane.b32.xlu1 %v5558_v47, %s6425_s28 }
 0x5a4   : > { %v2183_v27 = vpop.f32.mrf.mxu0 }
 0x5a7   : > { %2237 = vrot.lane.b32.xlu1 %v2183_v27, %s6425_s28  ;;  %v1964_v27 = vld [vmem:[#allocation4 + $0x50] sm:$0xff] }
 0x5a8   : > { %v2060_v6 = vmul.f32 %v7910_v24, %v1964_v27 }
 0x5ae   : > { %v7984_v7 = vpop.f32.mrf.mxu0 }
 0x5b0   : > { %v7986_v8 = vpop.f32.mrf.mxu0 }
 0x5b2   : > { %v7989_v46 = vpop.f32.mrf.mxu0 }
 0x5b4   : > { %v7992_v20 = vpop.f32.mrf.mxu0 }
 0x5b6   : > { %v8007_v35 = vpop.f32.mrf.mxu0 }
 0x5b8   : > { %v8010_v44 = vpop.f32.mrf.mxu0 }
 0x5ba   : > { %v8012_v32 = vpop.f32.mrf.mxu0 }
 0x5bc   : > { %v8015_v51 = vpop.f32.mrf.mxu0 }
 0x5be   : > { %v8020_v63 = vpop.f32.mrf.mxu0 }
 0x5c0   : > { %v8025_v57 = vpop.f32.mrf.mxu0 }
 0x5c2   : > { %2490 = vmax.xlane.f32.xlu0 %v7984_v7  ;;  %v8028_v37 = vpop.f32.mrf.mxu0 }
 0x5c4   : > { %v8032_v47 = vpop.f32.mrf.mxu0 }
 0x5c6   : > { %2486 = vmax.xlane.f32.xlu0 %v7986_v8  ;;  %v8036_v15 = vpop.f32.mrf.mxu0 }
 0x5ca   : > { %2492 = vmax.xlane.f32.xlu0 %v7989_v46 }
 0x5cb   : > { %2488 = vmax.xlane.f32.xlu1 %v7992_v20 }
 0x5dc   : > { %2955 = vrot.lane.b32.xlu1 %v6218_v54, %s6424_s7  ;;  %v8041_v54 = vpop.f32.mrf.mxu0 }
 0x5dd   : > { %v2216_v14 = vpop.permute.xlu0 %2215 }
 0x5de   : > { %v2261_v18 = vadd.f32 %v2216_v14, %v2052_v53 }
 0x5e0   : > { %2278 = vst.msk [vmem:[#allocation4 + $0x10] sm:$0xff] %vm2275_vm2, %v2261_v18  ;;  %2957 = vrot.lane.b32.xlu0 %v6219_v31, %s6424_s7  ;;  %v1962_v18 = vld [vmem:[#allocation4 + $0x40] sm:$0xff]  ;;  %v8048_v31 = vpop.f32.mrf.mxu0 }
 0x5e1   : > { %v2218_v56 = vpop.permute.xlu1 %2217  ;;  %v2212_v58 = vpop.permute.xlu0 %2211  ;;  %v2058_v42 = vmul.f32 %v7914_v17, %v1962_v18 }
 0x5e2   : > { %v2262_v21 = vadd.f32 %v2218_v56, %v2053_v59  ;;  %v2259_v28 = vadd.f32 %v2212_v58, %v2050_v34  ;;  %v2061_v34 = vmul.f32 %v7933_v48, %v1965_v50 }
 0x5e4   : > { %2279 = vst.msk [vmem:[#allocation4 + $0x18] sm:$0xff] %vm2275_vm2, %v2262_v21  ;;  %2276 = vst.msk [vmem:[#allocation4] sm:$0xff] %vm2275_vm2, %v2259_v28  ;;  %v1968_v21 = vld [vmem:[#allocation4 + $0x70] sm:$0xff]  ;;  %v1963_v28 = vld [vmem:[#allocation4 + $0x48] sm:$0xff] }
 0x5e5   : > { %v2214_v23 = vpop.permute.xlu1 %2213  ;;  %v2064_v49 = vmul.f32 %v7918_v43, %v1968_v21  ;;  %v2059_v17 = vmul.f32 %v7937_v2, %v1963_v28  ;;  %v6222_v21 = vld [vmem:[%s7033_s18 + $0x8] sm:$0xff]  }
 0x5e6   : > { %v2260_v3 = vadd.f32 %v2214_v23, %v2051_v0  ;;  %v8056_v23 = vpop.f32.mrf.mxu0  ;;  %v6223_v28 = vld [vmem:[%s6602_s5 + $0x28] sm:$0xff]  }
 0x5e8   : > { %2277 = vst.msk [vmem:[#allocation4 + $0x8] sm:$0xff] %vm2275_vm2, %v2260_v3 }
 0x5f2   : > { %v2224_v45 = vpop.permute.xlu0 %2223 }
 0x5f3   : > { %v2265_v11 = vadd.f32 %v2224_v45, %v2056_v41  ;;  %v1966_v41 = vld [vmem:[#allocation4 + $0x60] sm:$0xff]  ;;  %v1969_v45 = vld [vmem:[#allocation4 + $0x78] sm:$0xff] }
 0x5f4   : > { %v2062_v43 = vmul.f32 %v7922_v62, %v1966_v41  ;;  %v2065_v2 = vmul.f32 %v7942_v61, %v1969_v45  ;;  %v8068_v61 = vld [vmem:[#allocation2 + $0x110] sm:$0xff] }
 0x5f5   : > { %2282 = vst.msk [vmem:[#allocation4 + $0x30] sm:$0xff] %vm2275_vm2, %v2265_v11  ;;  %v8128_v41 = vld [vmem:[#allocation2 + $0x130] sm:$0xff] }
 0x5f6   : > { %v2226_v60 = vpop.permute.xlu1 %2225  ;;  %v2220_v19 = vpop.permute.xlu0 %2219 }
 0x5f7   : > { %v2266_v22 = vadd.f32 %v2226_v60, %v2057_v25  ;;  %v2263_v1 = vadd.f32 %v2220_v19, %v2054_v33  ;;  %v1967_v25 = vld [vmem:[#allocation4 + $0x68] sm:$0xff] }
 0x5f8   : > { %v2063_v60 = vmul.f32 %v7946_v5, %v1967_v25  ;;  %v6231_v5 = vld [vmem:[%s6602_s5 + $0x10] sm:$0xff]  }
 0x5f9   : > { %2283 = vst.msk [vmem:[#allocation4 + $0x38] sm:$0xff] %vm2275_vm2, %v2266_v22  ;;  %2280 = vst.msk [vmem:[#allocation4 + $0x20] sm:$0xff] %vm2275_vm2, %v2263_v1 }
 0x5fa   : > { %v2222_v10 = vpop.permute.xlu1 %2221 }
 0x5fb   : > { %v2264_v16 = vadd.f32 %v2222_v10, %v2055_v26 }
 0x5fd   : > { %2281 = vst.msk [vmem:[#allocation4 + $0x28] sm:$0xff] %vm2275_vm2, %v2264_v16  ;;  %v8083_v16 = vld [vmem:[#allocation2 + $0x118] sm:$0xff] }
 0x5ff   : > { %2500 = vmax.xlane.f32.xlu0 %v8012_v32 }
 0x600   : > { %2498 = vmax.xlane.f32.xlu1 %v8007_v35 }
 0x603   : > { %2496 = vmax.xlane.f32.xlu0 %v8015_v51 }
 0x604   : > { %2494 = vmax.xlane.f32.xlu1 %v8010_v44 }
 0x607   : > { %2508 = vmax.xlane.f32.xlu0 %v8028_v37 }
 0x608   : > { %2506 = vmax.xlane.f32.xlu1 %v8020_v63 }
 0x609   : > { %v2232_v53 = vpop.permute.xlu0 %2231 }
 0x60a   : > { %v2269_v14 = vadd.f32 %v2232_v53, %v2060_v6  ;;  %v8090_v6 = vld [vmem:[#allocation2 + $0x108] sm:$0xff] }
 0x60b   : > { %2504 = vmax.xlane.f32.xlu0 %v8032_v47  ;;  %v6220_v53 = vld [vmem:[%s7033_s18 + $0x28] sm:$0xff]  }
 0x60c   : > { %2286 = vst.msk [vmem:[#allocation4 + $0x50] sm:$0xff] %vm2275_vm2, %v2269_v14  ;;  %2502 = vmax.xlane.f32.xlu1 %v8025_v57 }
 0x60d   : > { %v2234_v59 = vpop.permute.xlu1 %2233  ;;  %v2228_v24 = vpop.permute.xlu0 %2227 }
 0x60e   : > { %v2270_v56 = vadd.f32 %v2234_v59, %v2061_v34  ;;  %v2267_v58 = vadd.f32 %v2228_v24, %v2058_v42  ;;  %v6221_v59 = vld [vmem:[%s7033_s18 + $0x18] sm:$0xff]  }
 0x60f   : > { %2516 = vmax.xlane.f32.xlu0 %v8048_v31  ;;  %v6230_v34 = vld [vmem:[%s6602_s5 + $0x18] sm:$0xff]  }
 0x610   : > { %2287 = vst.msk [vmem:[#allocation4 + $0x58] sm:$0xff] %vm2275_vm2, %v2270_v56  ;;  %2284 = vst.msk [vmem:[#allocation4 + $0x40] sm:$0xff] %vm2275_vm2, %v2267_v58  ;;  %2514 = vmax.xlane.f32.xlu1 %v8036_v15 }
 0x611   : > { %v2230_v48 = vpop.permute.xlu1 %2229  ;;  %v2240_v0 = vpop.permute.xlu0 %2239 }
 0x612   : > { %v2268_v3 = vadd.f32 %v2230_v48, %v2059_v17  ;;  %v2273_v52 = vadd.f32 %v2240_v0, %v2064_v49  ;;  %v6224_v49 = vld [vmem:[%s7033_s18 + $0x20] sm:$0xff]   ;;  %v6225_v17 = vld [vmem:[%s7033_s18 + $0x10] sm:$0xff]   ;;  %v6227_v0 = vld [vmem:[%s6602_s5 + $0x38] sm:$0xff]  }
 0x613   : > { %2512 = vmax.xlane.f32.xlu0 %v8056_v23  ;;  %v6226_v48 = vld [vmem:[%s7033_s18] sm:$0xff]  }
 0x614   : > { %2285 = vst.msk [vmem:[#allocation4 + $0x48] sm:$0xff] %vm2275_vm2, %v2268_v3  ;;  %2290 = vst.msk [vmem:[#allocation4 + $0x70] sm:$0xff] %vm2275_vm2, %v2273_v52  ;;  %2510 = vmax.xlane.f32.xlu1 %v8041_v54  ;;  %v6228_v3 = vld [vmem:[%s6602_s5 + $0x30] sm:$0xff]   ;;  %v8126_v52 = vld [vmem:[#allocation2 + $0x138] sm:$0xff] }
 0x615   : > { %v2242_v11 = vpop.permute.xlu1 %2241  ;;  %v2236_v38 = vpop.permute.xlu0 %2235 }
 0x616   : > { %v2274_v12 = vadd.f32 %v2242_v11, %v2065_v2  ;;  %v2271_v33 = vadd.f32 %v2236_v38, %v2062_v43  ;;  %v8136_v38 = vld [vmem:[#allocation2 + $0x128] sm:$0xff] }
 0x618   : > { %2291 = vst.msk [vmem:[#allocation4 + $0x78] sm:$0xff] %vm2275_vm2, %v2274_v12  ;;  %2288 = vst.msk [vmem:[#allocation4 + $0x60] sm:$0xff] %vm2275_vm2, %v2271_v33  ;;  %v2474_v12 = vld [vmem:[#allocation2 + $0x120] sm:$0xff] }
 0x619   : > { %v2238_v62 = vpop.permute.xlu1 %2237 }
 0x61a   : > { %v2272_v19 = vadd.f32 %v2238_v62, %v2063_v60 }
 0x61c   : > { %2289 = vst.msk [vmem:[#allocation4 + $0x68] sm:$0xff] %vm2275_vm2, %v2272_v19  ;;  %v8147_v19 = vld [vmem:[#allocation2 + $0x158] sm:$0xff] }
 0x64b   : > { %v2491_v22 = vpop.xlane.xlu0 %2490 }
 0x64c   : > { %v8071_v1 = vmax.f32 %v8068_v61, %v2491_v22  ;;  %v2480_v22 = vld [vmem:[#allocation2 + $0x150] sm:$0xff] }
 0x64e   : > { %2809 = vst.msk [vmem:[#allocation2 + $0x110] sm:$0xff] %vm338_vm1, %v8071_v1  ;;  %2594 = vperm.xlu0 %5802, %v8071_v1  }
 0x64f   : > { %v2487_v26 = vpop.xlane.xlu0 %2486 }
 0x650   : > { %v8081_v10 = vmax.f32 %v8073_v4, %v2487_v26 }
 0x652   : > { %2807 = vst.msk [vmem:[#allocation2 + $0x100] sm:$0xff] %vm338_vm1, %v8081_v10  ;;  %2584 = vperm.xlu1 %5803, %v8081_v10   ;;  %2953 = vrot.lane.b32.xlu0 %v6220_v53, %s6424_s7 }
 0x653   : > { %v2493_v14 = vpop.xlane.xlu0 %2492 }
 0x654   : > { %v8095_v18 = vmax.f32 %v8083_v16, %v2493_v14  ;;  %v2489_v50 = vpop.xlane.xlu1 %2488 }
 0x655   : > { %v8098_v42 = vmax.f32 %v8090_v6, %v2489_v50 }
 0x656   : > { %2810 = vst.msk [vmem:[#allocation2 + $0x118] sm:$0xff] %vm338_vm1, %v8095_v18  ;;  %2949 = vrot.lane.b32.xlu0 %v6221_v59, %s6424_s7  ;;  %v8155_v59 = vld [vmem:[#allocation2 + $0x148] sm:$0xff] }
 0x657   : > { %v2535_v24 = vsub.f32 %v8090_v6, %v8098_v42  ;;  %2808 = vst.msk [vmem:[#allocation2 + $0x108] sm:$0xff] %vm338_vm1, %v8098_v42  ;;  %2589 = vperm.xlu1 %5803, %v8098_v42   ;;  %v2958_v56 = vpop.permute.xlu0 %2957  ;;  %v6232_v42 = vld [vmem:[%s6602_s5 + $0x8] sm:$0xff]  }
 0x658   : > { %v2956_v58 = vpop.permute.xlu1 %2955  ;;  %5591 = vmatprep.subr.bf16.mxu1 %v2958_v56 }
 0x659   : > { %5592 = vmatpush3.bf16.msra.mxu1 %v2958_v56  ;;  %v2478_v56 = vld [vmem:[#allocation2 + $0x140] sm:$0xff] }
 0x65a   : > { %5593 = vmatprep.subr.bf16.mxu1 %v2956_v58  ;;  %2945 = vrot.lane.b32.xlu0 %v6222_v21, %s6424_s7 }
 0x65b   : > { %2599 = vperm.xlu1 %5803, %v8095_v18  }
 0x65d   : > { %5594 = vmatpush3.bf16.msra.mxu1 %v2956_v58 }
 0x65e   : > { %3187 = vrot.lane.b32.xlu0 %v6223_v28, %s6425_s28 }
 0x65f   : > { %2951 = vrot.lane.b32.xlu1 %v6224_v49, %s6424_s7 }
 0x663   : > { %2947 = vrot.lane.b32.xlu1 %v6225_v17, %s6424_s7  ;;  %v8164_v17 = vld [vmem:[#allocation2 + $0x178] sm:$0xff] }
 0x667   : > { %2943 = vrot.lane.b32.xlu1 %v6226_v48, %s6424_s7  ;;  %v2484_v48 = vld [vmem:[#allocation2 + $0x170] sm:$0xff] }
 0x66b   : > { %3191 = vrot.lane.b32.xlu1 %v6227_v0, %s6425_s28 }
 0x66f   : > { %3189 = vrot.lane.b32.xlu1 %v6228_v3, %s6425_s28 }
 0x688   : > { %v2501_v45 = vpop.xlane.xlu0 %2500 }
 0x689   : > { %v8131_v43 = vmax.f32 %v8126_v52, %v2501_v45  ;;  %v2499_v2 = vpop.xlane.xlu1 %2498 }
 0x68a   : > { %v8134_v11 = vmax.f32 %v8128_v41, %v2499_v2 }
 0x68b   : > { %2814 = vst.msk [vmem:[#allocation2 + $0x138] sm:$0xff] %vm338_vm1, %v8131_v43  ;;  %2619 = vperm.xlu1 %5803, %v8131_v43  }
 0x68c   : > { %2813 = vst.msk [vmem:[#allocation2 + $0x130] sm:$0xff] %vm338_vm1, %v8134_v11  ;;  %2614 = vperm.xlu0 %5802, %v8134_v11   ;;  %v2497_v33 = vpop.xlane.xlu0 %2496 }
 0x68d   : > { %v8145_v25 = vmax.f32 %v8136_v38, %v2497_v33  ;;  %v2495_v60 = vpop.xlane.xlu1 %2494  ;;  %v8173_v33 = vld [vmem:[#allocation2 + $0x168] sm:$0xff] }
 0x68e   : > { %v2522_v62 = vmax.f32 %v2474_v12, %v2495_v60  ;;  %v2482_v60 = vld [vmem:[#allocation2 + $0x160] sm:$0xff] }
 0x68f   : > { %2812 = vst.msk [vmem:[#allocation2 + $0x128] sm:$0xff] %vm338_vm1, %v8145_v25 }
 0x690   : > { %2811 = vst.msk [vmem:[#allocation2 + $0x120] sm:$0xff] %vm338_vm1, %v2522_v62  ;;  %2604 = vperm.xlu0 %5802, %v2522_v62   ;;  %v2509_v26 = vpop.xlane.xlu0 %2508 }
 0x691   : > { %v8153_v53 = vmax.f32 %v8147_v19, %v2509_v26  ;;  %v2507_v14 = vpop.xlane.xlu1 %2506  ;;  %v6229_v26 = vld [vmem:[%s6602_s5 + $0x20] sm:$0xff]  }
 0x692   : > { %v2528_v50 = vmax.f32 %v2480_v22, %v2507_v14 }
 0x693   : > { %2818 = vst.msk [vmem:[#allocation2 + $0x158] sm:$0xff] %vm338_vm1, %v8153_v53 }
 0x694   : > { %2817 = vst.msk [vmem:[#allocation2 + $0x150] sm:$0xff] %vm338_vm1, %v2528_v50  ;;  %2634 = vperm.xlu1 %5803, %v2528_v50   ;;  %2609 = vperm.xlu0 %5802, %v8145_v25   ;;  %v2505_v58 = vpop.xlane.xlu0 %2504  ;;  %v2544_v6 = vsub.f32 %v2480_v22, %v2528_v50 }
 0x695   : > { %v8162_v21 = vmax.f32 %v8155_v59, %v2505_v58  ;;  %v2503_v28 = vpop.xlane.xlu1 %2502 }
 0x696   : > { %v2526_v49 = vmax.f32 %v2478_v56, %v2503_v28 }
 0x697   : > { %2816 = vst.msk [vmem:[#allocation2 + $0x148] sm:$0xff] %vm338_vm1, %v8162_v21 }
 0x698   : > { %2815 = vst.msk [vmem:[#allocation2 + $0x140] sm:$0xff] %vm338_vm1, %v2526_v49  ;;  %2624 = vperm.xlu1 %5803, %v2526_v49   ;;  %2639 = vperm.xlu0 %5802, %v8153_v53   ;;  %v2517_v0 = vpop.xlane.xlu0 %2516 }
 0x699   : > { %v8171_v3 = vmax.f32 %v8164_v17, %v2517_v0  ;;  %v2515_v45 = vpop.xlane.xlu1 %2514 }
 0x69a   : > { %v2532_v2 = vmax.f32 %v2484_v48, %v2515_v45  ;;  %v2552_v45 = vmul.f32 1.442695, %v2535_v24  ;;  %v6233_v24 = vld [vmem:[%s6602_s5] sm:$0xff]  }
 0x69b   : > { %2822 = vst.msk [vmem:[#allocation2 + $0x178] sm:$0xff] %vm338_vm1, %v8171_v3 }
 0x69c   : > { %2821 = vst.msk [vmem:[#allocation2 + $0x170] sm:$0xff] %vm338_vm1, %v2532_v2  ;;  %3185 = vrot.lane.b32.xlu1 %v6229_v26, %s6425_s28  ;;  %2629 = vperm.xlu0 %5802, %v8162_v21   ;;  %v2513_v14 = vpop.xlane.xlu0 %2512  ;;  %v2538_v26 = vsub.f32 %v2474_v12, %v2522_v62  ;;  %5948 = vpow2.f32 %v2552_v45  ;;  %v2570_v12 = vmul.f32 1.442695, %v2544_v6  ;;  %v2542_v62 = vsub.f32 %v2478_v56, %v2526_v49 }
 0x69d   : > { %v8182_v58 = vmax.f32 %v8173_v33, %v2513_v14  ;;  %v2511_v28 = vpop.xlane.xlu1 %2510  ;;  %v2540_v14 = vsub.f32 %v8128_v41, %v8134_v11 }
 0x69e   : > { %v2530_v0 = vmax.f32 %v2482_v60, %v2511_v28  ;;  %v2558_v28 = vmul.f32 1.442695, %v2538_v26 }
 0x69f   : > { %2820 = vst.msk [vmem:[#allocation2 + $0x168] sm:$0xff] %vm338_vm1, %v8182_v58  ;;  %v2562_v27 = vmul.f32 1.442695, %v2540_v14  ;;  %v2547_v6 = vsub.f32 %v8173_v33, %v8182_v58 }
 0x6a0   : > { %2819 = vst.msk [vmem:[#allocation2 + $0x160] sm:$0xff] %vm338_vm1, %v2530_v0  ;;  %2654 = vperm.xlu0 %5802, %v2532_v2   ;;  %2649 = vperm.xlu1 %5803, %v8182_v58   ;;  %5950 = vpow2.f32 %v2558_v28  ;;  %v2546_v11 = vsub.f32 %v2482_v60, %v2530_v0 }
 0x6a1   : > { %5952 = vpow2.f32 %v2562_v27 }
 0x6a2   : > { %5954 = vpow2.f32 %v2570_v12  ;;  %v2574_v50 = vmul.f32 1.442695, %v2546_v11 }
 0x6a4   : > { %2644 = vperm.xlu0 %5802, %v2530_v0   ;;  %2659 = vperm.xlu1 %5803, %v8171_v3  }
 0x6a8   : > { %3183 = vrot.lane.b32.xlu0 %v6230_v34, %s6425_s28  ;;  %3181 = vrot.lane.b32.xlu1 %v6231_v5, %s6425_s28  ;;  %v2566_v5 = vmul.f32 1.442695, %v2542_v62  ;;  %v2548_v34 = vsub.f32 %v2484_v48, %v2532_v2 }
 0x6a9   : > { %v8206_v41 = vpop.eup %5948 }
 0x6aa   : > { %5956 = vpow2.f32 %v2566_v5  ;;  %v2578_v27 = vmul.f32 1.442695, %v2548_v34 }
 0x6ac   : > { %3179 = vrot.lane.b32.xlu0 %v6232_v42, %s6425_s28  ;;  %3177 = vrot.lane.b32.xlu1 %v6233_v24, %s6425_s28  ;;  %5958 = vpow2.f32 %v2578_v27 }
 0x6ad   : > { %v8211_v22 = vpop.eup %5950 }
 0x6ae   : > { %v8219_v56 = vpop.eup %5952 }
 0x6b0   : > { %3161 = vrot.lane.b32.xlu0 %v6627_v9, %s6425_s28  ;;  %3163 = vrot.lane.b32.xlu1 %v6674_v29, %s6425_s28  ;;  %v9399_v9 = vsub.f32 %v8073_v4, %v8081_v10  ;;  %v9401_v4 = vsub.f32 %v8083_v16, %v8095_v18 }
 0x6b2   : > { %v2550_v29 = vmul.f32 1.442695, %v9399_v9  ;;  %v2556_v10 = vmul.f32 1.442695, %v9401_v4 }
 0x6b4   : > { %2846 = vperm.xlu0 %5802, %v8206_v41   ;;  %3165 = vrot.lane.b32.xlu1 %v6676_v30, %s6425_s28  ;;  %5960 = vpow2.f32 %v2550_v29  ;;  %v9400_v30 = vsub.f32 %v8068_v61, %v8071_v1 }
 0x6b5   : > { %5962 = vpow2.f32 %v2574_v50 }
 0x6b6   : > { %v2554_v49 = vmul.f32 1.442695, %v9400_v30 }
 0x6b8   : > { %2861 = vperm.xlu0 %5802, %v8211_v22   ;;  %3167 = vrot.lane.b32.xlu1 %v6686_v39, %s6425_s28  ;;  %v8227_v39 = vpop.eup %5954  ;;  %5964 = vpow2.f32 %v2554_v49 }
 0x6b9   : > { %v8237_v48 = vpop.eup %5956  ;;  %5966 = vpow2.f32 %v2556_v10 }
 0x6ba   : > { %v8244_v1 = vpop.eup %5958 }
 0x6bc   : > { %2871 = vperm.xlu0 %5802, %v8219_v56   ;;  %3169 = vrot.lane.b32.xlu1 %v6688_v40, %s6425_s28  ;;  %v2541_v40 = vsub.f32 %v8126_v52, %v8131_v43 }
 0x6be   : > { %v2564_v61 = vmul.f32 1.442695, %v2541_v40 }
 0x6c0   : > { %2891 = vperm.xlu0 %5802, %v8227_v39   ;;  %3171 = vrot.lane.b32.xlu1 %v9362_v36, %s6425_s28  ;;  %v2539_v36 = vsub.f32 %v8136_v38, %v8145_v25  ;;  %5968 = vpow2.f32 %v2564_v61  ;;  %v2543_v38 = vsub.f32 %v8155_v59, %v8162_v21 }
 0x6c1   : > { %v8249_v18 = vpop.eup %5960 }
 0x6c2   : > { %v2560_v52 = vmul.f32 1.442695, %v2539_v36  ;;  %v8253_v43 = vpop.eup %5962 }
 0x6c4   : > { %2881 = vperm.xlu0 %5802, %v8237_v48   ;;  %3173 = vrot.lane.b32.xlu1 %v9364_v13, %s6425_s28  ;;  %v2545_v13 = vsub.f32 %v8147_v19, %v8153_v53  ;;  %5970 = vpow2.f32 %v2560_v52  ;;  %v2568_v19 = vmul.f32 1.442695, %v2543_v38  ;;  %v2549_v53 = vsub.f32 %v8164_v17, %v8171_v3 }
 0x6c5   : > { %v8260_v0 = vpop.eup %5964 }
 0x6c6   : > { %v8265_v59 = vpop.eup %5966  ;;  %v2580_v28 = vmul.f32 1.442695, %v2549_v53 }
 0x6c8   : > { %2911 = vperm.xlu0 %5802, %v8244_v1   ;;  %3175 = vrot.lane.b32.xlu1 %v6708_v55, %s6425_s28  ;;  %v2572_v55 = vmul.f32 1.442695, %v2545_v13 }
 0x6c9   : > { %v2595_v16 = vpop.permute.xlu0 %2594 }
 0x6ca   : > { %5972 = vpow2.f32 %v2572_v55  ;;  %v2664_v14 = vsub.f32 %v7984_v7, %v2595_v16  ;;  %v2576_v7 = vmul.f32 1.442695, %v2547_v6 }
 0x6cb   : > { %5974 = vpow2.f32 %v2568_v19 }
 0x6cc   : > { %2901 = vperm.xlu0 %5802, %v8253_v43   ;;  %2841 = vperm.xlu1 %5803, %v8249_v18   ;;  %v2682_v3 = vmul.f32 1.442695, %v2664_v14 }
 0x6cd   : > { %v2585_v25 = vpop.permute.xlu1 %2584  ;;  %v2954_v2 = vpop.permute.xlu0 %2953 }
 0x6ce   : > { %v2662_v60 = vsub.f32 %v7986_v8, %v2585_v25  ;;  %5595 = vmatprep.subr.bf16.mxu1 %v2954_v2  ;;  %v8272_v24 = vpop.eup %5968 }
 0x6cf   : > { %5596 = vmatpush3.bf16.msra.mxu1 %v2954_v2 }
 0x6d0   : > { %2851 = vperm.xlu1 %5803, %v8260_v0   ;;  %v2678_v45 = vmul.f32 1.442695, %v2662_v60 }
 0x6d1   : > { %v2950_v62 = vpop.permute.xlu0 %2949  ;;  %v8276_v5 = vpop.eup %5970 }
 0x6d2   : > { %v2590_v26 = vpop.permute.xlu1 %2589  ;;  %5976 = vpow2.f32 %v2678_v45 }
 0x6d3   : > { %v2663_v21 = vsub.f32 %v7992_v20, %v2590_v26 }
 0x6d4   : > { %2856 = vperm.xlu1 %5803, %v8265_v59  }
 0x6d5   : > { %v2680_v8 = vmul.f32 1.442695, %v2663_v21  ;;  %v2946_v34 = vpop.permute.xlu0 %2945 }
 0x6d6   : > { %v2600_v42 = vpop.permute.xlu1 %2599 }
 0x6d7   : > { %5978 = vpow2.f32 %v2680_v8  ;;  %v2665_v17 = vsub.f32 %v7989_v46, %v2600_v42  ;;  %v8279_v46 = vpop.eup %5972 }
 0x6d8   : > { %2876 = vperm.xlu1 %5803, %v8272_v24   ;;  %5980 = vpow2.f32 %v2580_v28  ;;  %v8282_v58 = vpop.eup %5974 }
 0x6d9   : > { %v2684_v20 = vmul.f32 1.442695, %v2665_v17  ;;  %5982 = vpow2.f32 %v2682_v3  ;;  %v3188_v52 = vpop.permute.xlu0 %3187 }
 0x6da   : > { %v2952_v12 = vpop.permute.xlu1 %2951  ;;  %v3233_v13 = vsel %vm627_vm0, %v3188_v52, 0 }
 0x6db   : > { %5597 = vmatprep.subr.bf16.mxu1 %v2952_v12  ;;  %5984 = vpow2.f32 %v2684_v20 }
 0x6dc   : > { %2866 = vperm.xlu1 %5803, %v8276_v5   ;;  %5598 = vmatpush3.bf16.msra.mxu1 %v2952_v12  ;;  %5986 = vpow2.f32 %v2576_v7 }
 0x6dd   : > { %5599 = vmatprep.subr.bf16.mxu1 %v2950_v62 }
 0x6de   : > { %v2948_v33 = vpop.permute.xlu1 %2947 }
 0x6df   : > { %v5977_v27 = vpop.eup %5976 }
 0x6e0   : > { %2896 = vperm.xlu1 %5803, %v8279_v46   ;;  %5600 = vmatpush3.bf16.msra.mxu1 %v2950_v62 }
 0x6e1   : > { %5601 = vmatprep.subr.bf16.mxu1 %v2948_v33 }
 0x6e2   : > { %v2944_v9 = vpop.permute.xlu1 %2943 }
 0x6e4   : > { %v5979_v11 = vpop.eup %5978  ;;  %2886 = vperm.xlu1 %5803, %v8282_v58   ;;  %5602 = vmatpush3.bf16.msra.mxu1 %v2948_v33 }
 0x6e5   : > { %5603 = vmatprep.subr.bf16.mxu1 %v2946_v34  ;;  %v2935_v29 = vpack.c.bf16 %v5979_v11, %v5977_v27  ;;  %v8285_v50 = vpop.eup %5980 }
 0x6e6   : > { %v5983_v30 = vpop.eup %5982  ;;  %v3192_v4 = vpop.permute.xlu1 %3191 }
 0x6e7   : > { %5607 = vmatprep.mubr.bf16.mxu1 %v2935_v29  ;;  %v3239_v61 = vsel %vm627_vm0, %v3192_v4, 0 }
 0x6e8   : > { %2916 = vperm.xlu1 %5803, %v8285_v50   ;;  %5604 = vmatpush3.bf16.msra.mxu1 %v2946_v34  ;;  %v5985_v49 = vpop.eup %5984 }
 0x6e9   : > { %5605 = vmatprep.subr.bf16.mxu1 %v2944_v9  ;;  %v8288_v10 = vpop.eup %5986  ;;  %v2936_v40 = vpack.c.bf16 %v5985_v49, %v5983_v30 }
 0x6ea   : > { %v3190_v36 = vpop.permute.xlu1 %3189 }
 0x6eb   : > { %2747 = vadd.xlane.f32.xlu0 %v5983_v30  ;;  %v3236_v16 = vsel %vm627_vm0, %v3190_v36, 0 }
 0x6ec   : > { %2906 = vperm.xlu1 %5803, %v8288_v10   ;;  %5606 = vmatpush3.bf16.msra.mxu1 %v2944_v9 }
 0x6ed   : > { %5711 = vmatprep.subr.msk.bf16.mxu1 %vm627_vm0, %v3192_v4 }
 0x6ef   : > { %2743 = vadd.xlane.f32.xlu0 %v5977_v27  ;;  %5608 = vmatmul.mubr.bf16.vlgmr.msra.gmra.mxu1 %v2936_v40 }
 0x6f0   : > { %5624 = vmatpush3.bf16.xpose.msra.mxu1 %v3239_v61 }
 0x6f1   : > { %5712 = vmatprep.subr.msk.bf16.mxu1 %vm627_vm0, %v3190_v36 }
 0x6f3   : > { %2749 = vadd.xlane.f32.xlu0 %v5985_v49 }
 0x6f8   : > { %5626 = vmatpush3.bf16.xpose.msra.mxu1 %v3236_v16 }
 0x6f9   : > { %5713 = vmatprep.subr.msk.bf16.mxu1 %vm627_vm0, %v3188_v52 }
 0x700   : > { %5628 = vmatpush3.bf16.xpose.msra.mxu1 %v3233_v13 }
 0x706   : > { %v2620_v25 = vpop.permute.xlu1 %2619 }
 0x707   : > { %v2615_v38 = vpop.permute.xlu0 %2614  ;;  %v2669_v60 = vsub.f32 %v8012_v32, %v2620_v25 }
 0x708   : > { %v2668_v2 = vsub.f32 %v8007_v35, %v2615_v38 }
 0x709   : > { %v2692_v26 = vmul.f32 1.442695, %v2669_v60 }
 0x70a   : > { %v2690_v55 = vmul.f32 1.442695, %v2668_v2 }
 0x70b   : > { %v2605_v19 = vpop.permute.xlu0 %2604 }
 0x70c   : > { %5988 = vpow2.f32 %v2690_v55  ;;  %v2666_v53 = vsub.f32 %v8010_v44, %v2605_v19 }
 0x70e   : > { %v2686_v45 = vmul.f32 1.442695, %v2666_v53 }
 0x70f   : > { %v2635_v21 = vpop.permute.xlu1 %2634  ;;  %v2610_v14 = vpop.permute.xlu0 %2609 }
 0x710   : > { %5990 = vpow2.f32 %v2686_v45  ;;  %v2672_v8 = vsub.f32 %v8020_v63, %v2635_v21  ;;  %v2667_v28 = vsub.f32 %v8015_v51, %v2610_v14  ;;  %2745 = vadd.xlane.f32.xlu1 %v5979_v11 }
 0x711   : > { %5992 = vpow2.f32 %v2692_v26 }
 0x712   : > { %v2698_v6 = vmul.f32 1.442695, %v2672_v8  ;;  %v2688_v42 = vmul.f32 1.442695, %v2667_v28 }
 0x713   : > { %v2625_v35 = vpop.permute.xlu1 %2624  ;;  %v2640_v17 = vpop.permute.xlu0 %2639 }
 0x714   : > { %5994 = vpow2.f32 %v2698_v6  ;;  %v2670_v32 = vsub.f32 %v8025_v57, %v2625_v35  ;;  %v2673_v44 = vsub.f32 %v8028_v37, %v2640_v17 }
 0x715   : > { %5996 = vpow2.f32 %v2688_v42 }
 0x716   : > { %v2694_v3 = vmul.f32 1.442695, %v2670_v32  ;;  %v2700_v20 = vmul.f32 1.442695, %v2673_v44 }
 0x717   : > { %v3186_v7 = vpop.permute.xlu1 %3185  ;;  %v2630_v12 = vpop.permute.xlu0 %2629 }
 0x718   : > { %v2671_v63 = vsub.f32 %v8032_v47, %v2630_v12  ;;  %5714 = vmatprep.subr.msk.bf16.mxu1 %vm627_vm0, %v3186_v7  ;;  %v3230_v51 = vsel %vm627_vm0, %v3186_v7, 0  ;;  %5998 = vpow2.f32 %v2694_v3 }
 0x719   : > { %v5989_v62 = vpop.eup %5988  ;;  %5630 = vmatpush3.bf16.xpose.msra.mxu1 %v3230_v51  ;;  %6000 = vpow2.f32 %v2700_v20 }
 0x71a   : > { %v2696_v33 = vmul.f32 1.442695, %v2671_v63  ;;  %2755 = vadd.xlane.f32.xlu0 %v5989_v62 }
 0x71b   : > { %v2650_v57 = vpop.permute.xlu1 %2649  ;;  %v2655_v34 = vpop.permute.xlu0 %2654 }
 0x71c   : > { %6002 = vpow2.f32 %v2696_v33  ;;  %v2675_v37 = vsub.f32 %v8056_v23, %v2650_v57  ;;  %v2676_v27 = vsub.f32 %v8036_v15, %v2655_v34 }
 0x71d   : > { %v5991_v11 = vpop.eup %5990 }
 0x71e   : > { %v2706_v9 = vmul.f32 1.442695, %v2676_v27  ;;  %2751 = vadd.xlane.f32.xlu0 %v5991_v11  ;;  %v2704_v47 = vmul.f32 1.442695, %v2675_v37  ;;  %v5993_v49 = vpop.eup %5992 }
 0x71f   : > { %v2660_v29 = vpop.permute.xlu1 %2659  ;;  %v2645_v30 = vpop.permute.xlu0 %2644  ;;  %v2938_v13 = vpack.c.bf16 %v5993_v49, %v5989_v62 }
 0x720   : > { %v2677_v4 = vsub.f32 %v8048_v31, %v2660_v29  ;;  %v2674_v40 = vsub.f32 %v8041_v54, %v2645_v30  ;;  %6004 = vpow2.f32 %v2706_v9 }
 0x721   : > { %v5995_v61 = vpop.eup %5994  ;;  %6006 = vpow2.f32 %v2704_v47  ;;  %v2713_v47 = vld [vmem:[#allocation3 + $0x110] sm:$0xff] }
 0x722   : > { %v5997_v36 = vpop.eup %5996  ;;  %v2708_v16 = vmul.f32 1.442695, %v2677_v4  ;;  %v2702_v52 = vmul.f32 1.442695, %v2674_v40  ;;  %2763 = vadd.xlane.f32.xlu1 %v5995_v61  ;;  %2757 = vadd.xlane.f32.xlu0 %v5993_v49  ;;  %v2729_v30 = vmul.f32 %v8260_v0, %v2713_v47  ;;  %v2711_v4 = vld [vmem:[#allocation3 + $0x100] sm:$0xff] }
 0x723   : > { %v3184_v15 = vpop.permute.xlu0 %3183  ;;  %v2937_v23 = vpack.c.bf16 %v5997_v36, %v5991_v11  ;;  %v3182_v54 = vpop.permute.xlu1 %3181 }
 0x724   : > { %6008 = vpow2.f32 %v2708_v16  ;;  %5715 = vmatprep.subr.msk.bf16.mxu1 %vm627_vm0, %v3184_v15  ;;  %v3227_v38 = vsel %vm627_vm0, %v3184_v15, 0  ;;  %v3224_v60 = vsel %vm627_vm0, %v3182_v54, 0 }
 0x725   : > { %6010 = vpow2.f32 %v2702_v52  ;;  %5611 = vmatprep.mubr.bf16.mxu1 %v2937_v23  ;;  %5632 = vmatpush3.bf16.xpose.msra.mxu1 %v3227_v38  ;;  %v5999_v31 = vpop.eup %5998  ;;  %v2714_v52 = vld [vmem:[#allocation3 + $0x118] sm:$0xff] }
 0x726   : > { %5612 = vmatmul.mubr.bf16.gmra.mxu1 %v2938_v13  ;;  %2753 = vadd.xlane.f32.xlu0 %v5997_v36  ;;  %v6001_v25 = vpop.eup %6000  ;;  %v2727_v36 = vmul.f32 %v8249_v18, %v2711_v4  ;;  %v2730_v23 = vmul.f32 %v8265_v59, %v2714_v52  ;;  %v2717_v59 = vld [vmem:[#allocation3 + $0x130] sm:$0xff] }
 0x727   : > { %5716 = vmatprep.subr.msk.bf16.mxu1 %vm627_vm0, %v3182_v54  ;;  %v2940_v19 = vpack.c.bf16 %v6001_v25, %v5995_v61  ;;  %v3180_v45 = vpop.permute.xlu0 %3179  ;;  %v3178_v21 = vpop.permute.xlu1 %3177 }
 0x728   : > { %v3221_v6 = vsel %vm627_vm0, %v3180_v45, 0  ;;  %v3218_v32 = vsel %vm627_vm0, %v3178_v21, 0 }
 0x729   : > { %v6003_v2 = vpop.eup %6002 }
 0x72a   : > { %2759 = vadd.xlane.f32.xlu0 %v5999_v31  ;;  %v2939_v55 = vpack.c.bf16 %v6003_v2, %v5999_v31 }
 0x72b   : > { %v3164_v35 = vpop.permute.xlu1 %3163  ;;  %v3162_v17 = vpop.permute.xlu0 %3161 }
 0x72c   : > { %5615 = vmatprep.mubr.bf16.mxu1 %v2939_v55 }
 0x72d   : > { %5634 = vmatpush3.bf16.xpose.msra.mxu1 %v3224_v60  ;;  %v6005_v53 = vpop.eup %6004 }
 0x72e   : > { %5616 = vmatmul.mubr.bf16.gmra.mxu1 %v2940_v19  ;;  %2765 = vadd.xlane.f32.xlu0 %v6001_v25  ;;  %v6007_v26 = vpop.eup %6006 }
 0x72f   : > { %2771 = vadd.xlane.f32.xlu1 %v6005_v53  ;;  %5717 = vmatprep.subr.msk.bf16.mxu1 %vm627_vm0, %v3180_v45  ;;  %v3166_v44 = vpop.permute.xlu1 %3165  ;;  %v8322_v7 = vpop.permute.xlu0 %2846 }
 0x731   : > { %v6009_v14 = vpop.eup %6008 }
 0x732   : > { %v6011_v8 = vpop.eup %6010  ;;  %2761 = vadd.xlane.f32.xlu0 %v6003_v2  ;;  %v2942_v28 = vpack.c.bf16 %v6009_v14, %v6005_v53  ;;  %v2712_v2 = vld [vmem:[#allocation3 + $0x108] sm:$0xff]  ;;  %v2733_v53 = vmul.f32 %v8219_v56, %v2717_v59 }
 0x733   : > { %2767 = vadd.xlane.f32.xlu1 %v6011_v8  ;;  %v2941_v42 = vpack.c.bf16 %v6007_v26, %v6011_v8  ;;  %v3168_v3 = vpop.permute.xlu1 %3167  ;;  %v8326_v63 = vpop.permute.xlu0 %2861  ;;  %v2728_v55 = vmul.f32 %v8206_v41, %v2712_v2  ;;  %v2716_v56 = vld [vmem:[#allocation3 + $0x128] sm:$0xff] }
 0x735   : > { %5619 = vmatprep.mubr.bf16.mxu1 %v2941_v42  ;;  %5636 = vmatpush3.bf16.xpose.msra.mxu1 %v3221_v6  ;;  %v2718_v6 = vld [vmem:[#allocation3 + $0x138] sm:$0xff] }
 0x736   : > { %5620 = vmatmul.mubr.bf16.gmra.mxu1 %v2942_v28  ;;  %2773 = vadd.xlane.f32.xlu0 %v6009_v14  ;;  %v2721_v28 = vld [vmem:[#allocation3 + $0x150] sm:$0xff] }
 0x737   : > { %5718 = vmatprep.subr.msk.bf16.mxu1 %vm627_vm0, %v3178_v21  ;;  %5639 = vmatprep.mubr.msk.bf16.mxu1 %vm627_vm0, %v3162_v17  ;;  %v3170_v20 = vpop.permute.xlu1 %3169  ;;  %v8330_v62 = vpop.permute.xlu0 %2871  ;;  %v2737_v41 = vmul.f32 %v8227_v39, %v2721_v28 }
 0x73a   : > { %2769 = vadd.xlane.f32.xlu0 %v6007_v26  ;;  %v2715_v26 = vld [vmem:[#allocation3 + $0x120] sm:$0xff] }
 0x73b   : > { %v3172_v12 = vpop.permute.xlu1 %3171  ;;  %v8333_v57 = vpop.permute.xlu0 %2891  ;;  %v2731_v14 = vmul.f32 %v8211_v22, %v2715_v26  ;;  %v2732_v22 = vmul.f32 %v8276_v5, %v2716_v56  ;;  %v2725_v5 = vld [vmem:[#allocation3 + $0x170] sm:$0xff]  ;;  %v2724_v26 = vld [vmem:[#allocation3 + $0x168] sm:$0xff] }
 0x73d   : > { %5638 = vmatpush3.bf16.xpose.msra.mxu1 %v3218_v32 }
 0x73f   : > { %v3174_v51 = vpop.permute.xlu1 %3173  ;;  %v8335_v34 = vpop.permute.xlu0 %2881 }
 0x743   : > { %v3176_v33 = vpop.permute.xlu1 %3175  ;;  %v8339_v27 = vpop.permute.xlu0 %2911 }
 0x744   : > { %5640 = vmatmul.mubr.msk.bf16.vlgmr.msra.gmra.mxu1 %vm627_vm0, %v3164_v35  ;;  %v2734_v35 = vmul.f32 %v8272_v24, %v2718_v6 }
 0x745   : > { %5643 = vmatprep.mubr.msk.bf16.mxu1 %vm627_vm0, %v3166_v44 }
 0x747   : > { %v8337_v37 = vpop.permute.xlu1 %2841  ;;  %v8343_v9 = vpop.permute.xlu0 %2901 }
 0x74b   : > { %v8341_v11 = vpop.permute.xlu1 %2851 }
 0x74c   : > { %5644 = vmatmul.mubr.msk.bf16.gmra.mxu1 %vm627_vm0, %v3168_v3 }
 0x74d   : > { %5647 = vmatprep.mubr.msk.bf16.mxu1 %vm627_vm0, %v3170_v20 }
 0x74f   : > { %v8345_v29 = vpop.permute.xlu1 %2856 }
 0x753   : > { %v8348_v61 = vpop.permute.xlu1 %2876 }
 0x754   : > { %5648 = vmatmul.mubr.msk.bf16.gmra.mxu1 %vm627_vm0, %v3172_v12 }
 0x755   : > { %5651 = vmatprep.mubr.msk.bf16.mxu1 %vm627_vm0, %v3174_v51  ;;  %v2719_v51 = vld [vmem:[#allocation3 + $0x140] sm:$0xff] }
 0x756   : > { %v2735_v24 = vmul.f32 %v8237_v48, %v2719_v51 }
 0x757   : > { %v8354_v38 = vpop.permute.xlu1 %2866 }
 0x75b   : > { %v8357_v54 = vpop.permute.xlu1 %2896 }
 0x75c   : > { %5652 = vmatmul.mubr.msk.bf16.gmra.mxu1 %vm627_vm0, %v3176_v33 }
 0x75f   : > { %v8359_v31 = vpop.permute.xlu1 %2886 }
 0x763   : > { %v8361_v25 = vpop.permute.xlu1 %2916 }
 0x767   : > { %v8363_v18 = vpop.permute.xlu1 %2906 }
 0x774   : > { %v2748_v49 = vpop.xlane.xlu0 %2747 }
 0x775   : > { %v2777_v40 = vadd.f32 %v2748_v49, %v2729_v30  ;;  %v2722_v49 = vld [vmem:[#allocation3 + $0x158] sm:$0xff] }
 0x777   : > { %2793 = vst.msk [vmem:[#allocation3 + $0x110] sm:$0xff] %vm338_vm1, %v2777_v40  ;;  %v2738_v40 = vmul.f32 %v8279_v46, %v2722_v49 }
 0x778   : > { %v2744_v16 = vpop.xlane.xlu0 %2743 }
 0x779   : > { %v2775_v15 = vadd.f32 %v2744_v16, %v2727_v36  ;;  %v2741_v16 = vmul.f32 %v8244_v1, %v2725_v5 }
 0x77b   : > { %2791 = vst.msk [vmem:[#allocation3 + $0x100] sm:$0xff] %vm338_vm1, %v2775_v15  ;;  %v2720_v15 = vld [vmem:[#allocation3 + $0x148] sm:$0xff] }
 0x77c   : > { %v2750_v13 = vpop.xlane.xlu0 %2749  ;;  %v2736_v2 = vmul.f32 %v8282_v58, %v2720_v15  ;;  %v2740_v58 = vmul.f32 %v8288_v10, %v2724_v26 }
 0x77d   : > { %v2778_v0 = vadd.f32 %v2750_v13, %v2730_v23  ;;  %v2723_v13 = vld [vmem:[#allocation3 + $0x160] sm:$0xff] }
 0x77f   : > { %2794 = vst.msk [vmem:[#allocation3 + $0x118] sm:$0xff] %vm338_vm1, %v2778_v0 }
 0x799   : > { %v2746_v60 = vpop.xlane.xlu1 %2745 }
 0x79a   : > { %v2776_v19 = vadd.f32 %v2746_v60, %v2728_v55  ;;  %v2739_v55 = vmul.f32 %v8253_v43, %v2723_v13  ;;  %v2726_v60 = vld [vmem:[#allocation3 + $0x178] sm:$0xff] }
 0x79c   : > { %2792 = vst.msk [vmem:[#allocation3 + $0x108] sm:$0xff] %vm338_vm1, %v2776_v19 }
 0x7a3   : > { %v2756_v45 = vpop.xlane.xlu0 %2755 }
 0x7a4   : > { %v2781_v21 = vadd.f32 %v2756_v45, %v2733_v53  ;;  %v2742_v53 = vmul.f32 %v8285_v50, %v2726_v60 }
 0x7a6   : > { %2797 = vst.msk [vmem:[#allocation3 + $0x130] sm:$0xff] %vm338_vm1, %v2781_v21 }
 0x7a7   : > { %v2752_v8 = vpop.xlane.xlu0 %2751 }
 0x7a8   : > { %v2779_v42 = vadd.f32 %v2752_v8, %v2731_v14 }
 0x7aa   : > { %2795 = vst.msk [vmem:[#allocation3 + $0x120] sm:$0xff] %vm338_vm1, %v2779_v42 }
 0x7ab   : > { %v2764_v17 = vpop.xlane.xlu1 %2763  ;;  %v2758_v32 = vpop.xlane.xlu0 %2757 }
 0x7ac   : > { %v2785_v44 = vadd.f32 %v2764_v17, %v2737_v41  ;;  %v2782_v3 = vadd.f32 %v2758_v32, %v2734_v35 }
 0x7ae   : > { %2801 = vst.msk [vmem:[#allocation3 + $0x150] sm:$0xff] %vm338_vm1, %v2785_v44  ;;  %2798 = vst.msk [vmem:[#allocation3 + $0x138] sm:$0xff] %vm338_vm1, %v2782_v3 }
 0x7af   : > { %v5609_v20 = vpop.f32.mrf.mxu1  ;;  %v2754_v12 = vpop.xlane.xlu0 %2753 }
 0x7b0   : > { %v2780_v33 = vadd.f32 %v2754_v12, %v2732_v22  ;;  %3084 = vrot.lane.b32.xlu0 %v5609_v20, %s6424_s7 }
 0x7b1   : > { %v3001_v39 = vpop.f32.mrf.mxu1 }
 0x7b2   : > { %2796 = vst.msk [vmem:[#allocation3 + $0x128] sm:$0xff] %vm338_vm1, %v2780_v33 }
 0x7b3   : > { %v5610_v47 = vpop.f32.mrf.mxu1  ;;  %v2760_v30 = vpop.xlane.xlu0 %2759 }
 0x7b4   : > { %v2783_v4 = vadd.f32 %v2760_v30, %v2735_v24  ;;  %3080 = vrot.lane.b32.xlu0 %v3001_v39, %s6424_s7  ;;  %3086 = vrot.lane.b32.xlu1 %v5610_v47, %s6424_s7  ;;  %v2825_v47 = vld [vmem:[#allocation4 + $0x10] sm:$0xff] }
 0x7b5   : > { %v3004_v36 = vpop.f32.mrf.mxu1  ;;  %v2921_v30 = vmul.f32 %v8341_v11, %v2825_v47 }
 0x7b6   : > { %2799 = vst.msk [vmem:[#allocation3 + $0x140] sm:$0xff] %vm338_vm1, %v2783_v4 }
 0x7b7   : > { %v2766_v52 = vpop.xlane.xlu0 %2765 }
 0x7b8   : > { %v2772_v23 = vpop.xlane.xlu1 %2771  ;;  %v2786_v48 = vadd.f32 %v2766_v52, %v2738_v40  ;;  %3082 = vrot.lane.b32.xlu1 %v3004_v36, %s6424_s7  ;;  %v2823_v40 = vld [vmem:[#allocation4] sm:$0xff]  ;;  %v2826_v36 = vld [vmem:[#allocation4 + $0x18] sm:$0xff] }
 0x7b9   : > { %v2789_v0 = vadd.f32 %v2772_v23, %v2741_v16  ;;  %v2919_v16 = vmul.f32 %v8337_v37, %v2823_v40  ;;  %v2922_v52 = vmul.f32 %v8345_v29, %v2826_v36  ;;  %v2832_v40 = vld [vmem:[#allocation4 + $0x48] sm:$0xff] }
 0x7ba   : > { %2802 = vst.msk [vmem:[#allocation3 + $0x158] sm:$0xff] %vm338_vm1, %v2786_v48 }
 0x7bb   : > { %2805 = vst.msk [vmem:[#allocation3 + $0x170] sm:$0xff] %vm338_vm1, %v2789_v0  ;;  %v2762_v46 = vpop.xlane.xlu0 %2761  ;;  %v2824_v0 = vld [vmem:[#allocation4 + $0x8] sm:$0xff] }
 0x7bc   : > { %v2768_v19 = vpop.xlane.xlu1 %2767  ;;  %v2784_v1 = vadd.f32 %v2762_v46, %v2736_v2  ;;  %v2920_v2 = vmul.f32 %v8322_v7, %v2824_v0 }
 0x7bd   : > { %v2787_v59 = vadd.f32 %v2768_v19, %v2739_v55 }
 0x7be   : > { %2800 = vst.msk [vmem:[#allocation3 + $0x148] sm:$0xff] %vm338_vm1, %v2784_v1 }
 0x7bf   : > { %2803 = vst.msk [vmem:[#allocation3 + $0x160] sm:$0xff] %vm338_vm1, %v2787_v59  ;;  %v2774_v45 = vpop.xlane.xlu0 %2773  ;;  %v2829_v59 = vld [vmem:[#allocation4 + $0x30] sm:$0xff] }
 0x7c0   : > { %v2790_v21 = vadd.f32 %v2774_v45, %v2742_v53  ;;  %v2925_v53 = vmul.f32 %v8330_v62, %v2829_v59 }
 0x7c2   : > { %2806 = vst.msk [vmem:[#allocation3 + $0x178] sm:$0xff] %vm338_vm1, %v2790_v21  ;;  %v2827_v21 = vld [vmem:[#allocation4 + $0x20] sm:$0xff] }
 0x7c3   : > { %v2770_v14 = vpop.xlane.xlu0 %2769 }
 0x7c4   : > { %v2788_v43 = vadd.f32 %v2770_v14, %v2740_v58  ;;  %v2830_v58 = vld [vmem:[#allocation4 + $0x38] sm:$0xff]  ;;  %v2923_v14 = vmul.f32 %v8326_v63, %v2827_v21  ;;  %v8492_v21 = vld [vmem:[#allocation2 + $0x180] sm:$0xff] }
 0x7c6   : > { %2804 = vst.msk [vmem:[#allocation3 + $0x168] sm:$0xff] %vm338_vm1, %v2788_v43  ;;  %v2926_v43 = vmul.f32 %v8348_v61, %v2830_v58 }
 0x7e6   : > { %v5613_v8 = vpop.f32.mrf.mxu1 }
 0x7e7   : > { %3092 = vrot.lane.b32.xlu0 %v5613_v8, %s6424_s7 }
 0x7e8   : > { %v3017_v28 = vpop.f32.mrf.mxu1 }
 0x7ea   : > { %v5614_v6 = vpop.f32.mrf.mxu1 }
 0x7eb   : > { %3088 = vrot.lane.b32.xlu0 %v3017_v28, %s6424_s7  ;;  %3094 = vrot.lane.b32.xlu1 %v5614_v6, %s6424_s7 }
 0x7ec   : > { %v3020_v50 = vpop.f32.mrf.mxu1 }
 0x7ee   : > { %v5617_v42 = vpop.f32.mrf.mxu1 }
 0x7ef   : > { %3100 = vrot.lane.b32.xlu0 %v5617_v42, %s6424_s7  ;;  %3090 = vrot.lane.b32.xlu1 %v3020_v50, %s6424_s7  ;;  %v2833_v42 = vld [vmem:[#allocation4 + $0x50] sm:$0xff] }
 0x7f0   : > { %v3033_v10 = vpop.f32.mrf.mxu1 }
 0x7f2   : > { %v5618_v41 = vpop.f32.mrf.mxu1 }
 0x7f3   : > { %3096 = vrot.lane.b32.xlu0 %v3033_v10, %s6424_s7  ;;  %3102 = vrot.lane.b32.xlu1 %v5618_v41, %s6424_s7  ;;  %v2828_v10 = vld [vmem:[#allocation4 + $0x28] sm:$0xff]  ;;  %v2929_v41 = vmul.f32 %v8333_v57, %v2833_v42  ;;  %v8508_v42 = vld [vmem:[#allocation2 + $0x1b8] sm:$0xff] }
 0x7f4   : > { %v3036_v35 = vpop.f32.mrf.mxu1  ;;  %v2924_v62 = vmul.f32 %v8354_v38, %v2828_v10  ;;  %v8513_v10 = vld [vmem:[#allocation2 + $0x1b0] sm:$0xff] }
 0x7f6   : > { %v5621_v17 = vpop.f32.mrf.mxu1 }
 0x7f7   : > { %3098 = vrot.lane.b32.xlu1 %v3036_v35, %s6424_s7  ;;  %3108 = vrot.lane.b32.xlu0 %v5621_v17, %s6424_s7 }
 0x7f8   : > { %v3049_v32 = vpop.f32.mrf.mxu1 }
 0x7fa   : > { %v5622_v56 = vpop.f32.mrf.mxu1 }
 0x7fb   : > { %3104 = vrot.lane.b32.xlu0 %v3049_v32, %s6424_s7  ;;  %3110 = vrot.lane.b32.xlu1 %v5622_v56, %s6424_s7  ;;  %v2831_v32 = vld [vmem:[#allocation4 + $0x40] sm:$0xff]  ;;  %v2834_v56 = vld [vmem:[#allocation4 + $0x58] sm:$0xff] }
 0x7fc   : > { %v3052_v44 = vpop.f32.mrf.mxu1  ;;  %v2930_v47 = vmul.f32 %v8357_v54, %v2834_v56 }
 0x7ff   : > { %3106 = vrot.lane.b32.xlu1 %v3052_v44, %s6424_s7  ;;  %v2927_v44 = vmul.f32 %v8335_v34, %v2831_v32  ;;  %v3343_v32 = vld [vmem:[#allocation2 + $0x1a0] sm:$0xff] }
 0x804   : > { %v8407_v3 = vpop.f32.mrf.mxu1 }
 0x806   : > { %v8409_v22 = vpop.f32.mrf.mxu1 }
 0x808   : > { %v8411_v20 = vpop.f32.mrf.mxu1 }
 0x80a   : > { %v8413_v12 = vpop.f32.mrf.mxu1 }
 0x80c   : > { %v8415_v51 = vpop.f32.mrf.mxu1 }
 0x80e   : > { %v8417_v33 = vpop.f32.mrf.mxu1 }
 0x810   : > { %v8419_v39 = vpop.f32.mrf.mxu1 }
 0x812   : > { %v8422_v24 = vpop.f32.mrf.mxu1 }
 0x814   : > { %v8426_v49 = vpop.f32.mrf.mxu1 }
 0x816   : > { %v8433_v15 = vpop.f32.mrf.mxu1 }
 0x818   : > { %v8439_v37 = vpop.f32.mrf.mxu1 }
 0x81a   : > { %3359 = vmax.xlane.f32.xlu0 %v8407_v3  ;;  %v8444_v46 = vpop.f32.mrf.mxu1 }
 0x81c   : > { %v8449_v7 = vpop.f32.mrf.mxu1 }
 0x81e   : > { %3355 = vmax.xlane.f32.xlu0 %v8409_v22  ;;  %v8451_v60 = vpop.f32.mrf.mxu1 }
 0x820   : > { %v8455_v19 = vpop.f32.mrf.mxu1 }
 0x822   : > { %3361 = vmax.xlane.f32.xlu0 %v8411_v20  ;;  %v3085_v4 = vpop.permute.xlu0 %3084  ;;  %v8459_v1 = vpop.f32.mrf.mxu1 }
 0x823   : > { %3357 = vmax.xlane.f32.xlu1 %v8413_v12  ;;  %v3130_v5 = vadd.f32 %v3085_v4, %v2921_v30 }
 0x825   : > { %3147 = vst.msk [vmem:[#allocation4 + $0x10] sm:$0xff] %vm3144_vm3, %v3130_v5  ;;  %v2837_v5 = vld [vmem:[#allocation4 + $0x70] sm:$0xff] }
 0x826   : > { %3369 = vmax.xlane.f32.xlu0 %v8419_v39  ;;  %v3087_v11 = vpop.permute.xlu1 %3086  ;;  %v3081_v23 = vpop.permute.xlu0 %3080  ;;  %v2933_v36 = vmul.f32 %v8339_v27, %v2837_v5 }
 0x827   : > { %v3131_v48 = vadd.f32 %v3087_v11, %v2922_v52  ;;  %3367 = vmax.xlane.f32.xlu1 %v8415_v51  ;;  %v3128_v13 = vadd.f32 %v3081_v23, %v2919_v16  ;;  %v2928_v16 = vmul.f32 %v8359_v31, %v2832_v40  ;;  %v2835_v23 = vld [vmem:[#allocation4 + $0x60] sm:$0xff] }
 0x829   : > { %3148 = vst.msk [vmem:[#allocation4 + $0x18] sm:$0xff] %vm3144_vm3, %v3131_v48  ;;  %3145 = vst.msk [vmem:[#allocation4] sm:$0xff] %vm3144_vm3, %v3128_v13  ;;  %v2838_v48 = vld [vmem:[#allocation4 + $0x78] sm:$0xff]  ;;  %v2931_v13 = vmul.f32 %v8343_v9, %v2835_v23  ;;  %v8487_v9 = vld [vmem:[#allocation2 + $0x190] sm:$0xff] }
 0x82a   : > { %3365 = vmax.xlane.f32.xlu0 %v8422_v24  ;;  %v3083_v29 = vpop.permute.xlu1 %3082  ;;  %v2934_v0 = vmul.f32 %v8361_v25, %v2838_v48 }
 0x82b   : > { %v3129_v55 = vadd.f32 %v3083_v29, %v2920_v2  ;;  %3363 = vmax.xlane.f32.xlu1 %v8417_v33 }
 0x82d   : > { %3146 = vst.msk [vmem:[#allocation4 + $0x8] sm:$0xff] %vm3144_vm3, %v3129_v55  ;;  %v2836_v55 = vld [vmem:[#allocation4 + $0x68] sm:$0xff] }
 0x82e   : > { %3377 = vmax.xlane.f32.xlu0 %v8439_v37  ;;  %v2932_v59 = vmul.f32 %v8363_v18, %v2836_v55 }
 0x82f   : > { %3375 = vmax.xlane.f32.xlu1 %v8426_v49 }
 0x832   : > { %3373 = vmax.xlane.f32.xlu0 %v8444_v46 }
 0x833   : > { %3371 = vmax.xlane.f32.xlu1 %v8433_v15 }
 0x836   : > { %3385 = vmax.xlane.f32.xlu0 %v8455_v19 }
 0x837   : > { %3383 = vmax.xlane.f32.xlu1 %v8449_v7 }
 0x83a   : > { %3381 = vmax.xlane.f32.xlu0 %v8459_v1 }
 0x83b   : > { %3379 = vmax.xlane.f32.xlu1 %v8451_v60 }
 0x859   : > { %v3093_v45 = vpop.permute.xlu0 %3092 }
 0x85a   : > { %v3134_v26 = vadd.f32 %v3093_v45, %v2925_v53 }
 0x85c   : > { %3151 = vst.msk [vmem:[#allocation4 + $0x30] sm:$0xff] %vm3144_vm3, %v3134_v26 }
 0x85d   : > { %v3095_v8 = vpop.permute.xlu1 %3094  ;;  %v3089_v28 = vpop.permute.xlu0 %3088 }
 0x85e   : > { %v3135_v6 = vadd.f32 %v3095_v8, %v2926_v43  ;;  %v3132_v50 = vadd.f32 %v3089_v28, %v2923_v14  ;;  %v8500_v14 = vld [vmem:[#allocation2 + $0x198] sm:$0xff]  ;;  %v3340_v43 = vld [vmem:[#allocation2 + $0x188] sm:$0xff] }
 0x860   : > { %3152 = vst.msk [vmem:[#allocation4 + $0x38] sm:$0xff] %vm3144_vm3, %v3135_v6  ;;  %3149 = vst.msk [vmem:[#allocation4 + $0x20] sm:$0xff] %vm3144_vm3, %v3132_v50 }
 0x861   : > { %v3091_v35 = vpop.permute.xlu1 %3090  ;;  %v3101_v63 = vpop.permute.xlu0 %3100 }
 0x862   : > { %v3133_v17 = vadd.f32 %v3091_v35, %v2924_v62  ;;  %v3138_v61 = vadd.f32 %v3101_v63, %v2929_v41 }
 0x864   : > { %3150 = vst.msk [vmem:[#allocation4 + $0x28] sm:$0xff] %vm3144_vm3, %v3133_v17  ;;  %3155 = vst.msk [vmem:[#allocation4 + $0x50] sm:$0xff] %vm3144_vm3, %v3138_v61  ;;  %v8522_v17 = vld [vmem:[#allocation2 + $0x1a8] sm:$0xff] }
 0x865   : > { %v3103_v57 = vpop.permute.xlu1 %3102  ;;  %v3097_v38 = vpop.permute.xlu0 %3096 }
 0x866   : > { %v3139_v30 = vadd.f32 %v3103_v57, %v2930_v47  ;;  %v3136_v4 = vadd.f32 %v3097_v38, %v2927_v44  ;;  %v8535_v38 = vld [vmem:[#allocation2 + $0x1d8] sm:$0xff] }
 0x868   : > { %3156 = vst.msk [vmem:[#allocation4 + $0x58] sm:$0xff] %vm3144_vm3, %v3139_v30  ;;  %3153 = vst.msk [vmem:[#allocation4 + $0x40] sm:$0xff] %vm3144_vm3, %v3136_v4  ;;  %v8542_v4 = vld [vmem:[#allocation2 + $0x1d0] sm:$0xff] }
 0x869   : > { %v3099_v34 = vpop.permute.xlu1 %3098  ;;  %v3109_v54 = vpop.permute.xlu0 %3108 }
 0x86a   : > { %v3137_v52 = vadd.f32 %v3099_v34, %v2928_v16  ;;  %v3142_v11 = vadd.f32 %v3109_v54, %v2933_v36  ;;  %v8551_v54 = vld [vmem:[#allocation2 + $0x1c8] sm:$0xff] }
 0x86c   : > { %3154 = vst.msk [vmem:[#allocation4 + $0x48] sm:$0xff] %vm3144_vm3, %v3137_v52  ;;  %3159 = vst.msk [vmem:[#allocation4 + $0x70] sm:$0xff] %vm3144_vm3, %v3142_v11  ;;  %v8558_v11 = vld [vmem:[#allocation2 + $0x1c0] sm:$0xff] }
 0x86d   : > { %v3111_v27 = vpop.permute.xlu1 %3110  ;;  %v3105_v31 = vpop.permute.xlu0 %3104 }
 0x86e   : > { %v3143_v2 = vadd.f32 %v3111_v27, %v2934_v0  ;;  %v3140_v29 = vadd.f32 %v3105_v31, %v2931_v13 }
 0x870   : > { %3160 = vst.msk [vmem:[#allocation4 + $0x78] sm:$0xff] %vm3144_vm3, %v3143_v2  ;;  %3157 = vst.msk [vmem:[#allocation4 + $0x60] sm:$0xff] %vm3144_vm3, %v3140_v29  ;;  %v8571_v29 = vld [vmem:[#allocation2 + $0x1f8] sm:$0xff] }
 0x871   : > { %v3107_v53 = vpop.permute.xlu1 %3106 }
 0x872   : > { %v3141_v45 = vadd.f32 %v3107_v53, %v2932_v59  ;;  %v8578_v59 = vld [vmem:[#allocation2 + $0x1f0] sm:$0xff] }
 0x874   : > { %3158 = vst.msk [vmem:[#allocation4 + $0x68] sm:$0xff] %vm3144_vm3, %v3141_v45 }
 0x8a3   : > { %v3360_v25 = vpop.xlane.xlu0 %3359 }
 0x8a4   : > { %v8490_v26 = vmax.f32 %v8487_v9, %v3360_v25 }
 0x8a6   : > { %3678 = vst.msk [vmem:[#allocation2 + $0x190] sm:$0xff] %vm338_vm1, %v8490_v26  ;;  %3463 = vperm.xlu1 %5803, %v8490_v26  }
 0x8a7   : > { %v3356_v18 = vpop.xlane.xlu0 %3355 }
 0x8a8   : > { %v8498_v58 = vmax.f32 %v8492_v21, %v3356_v18 }
 0x8aa   : > { %3676 = vst.msk [vmem:[#allocation2 + $0x180] sm:$0xff] %vm338_vm1, %v8498_v58  ;;  %3453 = vperm.xlu1 %5803, %v8498_v58  }
 0x8ab   : > { %v3362_v8 = vpop.xlane.xlu0 %3361 }
 0x8ac   : > { %v8506_v28 = vmax.f32 %v8500_v14, %v3362_v8  ;;  %v3358_v6 = vpop.xlane.xlu1 %3357 }
 0x8ad   : > { %v3388_v50 = vmax.f32 %v3340_v43, %v3358_v6 }
 0x8ae   : > { %3679 = vst.msk [vmem:[#allocation2 + $0x198] sm:$0xff] %vm338_vm1, %v8506_v28  ;;  %3468 = vperm.xlu1 %5803, %v8506_v28  }
 0x8af   : > { %3677 = vst.msk [vmem:[#allocation2 + $0x188] sm:$0xff] %vm338_vm1, %v3388_v50  ;;  %3458 = vperm.xlu0 %5802, %v3388_v50   ;;  %v3370_v41 = vpop.xlane.xlu0 %3369  ;;  %v3404_v16 = vsub.f32 %v3340_v43, %v3388_v50  ;;  %v8593_v50 = vld [vmem:[#allocation2 + $0x1e8] sm:$0xff] }
 0x8b0   : > { %v8517_v62 = vmax.f32 %v8508_v42, %v3370_v41  ;;  %v3368_v35 = vpop.xlane.xlu1 %3367  ;;  %v6234_v41 = vld [vmem:[%s7033_s18 + $0x30] sm:$0xff]  }
 0x8b1   : > { %v8520_v63 = vmax.f32 %v8513_v10, %v3368_v35  ;;  %v3421_v27 = vmul.f32 1.442695, %v3404_v16  ;;  %v8597_v35 = vld [vmem:[#allocation2 + $0x1e0] sm:$0xff]  ;;  %v4046_v16 = vld [vmem:[#allocation3 + $0x68] sm:$0xff] }
 0x8b2   : > { %v3410_v61 = vsub.f32 %v8508_v42, %v8517_v62  ;;  %3683 = vst.msk [vmem:[#allocation2 + $0x1b8] sm:$0xff] %vm338_vm1, %v8517_v62  ;;  %3488 = vperm.xlu1 %5803, %v8517_v62  }
 0x8b3   : > { %3682 = vst.msk [vmem:[#allocation2 + $0x1b0] sm:$0xff] %vm338_vm1, %v8520_v63  ;;  %3483 = vperm.xlu0 %5802, %v8520_v63   ;;  %v3366_v56 = vpop.xlane.xlu0 %3365  ;;  %6012 = vpow2.f32 %v3421_v27  ;;  %v3409_v43 = vsub.f32 %v8513_v10, %v8520_v63  ;;  %v6236_v27 = vld [vmem:[%s7033_s18 + $0x20] sm:$0xff]  }
 0x8b4   : > { %v8533_v44 = vmax.f32 %v8522_v17, %v3366_v56  ;;  %v3364_v47 = vpop.xlane.xlu1 %3363 }
 0x8b5   : > { %v3391_v57 = vmax.f32 %v3343_v32, %v3364_v47 }
 0x8b6   : > { %v3408_v30 = vsub.f32 %v8522_v17, %v8533_v44  ;;  %3681 = vst.msk [vmem:[#allocation2 + $0x1a8] sm:$0xff] %vm338_vm1, %v8533_v44  ;;  %3478 = vperm.xlu1 %5803, %v8533_v44  }
 0x8b7   : > { %3680 = vst.msk [vmem:[#allocation2 + $0x1a0] sm:$0xff] %vm338_vm1, %v3391_v57  ;;  %3473 = vperm.xlu0 %5802, %v3391_v57   ;;  %v3378_v5 = vpop.xlane.xlu0 %3377  ;;  %v3407_v31 = vsub.f32 %v3343_v32, %v3391_v57  ;;  %v3431_v57 = vmul.f32 1.442695, %v3409_v43  ;;  %v6238_v43 = vld [vmem:[%s7033_s18 + $0x18] sm:$0xff]  }
 0x8b8   : > { %v8546_v40 = vmax.f32 %v8535_v38, %v3378_v5  ;;  %v3376_v36 = vpop.xlane.xlu1 %3375 }
 0x8b9   : > { %v8549_v34 = vmax.f32 %v8542_v4, %v3376_v36  ;;  %v3427_v8 = vmul.f32 1.442695, %v3407_v31  ;;  %v6235_v36 = vld [vmem:[%s7033_s18 + $0x28] sm:$0xff]   ;;  %v6237_v31 = vld [vmem:[%s7033_s18 + $0x38] sm:$0xff]  }
 0x8ba   : > { %v3414_v52 = vsub.f32 %v8535_v38, %v8546_v40  ;;  %3687 = vst.msk [vmem:[#allocation2 + $0x1d8] sm:$0xff] %vm338_vm1, %v8546_v40  ;;  %3508 = vperm.xlu1 %5803, %v8546_v40  }
 0x8bb   : > { %v3413_v23 = vsub.f32 %v8542_v4, %v8549_v34  ;;  %3686 = vst.msk [vmem:[#allocation2 + $0x1d0] sm:$0xff] %vm338_vm1, %v8549_v34  ;;  %3503 = vperm.xlu0 %5802, %v8549_v34   ;;  %v3374_v48 = vpop.xlane.xlu0 %3373  ;;  %6014 = vpow2.f32 %v3427_v8  ;;  %v3403_v8 = vsub.f32 %v8492_v21, %v8498_v58  ;;  %v3406_v58 = vsub.f32 %v8500_v14, %v8506_v28  ;;  %v4045_v14 = vld [vmem:[#allocation3 + $0x60] sm:$0xff] }
 0x8bc   : > { %v8566_v13 = vmax.f32 %v8551_v54, %v3374_v48  ;;  %v3372_v0 = vpop.xlane.xlu1 %3371  ;;  %6016 = vpow2.f32 %v3431_v57  ;;  %v3405_v57 = vsub.f32 %v8487_v9, %v8490_v26  ;;  %v6241_v28 = vld [vmem:[%s7033_s18] sm:$0xff]  }
 0x8bd   : > { %v8569_v2 = vmax.f32 %v8558_v11, %v3372_v0  ;;  %v4033_v0 = vld [vmem:[#allocation3] sm:$0xff]  ;;  %v3425_v9 = vmul.f32 1.442695, %v3406_v58  ;;  %v4038_v58 = vld [vmem:[#allocation3 + $0x28] sm:$0xff] }
 0x8be   : > { %v3412_v55 = vsub.f32 %v8551_v54, %v8566_v13  ;;  %3685 = vst.msk [vmem:[#allocation2 + $0x1c8] sm:$0xff] %vm338_vm1, %v8566_v13  ;;  %3498 = vperm.xlu1 %5803, %v8566_v13   ;;  %6018 = vrcp.f32 %v4033_v0  ;;  %v3423_v21 = vmul.f32 1.442695, %v3405_v57 }
 0x8bf   : > { %v3411_v53 = vsub.f32 %v8558_v11, %v8569_v2  ;;  %3684 = vst.msk [vmem:[#allocation2 + $0x1c0] sm:$0xff] %vm338_vm1, %v8569_v2  ;;  %3493 = vperm.xlu0 %5802, %v8569_v2   ;;  %v3386_v45 = vpop.xlane.xlu0 %3385 }
 0x8c0   : > { %v3384_v25 = vpop.xlane.xlu1 %3383  ;;  %v8586_v18 = vmax.f32 %v8571_v29, %v3386_v45  ;;  %v8629_v45 = vpop.eup %6012  ;;  %v3437_v17 = vmul.f32 1.442695, %v3412_v55 }
 0x8c1   : > { %v8591_v6 = vmax.f32 %v8578_v59, %v3384_v25  ;;  %v4035_v25 = vld [vmem:[#allocation3 + $0x10] sm:$0xff] }
 0x8c2   : > { %3824 = vrot.lane.b32.xlu1 %v6234_v41, %s6425_s28  ;;  %v3418_v32 = vsub.f32 %v8571_v29, %v8586_v18  ;;  %3691 = vst.msk [vmem:[#allocation2 + $0x1f8] sm:$0xff] %vm338_vm1, %v8586_v18  ;;  %6020 = vrcp.f32 %v4035_v25 }
 0x8c3   : > { %v3417_v10 = vsub.f32 %v8578_v59, %v8591_v6  ;;  %3690 = vst.msk [vmem:[#allocation2 + $0x1f0] sm:$0xff] %vm338_vm1, %v8591_v6  ;;  %3523 = vperm.xlu0 %5802, %v8591_v6   ;;  %v3382_v63 = vpop.xlane.xlu0 %3381 }
 0x8c4   : > { %v3380_v56 = vpop.xlane.xlu1 %3379  ;;  %v8609_v47 = vmax.f32 %v8593_v50, %v3382_v63  ;;  %v4037_v63 = vld [vmem:[#allocation3 + $0x20] sm:$0xff]  ;;  %v3449_v40 = vmul.f32 1.442695, %v3418_v32 }
 0x8c5   : > { %v8612_v5 = vmax.f32 %v8597_v35, %v3380_v56  ;;  %v6239_v56 = vld [vmem:[%s7033_s18 + $0x10] sm:$0xff]   ;;  %6022 = vrcp.f32 %v4037_v63  ;;  %v4034_v63 = vld [vmem:[#allocation3 + $0x8] sm:$0xff] }
 0x8c6   : > { %3822 = vrot.lane.b32.xlu1 %v6235_v36, %s6425_s28  ;;  %3689 = vst.msk [vmem:[#allocation2 + $0x1e8] sm:$0xff] %vm338_vm1, %v8609_v47  ;;  %v3419_v36 = vmul.f32 1.442695, %v3403_v8  ;;  %v4043_v8 = vld [vmem:[#allocation3 + $0x50] sm:$0xff] }
 0x8c7   : > { %v3415_v48 = vsub.f32 %v8597_v35, %v8612_v5  ;;  %3688 = vst.msk [vmem:[#allocation2 + $0x1e0] sm:$0xff] %vm338_vm1, %v8612_v5  ;;  %3513 = vperm.xlu0 %5802, %v8612_v5   ;;  %v4496_v5 = vld [vmem:[#allocation3 + $0x168] sm:$0xff] }
 0x8c8   : > { %v8636_v41 = vpop.eup %6014  ;;  %6024 = vpow2.f32 %v3419_v36  ;;  %v4036_v36 = vld [vmem:[#allocation3 + $0x18] sm:$0xff] }
 0x8c9   : > { %v8643_v0 = vpop.eup %6016 }
 0x8ca   : > { %3820 = vrot.lane.b32.xlu1 %v6236_v27, %s6425_s28  ;;  %v4039_v27 = vld [vmem:[#allocation3 + $0x30] sm:$0xff] }
 0x8cb   : > { %3826 = vrot.lane.b32.xlu0 %v6237_v31, %s6425_s28  ;;  %v6240_v31 = vld [vmem:[%s7033_s18 + $0x8] sm:$0xff]   ;;  %6026 = vrcp.f32 %v4039_v27  ;;  %v6019_v25 = vpop.eup %6018 }
 0x8cc   : > { %6028 = vpow2.f32 %v3423_v21 }
 0x8ce   : > { %3818 = vrot.lane.b32.xlu1 %v6238_v43, %s6425_s28  ;;  %v4041_v43 = vld [vmem:[#allocation3 + $0x40] sm:$0xff] }
 0x8cf   : > { %3715 = vperm.xlu0 %5802, %v8629_v45   ;;  %6030 = vrcp.f32 %v4041_v43  ;;  %v6021_v26 = vpop.eup %6020  ;;  %v4258_v43 = vld [vmem:[#allocation3 + $0x80] sm:$0xff] }
 0x8d0   : > { %6032 = vpow2.f32 %v3425_v9 }
 0x8d1   : > { %6034 = vrcp.f32 %v4043_v8 }
 0x8d2   : > { %3816 = vrot.lane.b32.xlu1 %v6239_v56, %s6425_s28  ;;  %v6023_v56 = vpop.eup %6022  ;;  %6036 = vrcp.f32 %v4034_v63  ;;  %v4260_v63 = vld [vmem:[#allocation3 + $0x90] sm:$0xff] }
 0x8d3   : > { %3730 = vperm.xlu0 %5802, %v8636_v41   ;;  %6038 = vrcp.f32 %v4045_v14  ;;  %v4042_v14 = vld [vmem:[#allocation3 + $0x48] sm:$0xff] }
 0x8d4   : > { %6040 = vrcp.f32 %v4036_v36  ;;  %v4262_v36 = vld [vmem:[#allocation3 + $0xa0] sm:$0xff] }
 0x8d5   : > { %v8654_v57 = vpop.eup %6024 }
 0x8d6   : > { %3814 = vrot.lane.b32.xlu1 %v6240_v31, %s6425_s28  ;;  %v4047_v31 = vld [vmem:[#allocation3 + $0x70] sm:$0xff] }
 0x8d7   : > { %3740 = vperm.xlu0 %5802, %v8643_v0   ;;  %6042 = vrcp.f32 %v4047_v31  ;;  %v4044_v31 = vld [vmem:[#allocation3 + $0x58] sm:$0xff] }
 0x8d8   : > { %v6027_v27 = vpop.eup %6026  ;;  %6044 = vrcp.f32 %v4038_v58 }
 0x8d9   : > { %v8657_v21 = vpop.eup %6028  ;;  %6046 = vrcp.f32 %v4258_v43 }
 0x8da   : > { %3528 = vperm.xlu1 %5803, %v8586_v18  }
 0x8db   : > { %4083 = vperm.xlu0 %5802, %v6019_v25  }
 0x8dc   : > { %v6031_v25 = vpop.eup %6030 }
 0x8dd   : > { %v8660_v9 = vpop.eup %6032 }
 0x8de   : > { %3518 = vperm.xlu1 %5803, %v8609_v47   ;;  %v6035_v8 = vpop.eup %6034 }
 0x8df   : > { %4093 = vperm.xlu0 %5802, %v6021_v26   ;;  %v4040_v26 = vld [vmem:[#allocation3 + $0x38] sm:$0xff] }
 0x8e0   : > { %6048 = vrcp.f32 %v4040_v26 }
 0x8e1   : > { %6050 = vrcp.f32 %v4260_v63 }
 0x8e2   : > { %3812 = vrot.lane.b32.xlu1 %v6241_v28, %s6425_s28  ;;  %6052 = vrcp.f32 %v4042_v14 }
 0x8e3   : > { %4103 = vperm.xlu0 %5802, %v6023_v56   ;;  %v6037_v56 = vpop.eup %6036  ;;  %6054 = vrcp.f32 %v4262_v36 }
 0x8e4   : > { %v6039_v28 = vpop.eup %6038  ;;  %6056 = vrcp.f32 %v4044_v31 }
 0x8e6   : > { %3710 = vperm.xlu1 %5803, %v8654_v57  }
 0x8e7   : > { %4113 = vperm.xlu0 %5802, %v6027_v27   ;;  %v6041_v27 = vpop.eup %6040 }
 0x8e8   : > { %v6043_v58 = vpop.eup %6042 }
 0x8e9   : > { %v6045_v43 = vpop.eup %6044 }
 0x8ea   : > { %3720 = vperm.xlu1 %5803, %v8657_v21   ;;  %v6047_v26 = vpop.eup %6046 }
 0x8eb   : > { %4123 = vperm.xlu0 %5802, %v6031_v25   ;;  %v4264_v25 = vld [vmem:[#allocation3 + $0xb0] sm:$0xff] }
 0x8ec   : > { %6058 = vrcp.f32 %v4264_v25 }
 0x8ed   : > { %6060 = vrcp.f32 %v4046_v16  ;;  %v6049_v63 = vpop.eup %6048 }
 0x8ee   : > { %3725 = vperm.xlu1 %5803, %v8660_v9   ;;  %v6051_v14 = vpop.eup %6050 }
 0x8ef   : > { %4133 = vperm.xlu0 %5802, %v6035_v8   ;;  %v4266_v8 = vld [vmem:[#allocation3 + $0xc0] sm:$0xff]  ;;  %v6053_v36 = vpop.eup %6052 }
 0x8f0   : > { %6062 = vrcp.f32 %v4266_v8  ;;  %v6055_v31 = vpop.eup %6054 }
 0x8f1   : > { %v6057_v25 = vpop.eup %6056 }
 0x8f2   : > { %4088 = vperm.xlu1 %5803, %v6037_v56   ;;  %v4048_v56 = vld [vmem:[#allocation3 + $0x78] sm:$0xff] }
 0x8f3   : > { %4143 = vperm.xlu0 %5802, %v6039_v28   ;;  %v4268_v28 = vld [vmem:[#allocation3 + $0xd0] sm:$0xff]  ;;  %6064 = vrcp.f32 %v4048_v56 }
 0x8f4   : > { %6066 = vrcp.f32 %v4268_v28 }
 0x8f6   : > { %4098 = vperm.xlu1 %5803, %v6041_v27   ;;  %v4259_v27 = vld [vmem:[#allocation3 + $0x88] sm:$0xff] }
 0x8f7   : > { %4153 = vperm.xlu0 %5802, %v6043_v58   ;;  %v4270_v58 = vld [vmem:[#allocation3 + $0xe0] sm:$0xff]  ;;  %6068 = vrcp.f32 %v4259_v27 }
 0x8f8   : > { %6070 = vrcp.f32 %v4270_v58 }
 0x8f9   : > { %v6059_v16 = vpop.eup %6058 }
 0x8fa   : > { %4108 = vperm.xlu1 %5803, %v6045_v43   ;;  %v4261_v43 = vld [vmem:[#allocation3 + $0x98] sm:$0xff]  ;;  %v6061_v8 = vpop.eup %6060 }
 0x8fb   : > { %4308 = vperm.xlu0 %5802, %v6047_v26   ;;  %v4272_v26 = vld [vmem:[#allocation3 + $0xf0] sm:$0xff]  ;;  %6072 = vrcp.f32 %v4261_v43 }
 0x8fc   : > { %6074 = vrcp.f32 %v4272_v26 }
 0x8fd   : > { %v6063_v56 = vpop.eup %6062 }
 0x8fe   : > { %4118 = vperm.xlu1 %5803, %v6049_v63   ;;  %v4263_v63 = vld [vmem:[#allocation3 + $0xa8] sm:$0xff] }
 0x8ff   : > { %4318 = vperm.xlu0 %5802, %v6051_v14   ;;  %v4483_v14 = vld [vmem:[#allocation3 + $0x100] sm:$0xff]  ;;  %6076 = vrcp.f32 %v4263_v63 }
 0x900   : > { %v6065_v28 = vpop.eup %6064  ;;  %6078 = vrcp.f32 %v4483_v14 }
 0x901   : > { %v6067_v27 = vpop.eup %6066 }
 0x902   : > { %4128 = vperm.xlu1 %5803, %v6053_v36   ;;  %v4265_v36 = vld [vmem:[#allocation3 + $0xb8] sm:$0xff] }
 0x903   : > { %4328 = vperm.xlu0 %5802, %v6055_v31   ;;  %v4485_v31 = vld [vmem:[#allocation3 + $0x110] sm:$0xff]  ;;  %6080 = vrcp.f32 %v4265_v36 }
 0x904   : > { %v6069_v58 = vpop.eup %6068  ;;  %6082 = vrcp.f32 %v4485_v31 }
 0x905   : > { %v6071_v43 = vpop.eup %6070 }
 0x906   : > { %4138 = vperm.xlu1 %5803, %v6057_v25   ;;  %v4267_v25 = vld [vmem:[#allocation3 + $0xc8] sm:$0xff] }
 0x907   : > { %4338 = vperm.xlu0 %5802, %v6059_v16   ;;  %v4487_v16 = vld [vmem:[#allocation3 + $0x120] sm:$0xff]  ;;  %6084 = vrcp.f32 %v4267_v25 }
 0x908   : > { %v6073_v26 = vpop.eup %6072  ;;  %6086 = vrcp.f32 %v4487_v16 }
 0x909   : > { %v6075_v63 = vpop.eup %6074 }
 0x90a   : > { %4148 = vperm.xlu1 %5803, %v6061_v8   ;;  %v4269_v8 = vld [vmem:[#allocation3 + $0xd8] sm:$0xff] }
 0x90b   : > { %4348 = vperm.xlu0 %5802, %v6063_v56   ;;  %v4489_v56 = vld [vmem:[#allocation3 + $0x130] sm:$0xff]  ;;  %6088 = vrcp.f32 %v4269_v8 }
 0x90c   : > { %v6077_v14 = vpop.eup %6076  ;;  %6090 = vrcp.f32 %v4489_v56  ;;  %v4495_v56 = vld [vmem:[#allocation3 + $0x160] sm:$0xff] }
 0x90d   : > { %v6079_v36 = vpop.eup %6078 }
 0x90e   : > { %4158 = vperm.xlu1 %5803, %v6065_v28   ;;  %v4271_v28 = vld [vmem:[#allocation3 + $0xe8] sm:$0xff] }
 0x90f   : > { %4358 = vperm.xlu0 %5802, %v6067_v27   ;;  %v4491_v27 = vld [vmem:[#allocation3 + $0x140] sm:$0xff]  ;;  %6092 = vrcp.f32 %v4271_v28  ;;  %v4486_v28 = vld [vmem:[#allocation3 + $0x118] sm:$0xff] }
 0x910   : > { %v6081_v31 = vpop.eup %6080  ;;  %6094 = vrcp.f32 %v4491_v27 }
 0x911   : > { %v6083_v25 = vpop.eup %6082 }
 0x912   : > { %4313 = vperm.xlu1 %5803, %v6069_v58   ;;  %v4273_v58 = vld [vmem:[#allocation3 + $0xf8] sm:$0xff] }
 0x913   : > { %4368 = vperm.xlu0 %5802, %v6071_v43   ;;  %v4493_v43 = vld [vmem:[#allocation3 + $0x150] sm:$0xff]  ;;  %6096 = vrcp.f32 %v4273_v58 }
 0x914   : > { %v6085_v16 = vpop.eup %6084  ;;  %6098 = vrcp.f32 %v4493_v43  ;;  %v4488_v43 = vld [vmem:[#allocation3 + $0x128] sm:$0xff] }
 0x916   : > { %4323 = vperm.xlu1 %5803, %v6073_v26   ;;  %v4484_v26 = vld [vmem:[#allocation3 + $0x108] sm:$0xff] }
 0x917   : > { %4378 = vperm.xlu0 %5802, %v6075_v63   ;;  %v6087_v63 = vpop.eup %6086  ;;  %6100 = vrcp.f32 %v4484_v26 }
 0x918   : > { %6102 = vrcp.f32 %v4495_v56 }
 0x919   : > { %6104 = vrcp.f32 %v4486_v28 }
 0x91a   : > { %4333 = vperm.xlu1 %5803, %v6077_v14   ;;  %v6089_v14 = vpop.eup %6088 }
 0x91b   : > { %4533 = vperm.xlu0 %5802, %v6079_v36   ;;  %v3439_v36 = vmul.f32 1.442695, %v3413_v23  ;;  %v4490_v23 = vld [vmem:[#allocation3 + $0x138] sm:$0xff] }
 0x91d   : > { %6106 = vpow2.f32 %v3439_v36  ;;  %v4492_v36 = vld [vmem:[#allocation3 + $0x148] sm:$0xff] }
 0x91e   : > { %4343 = vperm.xlu1 %5803, %v6081_v31   ;;  %v6091_v31 = vpop.eup %6090  ;;  %6108 = vrcp.f32 %v4488_v43 }
 0x91f   : > { %4543 = vperm.xlu0 %5802, %v6083_v25   ;;  %v6093_v25 = vpop.eup %6092 }
 0x921   : > { %v8663_v8 = vpop.permute.xlu1 %3463 }
 0x922   : > { %4353 = vperm.xlu1 %5803, %v6085_v16   ;;  %v3435_v16 = vmul.f32 1.442695, %v3411_v53  ;;  %v3533_v38 = vsub.f32 %v8407_v3, %v8663_v8 }
 0x923   : > { %4553 = vperm.xlu0 %5802, %v6087_v63   ;;  %v6095_v63 = vpop.eup %6094 }
 0x924   : > { %6110 = vpow2.f32 %v3435_v16 }
 0x925   : > { %v3454_v27 = vpop.permute.xlu1 %3453 }
 0x926   : > { %v3531_v58 = vsub.f32 %v8409_v22, %v3454_v27  ;;  %4363 = vperm.xlu1 %5803, %v6089_v14   ;;  %v6097_v22 = vpop.eup %6096  ;;  %v3447_v14 = vmul.f32 1.442695, %v3417_v10  ;;  %v3443_v27 = vmul.f32 1.442695, %v3415_v48 }
 0x927   : > { %4563 = vperm.xlu0 %5802, %v6091_v31   ;;  %v6099_v2 = vpop.eup %6098 }
 0x928   : > { %v3547_v56 = vmul.f32 1.442695, %v3531_v58  ;;  %v4494_v58 = vld [vmem:[#allocation3 + $0x158] sm:$0xff] }
 0x929   : > { %v8672_v26 = vpop.permute.xlu1 %3468 }
 0x92a   : > { %4373 = vperm.xlu1 %5803, %v6093_v25   ;;  %v3459_v4 = vpop.permute.xlu0 %3458  ;;  %6112 = vpow2.f32 %v3547_v56 }
 0x92b   : > { %v3532_v34 = vsub.f32 %v8413_v12, %v3459_v4  ;;  %4573 = vperm.xlu0 %5802, %v6095_v63   ;;  %v6101_v12 = vpop.eup %6100 }
 0x92c   : > { %v6103_v6 = vpop.eup %6102 }
 0x92d   : > { %v3549_v28 = vmul.f32 1.442695, %v3532_v34  ;;  %v8678_v11 = vpop.permute.xlu1 %3488  ;;  %v6105_v31 = vpop.eup %6104 }
 0x92e   : > { %4383 = vperm.xlu1 %5803, %v6097_v22   ;;  %v8680_v53 = vpop.permute.xlu0 %3483  ;;  %v8691_v43 = vpop.eup %6106  ;;  %v3433_v22 = vmul.f32 1.442695, %v3410_v61 }
 0x92f   : > { %6114 = vpow2.f32 %v3549_v28  ;;  %4583 = vperm.xlu0 %5802, %v6099_v2   ;;  %v6109_v35 = vpop.eup %6108 }
 0x930   : > { %6116 = vrcp.f32 %v4490_v23 }
 0x931   : > { %6118 = vpow2.f32 %v3447_v14  ;;  %v8685_v59 = vpop.permute.xlu1 %3478  ;;  %v8698_v63 = vpop.eup %6110 }
 0x932   : > { %4538 = vperm.xlu1 %5803, %v6101_v12   ;;  %v8687_v10 = vpop.permute.xlu0 %3473  ;;  %6120 = vrcp.f32 %v4492_v36  ;;  %v3429_v36 = vmul.f32 1.442695, %v3408_v30  ;;  %v3536_v13 = vsub.f32 %v8422_v24, %v8685_v59 }
 0x933   : > { %4593 = vperm.xlu0 %5802, %v6103_v6   ;;  %6122 = vpow2.f32 %v3443_v27  ;;  %v3441_v6 = vmul.f32 1.442695, %v3414_v52  ;;  %v3534_v52 = vsub.f32 %v8411_v20, %v8672_v26  ;;  %v3535_v8 = vsub.f32 %v8417_v33, %v8687_v10 }
 0x934   : > { %6124 = vrcp.f32 %v4494_v58  ;;  %v3551_v20 = vmul.f32 1.442695, %v3533_v38  ;;  %v3557_v24 = vmul.f32 1.442695, %v3536_v13  ;;  %v3538_v33 = vsub.f32 %v8419_v39, %v8678_v11 }
 0x935   : > { %v8689_v25 = vpop.permute.xlu1 %3508  ;;  %6126 = vrcp.f32 %v4496_v5  ;;  %v3553_v18 = vmul.f32 1.442695, %v3534_v52  ;;  %v3555_v59 = vmul.f32 1.442695, %v3535_v8 }
 0x936   : > { %4548 = vperm.xlu1 %5803, %v6105_v31   ;;  %v8693_v16 = vpop.permute.xlu0 %3503  ;;  %6128 = vpow2.f32 %v3433_v22  ;;  %v9402_v22 = vsub.f32 %v8593_v50, %v8609_v47  ;;  %v3537_v47 = vsub.f32 %v8415_v51, %v8680_v53  ;;  %v3561_v11 = vmul.f32 1.442695, %v3538_v33 }
 0x937   : > { %3760 = vperm.xlu0 %5802, %v8691_v43   ;;  %v8702_v4 = vpop.eup %6112  ;;  %6130 = vpow2.f32 %v3429_v36 }
 0x938   : > { %6132 = vpow2.f32 %v3441_v6  ;;  %v3445_v3 = vmul.f32 1.442695, %v9402_v22  ;;  %v3559_v36 = vmul.f32 1.442695, %v3537_v47 }
 0x939   : > { %v8696_v48 = vpop.permute.xlu1 %3498  ;;  %6134 = vpow2.f32 %v3437_v17 }
 0x93a   : > { %4558 = vperm.xlu1 %5803, %v6109_v35   ;;  %v8700_v56 = vpop.permute.xlu0 %3493  ;;  %6136 = vpow2.f32 %v3449_v40 }
 0x93b   : > { %3750 = vperm.xlu0 %5802, %v8698_v63   ;;  %6138 = vpow2.f32 %v3445_v3 }
 0x93c   : > { %v8705_v34 = vpop.eup %6114  ;;  %6140 = vpow2.f32 %v3551_v20 }
 0x93d   : > { %v6117_v23 = vpop.eup %6116  ;;  %v3825_v14 = vpop.permute.xlu1 %3824  ;;  %v3804_v28 = vpack.c.bf16 %v8705_v34, %v8702_v4  ;;  %6142 = vpow2.f32 %v3553_v18 }
 0x93e   : > { %v8712_v2 = vpop.eup %6118  ;;  %4568 = vperm.xlu1 %5803, %v6117_v23   ;;  %v8714_v12 = vpop.permute.xlu0 %3523  ;;  %6144 = vpow2.f32 %v3557_v24  ;;  %v3540_v23 = vsub.f32 %v8444_v46, %v8696_v48 }
 0x93f   : > { %5671 = vmatprep.mubr.bf16.mxu0 %v3804_v28  ;;  %3780 = vperm.xlu0 %5802, %v8712_v2   ;;  %v6121_v42 = vpop.eup %6120  ;;  %6146 = vpow2.f32 %v3555_v59  ;;  %v3539_v28 = vsub.f32 %v8433_v15, %v8700_v56  ;;  %v3542_v15 = vsub.f32 %v8439_v37, %v8689_v25  ;;  %v3541_v56 = vsub.f32 %v8426_v49, %v8693_v16 }
 0x940   : > { %v8720_v61 = vpop.eup %6122  ;;  %v3565_v53 = vmul.f32 1.442695, %v3540_v23  ;;  %6148 = vpow2.f32 %v3561_v11  ;;  %v3545_v3 = vsub.f32 %v8449_v7, %v8714_v12 }
 0x941   : > { %v3823_v62 = vpop.permute.xlu1 %3822  ;;  %v6125_v31 = vpop.eup %6124  ;;  %6150 = vpow2.f32 %v3559_v36  ;;  %v3569_v37 = vmul.f32 1.442695, %v3542_v15  ;;  %v3567_v49 = vmul.f32 1.442695, %v3541_v56 }
 0x942   : > { %4578 = vperm.xlu1 %5803, %v6121_v42   ;;  %v8722_v27 = vpop.permute.xlu0 %3513  ;;  %v6127_v44 = vpop.eup %6126  ;;  %6152 = vpow2.f32 %v3565_v53 }
 0x943   : > { %3770 = vperm.xlu0 %5802, %v8720_v61   ;;  %v8740_v54 = vpop.eup %6128  ;;  %v3543_v25 = vsub.f32 %v8451_v60, %v8722_v27 }
 0x944   : > { %v8752_v32 = vpop.eup %6130 }
 0x945   : > { %v3821_v58 = vpop.permute.xlu1 %3820  ;;  %v8761_v10 = vpop.eup %6132  ;;  %v3571_v52 = vmul.f32 1.442695, %v3543_v25 }
 0x946   : > { %4588 = vperm.xlu1 %5803, %v6125_v31   ;;  %v3827_v35 = vpop.permute.xlu0 %3826  ;;  %v8770_v51 = vpop.eup %6134 }
 0x947   : > { %5655 = vmatprep.subr.bf16.mxu0 %v3827_v35  ;;  %v8777_v48 = vpop.eup %6136 }
 0x948   : > { %5656 = vmatpush3.bf16.msra.mxu0 %v3827_v35  ;;  %v8785_v35 = vpop.eup %6138 }
 0x949   : > { %v3819_v30 = vpop.permute.xlu1 %3818  ;;  %5657 = vmatprep.subr.bf16.mxu0 %v3825_v14  ;;  %v6141_v17 = vpop.eup %6140 }
 0x94a   : > { %4598 = vperm.xlu1 %5803, %v6127_v44   ;;  %v8731_v5 = vpop.permute.xlu0 %3715  ;;  %v6143_v44 = vpop.eup %6142 }
 0x94b   : > { %v3805_v13 = vpack.c.bf16 %v6143_v44, %v6141_v17 }
 0x94c   : > { %5658 = vmatpush3.bf16.msra.mxu0 %v3825_v14 }
 0x94d   : > { %v3817_v55 = vpop.permute.xlu1 %3816  ;;  %5659 = vmatprep.subr.bf16.mxu0 %v3823_v62 }
 0x94e   : > { %3745 = vperm.xlu1 %5803, %v8740_v54   ;;  %v8750_v29 = vpop.permute.xlu0 %3730 }
 0x950   : > { %5660 = vmatpush3.bf16.msra.mxu0 %v3823_v62  ;;  %v3563_v62 = vmul.f32 1.442695, %v3539_v28 }
 0x951   : > { %v3815_v26 = vpop.permute.xlu1 %3814  ;;  %5661 = vmatprep.subr.bf16.mxu0 %v3821_v58 }
 0x952   : > { %3735 = vperm.xlu1 %5803, %v8752_v32   ;;  %v8755_v50 = vpop.permute.xlu0 %3740  ;;  %6154 = vpow2.f32 %v3563_v62 }
 0x953   : > { %6156 = vpow2.f32 %v3569_v37 }
 0x954   : > { %5662 = vmatpush3.bf16.msra.mxu0 %v3821_v58  ;;  %6158 = vpow2.f32 %v3567_v49 }
 0x955   : > { %v3529_v14 = vpop.permute.xlu1 %3528  ;;  %5663 = vmatprep.subr.bf16.mxu0 %v3819_v30 }
 0x956   : > { %3765 = vperm.xlu1 %5803, %v8761_v10   ;;  %v8768_v39 = vpop.permute.xlu0 %4083  ;;  %v3546_v60 = vsub.f32 %v8455_v19, %v3529_v14 }
 0x958   : > { %5664 = vmatpush3.bf16.msra.mxu0 %v3819_v30  ;;  %v6145_v30 = vpop.eup %6144  ;;  %v3577_v18 = vmul.f32 1.442695, %v3546_v60  ;;  %v4498_v60 = vld [vmem:[#allocation3 + $0x178] sm:$0xff] }
 0x959   : > { %v3519_v42 = vpop.permute.xlu1 %3518  ;;  %5665 = vmatprep.subr.bf16.mxu0 %v3817_v55  ;;  %v6147_v40 = vpop.eup %6146 }
 0x95a   : > { %3755 = vperm.xlu1 %5803, %v8770_v51   ;;  %v8773_v46 = vpop.permute.xlu0 %4093  ;;  %v3544_v31 = vsub.f32 %v8459_v1, %v3519_v42  ;;  %v3806_v22 = vpack.c.bf16 %v6145_v30, %v6147_v40  ;;  %v6149_v8 = vpop.eup %6148 }
 0x95b   : > { %v6151_v20 = vpop.eup %6150 }
 0x95c   : > { %5666 = vmatpush3.bf16.msra.mxu0 %v3817_v55  ;;  %v3573_v38 = vmul.f32 1.442695, %v3544_v31  ;;  %v6153_v19 = vpop.eup %6152  ;;  %v3807_v47 = vpack.c.bf16 %v6149_v8, %v6151_v20 }
 0x95d   : > { %v3813_v6 = vpop.permute.xlu1 %3812  ;;  %5667 = vmatprep.subr.bf16.mxu0 %v3815_v26 }
 0x95e   : > { %3785 = vperm.xlu1 %5803, %v8777_v48   ;;  %v8783_v58 = vpop.permute.xlu0 %4103  ;;  %6160 = vpow2.f32 %v3573_v38 }
 0x95f   : > { %6162 = vpow2.f32 %v3571_v52  ;;  %v6155_v59 = vpop.eup %6154 }
 0x960   : > { %5668 = vmatpush3.bf16.msra.mxu0 %v3815_v26  ;;  %6164 = vpow2.f32 %v3577_v18  ;;  %v3808_v7 = vpack.c.bf16 %v6153_v19, %v6155_v59  ;;  %v6157_v23 = vpop.eup %6156 }
 0x961   : > { %v8789_v16 = vpop.permute.xlu1 %3710  ;;  %5669 = vmatprep.subr.bf16.mxu0 %v3813_v6  ;;  %v6159_v28 = vpop.eup %6158 }
 0x962   : > { %3775 = vperm.xlu1 %5803, %v8785_v35   ;;  %3616 = vadd.xlane.f32.xlu0 %v6141_v17  ;;  %v8792_v1 = vpop.permute.xlu0 %4113  ;;  %v3809_v62 = vpack.c.bf16 %v6157_v23, %v6159_v28 }
 0x964   : > { %5670 = vmatpush3.bf16.msra.mxu0 %v3813_v6 }
 0x965   : > { %v8795_v27 = vpop.permute.xlu1 %3720 }
 0x966   : > { %3612 = vadd.xlane.f32.xlu0 %v8702_v4  ;;  %v8798_v55 = vpop.permute.xlu0 %4123  ;;  %v3575_v4 = vmul.f32 1.442695, %v3545_v3 }
 0x967   : > { %9403 = vst [vmem:[#allocation22_spill] sm:$0xff] %v8798_v55  ;;  %5672 = vmatmul.mubr.bf16.vlgmr.msra.gmra.mxu0 %v3805_v13  ;;  %v4497_v13 = vld [vmem:[#allocation3 + $0x170] sm:$0xff]  ;;  %v3583_v55 = vld [vmem:[#allocation3 + $0x198] sm:$0xff] }
 0x968   : > { %5675 = vmatprep.mubr.bf16.mxu0 %v3806_v22  ;;  %6166 = vpow2.f32 %v3575_v4 }
 0x969   : > { %v8802_v24 = vpop.permute.xlu1 %3725  ;;  %6168 = vrcp.f32 %v4498_v60 }
 0x96a   : > { %3618 = vadd.xlane.f32.xlu0 %v6143_v44  ;;  %v8804_v26 = vpop.permute.xlu0 %4133  ;;  %6170 = vrcp.f32 %v4497_v13 }
 0x96b   : > { %v6161_v11 = vpop.eup %6160 }
 0x96c   : > { %v6163_v36 = vpop.eup %6162 }
 0x96d   : > { %v8806_v33 = vpop.permute.xlu1 %4088  ;;  %v3810_v15 = vpack.c.bf16 %v6161_v11, %v6163_v36  ;;  %v6165_v6 = vpop.eup %6164 }
 0x96e   : > { %3624 = vadd.xlane.f32.xlu0 %v6151_v20  ;;  %v8808_v12 = vpop.permute.xlu0 %4143 }
 0x96f   : > { %9404 = vst [vmem:[#allocation19_spill] sm:$0xff] %v8808_v12  ;;  %5676 = vmatmul.mubr.bf16.gmra.mxu0 %v3807_v47 }
 0x970   : > { %5679 = vmatprep.mubr.bf16.mxu0 %v3808_v7 }
 0x971   : > { %v8810_v14 = vpop.permute.xlu1 %4098 }
 0x972   : > { %3620 = vadd.xlane.f32.xlu0 %v6147_v40  ;;  %v8812_v53 = vpop.permute.xlu0 %4153 }
 0x973   : > { %9405 = vst [vmem:[#allocation20_spill] sm:$0xff] %v8812_v53 }
 0x975   : > { %v8814_v42 = vpop.permute.xlu1 %4108  ;;  %v6167_v17 = vpop.eup %6166 }
 0x976   : > { %9406 = vst [vmem:[#allocation38_spill] sm:$0xff] %v8814_v42  ;;  %3626 = vadd.xlane.f32.xlu0 %v6149_v8  ;;  %v8818_v31 = vpop.permute.xlu0 %4308  ;;  %v3811_v25 = vpack.c.bf16 %v6165_v6, %v6167_v17 }
 0x977   : > { %5680 = vmatmul.mubr.bf16.gmra.mxu0 %v3809_v62 }
 0x978   : > { %5683 = vmatprep.mubr.bf16.mxu0 %v3810_v15 }
 0x979   : > { %v8816_v56 = vpop.permute.xlu1 %4118 }
 0x97a   : > { %3622 = vadd.xlane.f32.xlu0 %v6145_v30  ;;  %v8822_v44 = vpop.permute.xlu0 %4318 }
 0x97d   : > { %v8820_v37 = vpop.permute.xlu1 %4128 }
 0x97e   : > { %9407 = vst [vmem:[#allocation37_spill] sm:$0xff] %v8820_v37  ;;  %3628 = vadd.xlane.f32.xlu0 %v6155_v59  ;;  %v8827_v38 = vpop.permute.xlu0 %4328 }
 0x97f   : > { %5684 = vmatmul.mubr.bf16.gmra.mxu0 %v3811_v25 }
 0x981   : > { %v8824_v49 = vpop.permute.xlu1 %4138 }
 0x982   : > { %9408 = vst [vmem:[#allocation41_spill] sm:$0xff] %v8824_v49  ;;  %3634 = vadd.xlane.f32.xlu0 %v6157_v23  ;;  %v8831_v30 = vpop.permute.xlu0 %4338 }
 0x985   : > { %v8829_v40 = vpop.permute.xlu1 %4148 }
 0x986   : > { %3614 = vadd.xlane.f32.xlu1 %v8705_v34  ;;  %3630 = vadd.xlane.f32.xlu0 %v6153_v19  ;;  %9409 = vst [vmem:[#allocation21_spill] sm:$0xff] %v8829_v40  ;;  %v8835_v22 = vpop.permute.xlu0 %4348  ;;  %v6169_v19 = vpop.eup %6168 }
 0x987   : > { %9411 = vst [vmem:[#allocation39_spill] sm:$0xff] %v8835_v22  ;;  %v6171_v59 = vpop.eup %6170 }
 0x989   : > { %v8833_v52 = vpop.permute.xlu1 %4158 }
 0x98a   : > { %3632 = vadd.xlane.f32.xlu1 %v6159_v28  ;;  %3642 = vadd.xlane.f32.xlu0 %v6165_v6  ;;  %9410 = vst [vmem:[#allocation42_spill] sm:$0xff] %v8833_v52  ;;  %v8839_v34 = vpop.permute.xlu0 %4358 }
 0x98d   : > { %v8837_v3 = vpop.permute.xlu1 %4313 }
 0x98e   : > { %3640 = vadd.xlane.f32.xlu1 %v6167_v17  ;;  %3638 = vadd.xlane.f32.xlu0 %v6161_v11  ;;  %v8843_v20 = vpop.permute.xlu0 %4368 }
 0x98f   : > { %9412 = vst [vmem:[#allocation40_spill] sm:$0xff] %v8843_v20 }
 0x991   : > { %v8841_v8 = vpop.permute.xlu1 %4323 }
 0x992   : > { %3636 = vadd.xlane.f32.xlu1 %v6163_v36  ;;  %v8847_v4 = vpop.permute.xlu0 %4378 }
 0x993   : > { %9414 = vst [vmem:[#allocation26_spill] sm:$0xff] %v8847_v4 }
 0x995   : > { %v8845_v18 = vpop.permute.xlu1 %4333 }
 0x996   : > { %9413 = vst [vmem:[#allocation23_spill] sm:$0xff] %v8845_v18  ;;  %v8851_v7 = vpop.permute.xlu0 %4533 }
 0x999   : > { %v8849_v47 = vpop.permute.xlu1 %4343 }
 0x99a   : > { %v8855_v28 = vpop.permute.xlu0 %4543 }
 0x99d   : > { %v8853_v23 = vpop.permute.xlu1 %4353 }
 0x99e   : > { %9415 = vst [vmem:[#allocation25_spill] sm:$0xff] %v8853_v23  ;;  %v8859_v36 = vpop.permute.xlu0 %4553  ;;  %v3582_v23 = vld [vmem:[#allocation3 + $0x190] sm:$0xff] }
 0x9a1   : > { %v8857_v11 = vpop.permute.xlu1 %4363 }
 0x9a2   : > { %9416 = vst [vmem:[#allocation24_spill] sm:$0xff] %v8857_v11  ;;  %v8863_v15 = vpop.permute.xlu0 %4563  ;;  %v3580_v11 = vld [vmem:[#allocation3 + $0x180] sm:$0xff] }
 0x9a3   : > { %4608 = vperm.xlu1 %5803, %v6169_v19  }
 0x9a4   : > { %4603 = vperm.xlu0 %5802, %v6171_v59  }
 0x9a5   : > { %v8861_v62 = vpop.permute.xlu1 %4373 }
 0x9a6   : > { %9417 = vst [vmem:[#allocation30_spill] sm:$0xff] %v8861_v62  ;;  %v8867_v17 = vpop.permute.xlu0 %4573 }
 0x9a7   : > { %9419 = vst [vmem:[#allocation29_spill] sm:$0xff] %v8867_v17 }
 0x9a9   : > { %v8865_v6 = vpop.permute.xlu1 %4383 }
 0x9aa   : > { %9418 = vst [vmem:[#allocation28_spill] sm:$0xff] %v8865_v6  ;;  %v8871_v60 = vpop.permute.xlu0 %4583 }
 0x9ad   : > { %v8869_v25 = vpop.permute.xlu1 %4538 }
 0x9ae   : > { %v8875_v19 = vpop.permute.xlu0 %4593 }
 0x9af   : > { %9420 = vst [vmem:[#allocation34_spill] sm:$0xff] %v8875_v19  ;;  %v3598_v19 = vmul.f32 %v8657_v21, %v3582_v23  ;;  %v3586_v21 = vld [vmem:[#allocation3 + $0x1b0] sm:$0xff] }
 0x9b1   : > { %v8873_v13 = vpop.permute.xlu1 %4548 }
 0x9b2   : > { %v8879_v52 = vpop.permute.xlu0 %3760 }
 0x9b5   : > { %v8877_v59 = vpop.permute.xlu1 %4558 }
 0x9b6   : > { %9421 = vst [vmem:[#allocation33_spill] sm:$0xff] %v8877_v59  ;;  %v8883_v62 = vpop.permute.xlu0 %3750 }
 0x9b9   : > { %v8881_v40 = vpop.permute.xlu1 %4568 }
 0x9ba   : > { %v8887_v6 = vpop.permute.xlu0 %3780 }
 0x9bd   : > { %v8885_v4 = vpop.permute.xlu1 %4578 }
 0x9be   : > { %9422 = vst [vmem:[#allocation27_spill] sm:$0xff] %v8885_v4  ;;  %v8891_v20 = vpop.permute.xlu0 %3770  ;;  %v3596_v4 = vmul.f32 %v8654_v57, %v3580_v11  ;;  %v3584_v57 = vld [vmem:[#allocation3 + $0x1a0] sm:$0xff] }
 0x9c1   : > { %v8889_v53 = vpop.permute.xlu1 %4588 }
 0x9c2   : > { %9423 = vst [vmem:[#allocation32_spill] sm:$0xff] %v8889_v53  ;;  %v3599_v53 = vmul.f32 %v8660_v9, %v3583_v55  ;;  %v3600_v9 = vmul.f32 %v8636_v41, %v3584_v57 }
 0x9c5   : > { %v8893_v12 = vpop.permute.xlu1 %4598 }
 0x9c6   : > { %9424 = vst [vmem:[#allocation31_spill] sm:$0xff] %v8893_v12 }
 0x9c9   : > { %v8896_v17 = vpop.permute.xlu1 %3745 }
 0x9cd   : > { %v8902_v12 = vpop.permute.xlu1 %3735 }
 0x9eb   : > { %v3617_v37 = vpop.xlane.xlu0 %3616 }
 0x9ec   : > { %v3646_v49 = vadd.f32 %v3617_v37, %v3598_v19  ;;  %v3602_v37 = vmul.f32 %v8643_v0, %v3586_v21  ;;  %v8906_v19 = vpop.permute.xlu1 %3765  ;;  %v3585_v21 = vld [vmem:[#allocation3 + $0x1a8] sm:$0xff] }
 0x9ed   : > { %v3601_v41 = vmul.f32 %v8752_v32, %v3585_v21 }
 0x9ee   : > { %3662 = vst.msk [vmem:[#allocation3 + $0x190] sm:$0xff] %vm338_vm1, %v3646_v49 }
 0x9ef   : > { %v3613_v22 = vpop.xlane.xlu0 %3612 }
 0x9f0   : > { %v3644_v59 = vadd.f32 %v3613_v22, %v3596_v4  ;;  %v3587_v4 = vld [vmem:[#allocation3 + $0x1b8] sm:$0xff] }
 0x9f1   : > { %v3603_v0 = vmul.f32 %v8740_v54, %v3587_v4 }
 0x9f2   : > { %3660 = vst.msk [vmem:[#allocation3 + $0x180] sm:$0xff] %vm338_vm1, %v3644_v59 }
 0x9f3   : > { %v3619_v18 = vpop.xlane.xlu0 %3618 }
 0x9f4   : > { %v3647_v23 = vadd.f32 %v3619_v18, %v3599_v53 }
 0x9f5   : > { %v4710_v42 = vld [vmem:[#allocation3 + $0x190] sm:$0xff] }
 0x9f6   : > { %6172 = vrcp.f32 %v4710_v42  ;;  %3663 = vst.msk [vmem:[#allocation3 + $0x198] sm:$0xff] %vm338_vm1, %v3647_v23  ;;  %v8912_v42 = vpop.permute.xlu1 %3755 }
 0x9f7   : > { %v3625_v49 = vpop.xlane.xlu0 %3624 }
 0x9f8   : > { %v3650_v11 = vadd.f32 %v3625_v49, %v3602_v37 }
 0x9f9   : > { %v4708_v22 = vld [vmem:[#allocation3 + $0x180] sm:$0xff] }
 0x9fa   : > { %6174 = vrcp.f32 %v4708_v22  ;;  %3666 = vst.msk [vmem:[#allocation3 + $0x1b0] sm:$0xff] %vm338_vm1, %v3650_v11  ;;  %v3588_v11 = vld [vmem:[#allocation3 + $0x1c0] sm:$0xff] }
 0x9fb   : > { %v3621_v55 = vpop.xlane.xlu0 %3620  ;;  %v3604_v54 = vmul.f32 %v8698_v63, %v3588_v11 }
 0x9fc   : > { %v3648_v53 = vadd.f32 %v3621_v55, %v3600_v9  ;;  %v8916_v9 = vpop.permute.xlu1 %3785 }
 0x9fd   : > { %v4711_v18 = vld [vmem:[#allocation3 + $0x198] sm:$0xff] }
 0x9fe   : > { %6176 = vrcp.f32 %v4711_v18  ;;  %3664 = vst.msk [vmem:[#allocation3 + $0x1a0] sm:$0xff] %vm338_vm1, %v3648_v53  ;;  %v3591_v18 = vld [vmem:[#allocation3 + $0x1d8] sm:$0xff] }
 0x9ff   : > { %v3627_v59 = vpop.xlane.xlu0 %3626  ;;  %v3607_v32 = vmul.f32 %v8761_v10, %v3591_v18 }
 0xa00   : > { %v3651_v23 = vadd.f32 %v3627_v59, %v3603_v0  ;;  %v8922_v21 = vpop.permute.xlu1 %3775 }
 0xa01   : > { %v4714_v37 = vld [vmem:[#allocation3 + $0x1b0] sm:$0xff] }
 0xa02   : > { %6178 = vrcp.f32 %v4714_v37  ;;  %3667 = vst.msk [vmem:[#allocation3 + $0x1b8] sm:$0xff] %vm338_vm1, %v3651_v23  ;;  %v3581_v37 = vld [vmem:[#allocation3 + $0x188] sm:$0xff] }
 0xa03   : > { %v6173_v49 = vpop.eup %6172  ;;  %v3623_v57 = vpop.xlane.xlu0 %3622  ;;  %v3597_v63 = vmul.f32 %v8629_v45, %v3581_v37 }
 0xa04   : > { %v3649_v22 = vadd.f32 %v3623_v57, %v3601_v41  ;;  %4768 = vperm.xlu0 %5802, %v6173_v49   ;;  %v3589_v41 = vld [vmem:[#allocation3 + $0x1c8] sm:$0xff] }
 0xa05   : > { %v4712_v55 = vld [vmem:[#allocation3 + $0x1a0] sm:$0xff]  ;;  %v3605_v57 = vmul.f32 %v8770_v51, %v3589_v41  ;;  %v3594_v51 = vld [vmem:[#allocation3 + $0x1f0] sm:$0xff] }
 0xa06   : > { %6180 = vrcp.f32 %v4712_v55  ;;  %3665 = vst.msk [vmem:[#allocation3 + $0x1a8] sm:$0xff] %vm338_vm1, %v3649_v22 }
 0xa07   : > { %v6175_v4 = vpop.eup %6174  ;;  %v3629_v53 = vpop.xlane.xlu0 %3628 }
 0xa08   : > { %v3652_v0 = vadd.f32 %v3629_v53, %v3604_v54  ;;  %4758 = vperm.xlu0 %5802, %v6175_v4   ;;  %v3590_v54 = vld [vmem:[#allocation3 + $0x1d0] sm:$0xff]  ;;  %v3595_v4 = vld [vmem:[#allocation3 + $0x1f8] sm:$0xff] }
 0xa09   : > { %v3606_v18 = vmul.f32 %v8691_v43, %v3590_v54  ;;  %v4715_v54 = vld [vmem:[#allocation3 + $0x1b8] sm:$0xff] }
 0xa0a   : > { %3668 = vst.msk [vmem:[#allocation3 + $0x1c0] sm:$0xff] %vm338_vm1, %v3652_v0  ;;  %v3611_v0 = vmul.f32 %v8777_v48, %v3595_v4 }
 0xa0b   : > { %v6177_v59 = vpop.eup %6176  ;;  %v3635_v23 = vpop.xlane.xlu0 %3634 }
 0xa0c   : > { %v3655_v49 = vadd.f32 %v3635_v23, %v3607_v32  ;;  %4773 = vperm.xlu1 %5803, %v6177_v59   ;;  %v3593_v23 = vld [vmem:[#allocation3 + $0x1e8] sm:$0xff] }
 0xa0e   : > { %3671 = vst.msk [vmem:[#allocation3 + $0x1d8] sm:$0xff] %vm338_vm1, %v3655_v49  ;;  %v3610_v49 = vmul.f32 %v8712_v2, %v3594_v51 }
 0xa0f   : > { %v6179_v11 = vpop.eup %6178  ;;  %v3615_v22 = vpop.xlane.xlu1 %3614 }
 0xa10   : > { %v3631_v55 = vpop.xlane.xlu0 %3630  ;;  %v3645_v10 = vadd.f32 %v3615_v22, %v3597_v63  ;;  %4788 = vperm.xlu0 %5802, %v6179_v11   ;;  %v3609_v63 = vmul.f32 %v8785_v35, %v3593_v23  ;;  %v3592_v11 = vld [vmem:[#allocation3 + $0x1e0] sm:$0xff] }
 0xa11   : > { %v3653_v53 = vadd.f32 %v3631_v55, %v3605_v57  ;;  %v3608_v4 = vmul.f32 %v8720_v61, %v3592_v11  ;;  %v4716_v35 = vld [vmem:[#allocation3 + $0x1c0] sm:$0xff] }
 0xa12   : > { %3661 = vst.msk [vmem:[#allocation3 + $0x188] sm:$0xff] %vm338_vm1, %v3645_v10 }
 0xa13   : > { %3669 = vst.msk [vmem:[#allocation3 + $0x1c8] sm:$0xff] %vm338_vm1, %v3653_v53  ;;  %v6181_v32 = vpop.eup %6180  ;;  %v3633_v45 = vpop.xlane.xlu1 %3632 }
 0xa14   : > { %v3643_v59 = vpop.xlane.xlu0 %3642  ;;  %v3654_v37 = vadd.f32 %v3633_v45, %v3606_v18  ;;  %4778 = vperm.xlu0 %5802, %v6181_v32   ;;  %v4713_v18 = vld [vmem:[#allocation3 + $0x1a8] sm:$0xff] }
 0xa15   : > { %v3659_v41 = vadd.f32 %v3643_v59, %v3611_v0  ;;  %v4719_v0 = vld [vmem:[#allocation3 + $0x1d8] sm:$0xff] }
 0xa16   : > { %3670 = vst.msk [vmem:[#allocation3 + $0x1d0] sm:$0xff] %vm338_vm1, %v3654_v37 }
 0xa17   : > { %3675 = vst.msk [vmem:[#allocation3 + $0x1f8] sm:$0xff] %vm338_vm1, %v3659_v41  ;;  %v3641_v57 = vpop.xlane.xlu1 %3640 }
 0xa18   : > { %v3639_v43 = vpop.xlane.xlu0 %3638  ;;  %v3658_v48 = vadd.f32 %v3641_v57, %v3610_v49 }
 0xa19   : > { %v3657_v22 = vadd.f32 %v3639_v43, %v3609_v63  ;;  %v4709_v55 = vld [vmem:[#allocation3 + $0x188] sm:$0xff] }
 0xa1a   : > { %6182 = vrcp.f32 %v4709_v55  ;;  %3674 = vst.msk [vmem:[#allocation3 + $0x1f0] sm:$0xff] %vm338_vm1, %v3658_v48  ;;  %v4717_v45 = vld [vmem:[#allocation3 + $0x1c8] sm:$0xff] }
 0xa1b   : > { %3673 = vst.msk [vmem:[#allocation3 + $0x1e8] sm:$0xff] %vm338_vm1, %v3657_v22  ;;  %v3637_v10 = vpop.xlane.xlu1 %3636  ;;  %6184 = vrcp.f32 %v4715_v54 }
 0xa1c   : > { %v3656_v53 = vadd.f32 %v3637_v10, %v3608_v4 }
 0xa1d   : > { %v4718_v2 = vld [vmem:[#allocation3 + $0x1d0] sm:$0xff] }
 0xa1e   : > { %6186 = vrcp.f32 %v4718_v2  ;;  %3672 = vst.msk [vmem:[#allocation3 + $0x1e0] sm:$0xff] %vm338_vm1, %v3656_v53 }
 0xa1f   : > { %6188 = vrcp.f32 %v4713_v18 }
 0xa20   : > { %6190 = vrcp.f32 %v4716_v35 }
 0xa21   : > { %6192 = vrcp.f32 %v4719_v0  ;;  %v4722_v2 = vld [vmem:[#allocation3 + $0x1f0] sm:$0xff] }
 0xa22   : > { %6194 = vrcp.f32 %v4717_v45  ;;  %v4721_v35 = vld [vmem:[#allocation3 + $0x1e8] sm:$0xff] }
 0xa25   : > { %v4720_v10 = vld [vmem:[#allocation3 + $0x1e0] sm:$0xff] }
 0xa26   : > { %6196 = vrcp.f32 %v4720_v10 }
 0xa27   : > { %v6183_v32 = vpop.eup %6182  ;;  %v5673_v59 = vpop.f32.mrf.mxu0  ;;  %6198 = vrcp.f32 %v4722_v2  ;;  %v3694_v2 = vld [vmem:[#allocation4 + $0x10] sm:$0xff] }
 0xa28   : > { %4763 = vperm.xlu1 %5803, %v6183_v32   ;;  %v6185_v23 = vpop.eup %6184  ;;  %6200 = vrcp.f32 %v4721_v35  ;;  %v4723_v32 = vld [vmem:[#allocation3 + $0x1f8] sm:$0xff] }
 0xa29   : > { %v3870_v51 = vpop.f32.mrf.mxu0  ;;  %6202 = vrcp.f32 %v4723_v32 }
 0xa2b   : > { %v6187_v61 = vpop.eup %6186  ;;  %v5674_v37 = vpop.f32.mrf.mxu0 }
 0xa2c   : > { %4808 = vperm.xlu0 %5802, %v6187_v61   ;;  %4793 = vperm.xlu1 %5803, %v6185_v23   ;;  %v6189_v49 = vpop.eup %6188 }
 0xa2d   : > { %v3873_v41 = vpop.f32.mrf.mxu0  ;;  %v6191_v63 = vpop.eup %6190 }
 0xa2e   : > { %v6193_v11 = vpop.eup %6192 }
 0xa2f   : > { %v5677_v57 = vpop.f32.mrf.mxu0  ;;  %v6195_v22 = vpop.eup %6194 }
 0xa30   : > { %4783 = vperm.xlu1 %5803, %v6189_v49   ;;  %4798 = vperm.xlu0 %5802, %v6191_v63   ;;  %v8955_v49 = vpop.permute.xlu0 %4603 }
 0xa31   : > { %v3886_v43 = vpop.f32.mrf.mxu0  ;;  %9425 = vst [vmem:[#allocation36_spill] sm:$0xff] %v8955_v49 }
 0xa33   : > { %v5678_v48 = vpop.f32.mrf.mxu0 }
 0xa34   : > { %3953 = vrot.lane.b32.xlu0 %v5673_v59, %s6423_s24  ;;  %4813 = vperm.xlu1 %5803, %v6193_v11   ;;  %v6197_v59 = vpop.eup %6196 }
 0xa35   : > { %v3889_v55 = vpop.f32.mrf.mxu0  ;;  %v6199_v23 = vpop.eup %6198 }
 0xa37   : > { %v5681_v54 = vpop.f32.mrf.mxu0 }
 0xa38   : > { %3949 = vrot.lane.b32.xlu0 %v3870_v51, %s6423_s24  ;;  %4803 = vperm.xlu1 %5803, %v6195_v22  }
 0xa39   : > { %v3902_v4 = vpop.f32.mrf.mxu0 }
 0xa3b   : > { %v5682_v53 = vpop.f32.mrf.mxu0 }
 0xa3c   : > { %3961 = vrot.lane.b32.xlu0 %v5677_v57, %s6423_s24  ;;  %3955 = vrot.lane.b32.xlu1 %v5674_v37, %s6423_s24  ;;  %v6201_v37 = vpop.eup %6200 }
 0xa3d   : > { %v3905_v18 = vpop.f32.mrf.mxu0 }
 0xa3f   : > { %v5685_v0 = vpop.f32.mrf.mxu0 }
 0xa40   : > { %3957 = vrot.lane.b32.xlu0 %v3886_v43, %s6423_s24  ;;  %3951 = vrot.lane.b32.xlu1 %v3873_v41, %s6423_s24  ;;  %v6203_v41 = vpop.eup %6202  ;;  %v8959_v43 = vpop.permute.xlu1 %4608 }
 0xa41   : > { %v3918_v45 = vpop.f32.mrf.mxu0  ;;  %9426 = vst [vmem:[#allocation35_spill] sm:$0xff] %v8959_v43 }
 0xa43   : > { %v5686_v51 = vpop.f32.mrf.mxu0 }
 0xa44   : > { %3969 = vrot.lane.b32.xlu0 %v5681_v54, %s6423_s24  ;;  %3963 = vrot.lane.b32.xlu1 %v5678_v48, %s6423_s24 }
 0xa45   : > { %v3921_v61 = vpop.f32.mrf.mxu0 }
 0xa48   : > { %3965 = vrot.lane.b32.xlu0 %v3902_v4, %s6423_s24  ;;  %3959 = vrot.lane.b32.xlu1 %v3889_v55, %s6423_s24 }
 0xa4c   : > { %3977 = vrot.lane.b32.xlu0 %v5685_v0, %s6423_s24  ;;  %3971 = vrot.lane.b32.xlu1 %v5682_v53, %s6423_s24 }
 0xa50   : > { %3973 = vrot.lane.b32.xlu0 %v3918_v45, %s6423_s24  ;;  %3967 = vrot.lane.b32.xlu1 %v3905_v18, %s6423_s24  ;;  %v3790_v18 = vmul.f32 %v8795_v27, %v3694_v2  ;;  %v3692_v45 = vld [vmem:[#allocation4] sm:$0xff] }
 0xa54   : > { %4818 = vperm.xlu0 %5802, %v6197_v59   ;;  %3979 = vrot.lane.b32.xlu1 %v5686_v51, %s6423_s24  ;;  %v3788_v59 = vmul.f32 %v8789_v16, %v3692_v45  ;;  %v3696_v45 = vld [vmem:[#allocation4 + $0x20] sm:$0xff] }
 0xa58   : > { %4828 = vperm.xlu0 %5802, %v6199_v23   ;;  %3975 = vrot.lane.b32.xlu1 %v3921_v61, %s6423_s24 }
 0xa5c   : > { %4823 = vperm.xlu1 %5803, %v6201_v37   ;;  %v3698_v37 = vld [vmem:[#allocation4 + $0x30] sm:$0xff] }
 0xa5d   : > { %v3794_v43 = vmul.f32 %v8755_v50, %v3698_v37 }
 0xa60   : > { %4833 = vperm.xlu1 %5803, %v6203_v41   ;;  %v3695_v41 = vld [vmem:[#allocation4 + $0x18] sm:$0xff] }
 0xa61   : > { %v3791_v27 = vmul.f32 %v8802_v24, %v3695_v41  ;;  %v3792_v24 = vmul.f32 %v8750_v29, %v3696_v45  ;;  %v3706_v29 = vld [vmem:[#allocation4 + $0x70] sm:$0xff] }
 0xa7f   : > { %v4769_v63 = vpop.permute.xlu0 %4768 }
 0xa83   : > { %v8957_v57 = vpop.permute.xlu0 %4758 }
 0xa87   : > { %v8963_v48 = vpop.permute.xlu1 %4773 }
 0xa8b   : > { %v8961_v11 = vpop.permute.xlu0 %4788 }
 0xa8f   : > { %v8965_v22 = vpop.permute.xlu0 %4778 }
 0xaa3   : > { %v8967_v55 = vpop.permute.xlu1 %4763 }
 0xaa7   : > { %v8969_v54 = vpop.permute.xlu1 %4793  ;;  %v8971_v4 = vpop.permute.xlu0 %4808 }
 0xaab   : > { %v8973_v10 = vpop.permute.xlu1 %4783  ;;  %v8975_v53 = vpop.permute.xlu0 %4798 }
 0xaaf   : > { %v8978_v35 = vpop.permute.xlu1 %4813  ;;  %v3954_v0 = vpop.permute.xlu0 %3953 }
 0xab0   : > { %9427 = vst [vmem:[#allocation43_spill] sm:$0xff] %v8978_v35  ;;  %v3999_v32 = vadd.f32 %v3954_v0, %v3790_v18  ;;  %v3693_v35 = vld [vmem:[#allocation4 + $0x8] sm:$0xff] }
 0xab2   : > { %4016 = vst.msk [vmem:[#allocation4 + $0x10] sm:$0xff] %vm4013_vm4, %v3999_v32  ;;  %v3789_v32 = vmul.f32 %v8731_v5, %v3693_v35 }
 0xab3   : > { %v8982_v51 = vpop.permute.xlu1 %4803  ;;  %v3950_v23 = vpop.permute.xlu0 %3949 }
 0xab4   : > { %9428 = vst [vmem:[#allocation44_spill] sm:$0xff] %v8982_v51  ;;  %v3997_v61 = vadd.f32 %v3950_v23, %v3788_v59  ;;  %v3702_v51 = vld [vmem:[#allocation4 + $0x50] sm:$0xff] }
 0xab6   : > { %4014 = vst.msk [vmem:[#allocation4] sm:$0xff] %vm4013_vm4, %v3997_v61 }
 0xab7   : > { %v3956_v2 = vpop.permute.xlu1 %3955  ;;  %v3962_v49 = vpop.permute.xlu0 %3961 }
 0xab8   : > { %v4000_v18 = vadd.f32 %v3956_v2, %v3791_v27  ;;  %v4003_v0 = vadd.f32 %v3962_v49, %v3794_v43  ;;  %v3798_v49 = vmul.f32 %v8879_v52, %v3702_v51  ;;  %v3700_v43 = vld [vmem:[#allocation4 + $0x40] sm:$0xff]  ;;  %v3699_v2 = vld [vmem:[#allocation4 + $0x38] sm:$0xff] }
 0xab9   : > { %v4067_v16 = vld [vmem:[#allocation4 + $0x10] sm:$0xff] }
 0xaba   : > { %v4163_v59 = vmul.f32 %v8773_v46, %v4067_v16  ;;  %v4388_v23 = vmul.f32 %v8822_v44, %v4067_v16  ;;  %v4613_v50 = vmul.f32 %v8855_v28, %v4067_v16  ;;  %4017 = vst.msk [vmem:[#allocation4 + $0x18] sm:$0xff] %vm4013_vm4, %v4000_v18  ;;  %4020 = vst.msk [vmem:[#allocation4 + $0x30] sm:$0xff] %vm4013_vm4, %v4003_v0  ;;  %v3704_v0 = vld [vmem:[#allocation4 + $0x60] sm:$0xff] }
 0xabb   : > { %v4838_v5 = vmul.f32 %v4769_v63, %v4067_v16  ;;  %v3952_v35 = vpop.permute.xlu1 %3951  ;;  %v3958_v61 = vpop.permute.xlu0 %3957  ;;  %v8996_v46 = vmul.f32 %v8883_v62, %v3700_v43  ;;  %v9007_v18 = vmul.f32 %v8887_v6, %v3706_v29  ;;  %v3795_v16 = vmul.f32 %v8896_v17, %v3699_v2  ;;  %v3703_v17 = vld [vmem:[#allocation4 + $0x58] sm:$0xff] }
 0xabc   : > { %v5240_v44 = vpack.c.bf16 %v4163_v59, %v4163_v59  ;;  %v5256_v28 = vpack.c.bf16 %v4388_v23, %v4388_v23  ;;  %v3998_v41 = vadd.f32 %v3952_v35, %v3789_v32  ;;  %v4001_v27 = vadd.f32 %v3958_v61, %v3792_v24  ;;  %v3697_v32 = vld [vmem:[#allocation4 + $0x28] sm:$0xff] }
 0xabd   : > { %v4065_v37 = vld [vmem:[#allocation4] sm:$0xff]  ;;  %v5272_v52 = vpack.c.bf16 %v4613_v50, %v4613_v50  ;;  %v5288_v45 = vpack.c.bf16 %v4838_v5, %v4838_v5  ;;  %v3793_v6 = vmul.f32 %v8902_v12, %v3697_v32 }
 0xabe   : > { %4244 = vst.msk [vmem:[%s8999_s23 + $0x8] sm:$0xf] %vm4241_vm5, %v5240_v44  ;;  %v4161_v62 = vmul.f32 %v8768_v39, %v4065_v37  ;;  %v4386_v63 = vmul.f32 %v8818_v31, %v4065_v37  ;;  %v4611_v51 = vmul.f32 %v8851_v7, %v4065_v37  ;;  %v4836_v59 = vmul.f32 %v8957_v57, %v4065_v37 }
 0xabf   : > { %4469 = vst.msk [vmem:[%s8999_s23 + $0x8] sm:$0xf] %vm4466_vm6, %v5256_v28  ;;  %v3964_v39 = vpop.permute.xlu1 %3963  ;;  %v3970_v31 = vpop.permute.xlu0 %3969  ;;  %v9016_v7 = vmul.f32 %v8891_v20, %v3704_v0  ;;  %v9022_v57 = vmul.f32 %v8906_v19, %v3703_v17  ;;  %v3701_v19 = vld [vmem:[#allocation4 + $0x48] sm:$0xff] }
 0xac0   : > { %4015 = vst.msk [vmem:[#allocation4 + $0x8] sm:$0xff] %vm4013_vm4, %v3998_v41  ;;  %4018 = vst.msk [vmem:[#allocation4 + $0x20] sm:$0xff] %vm4013_vm4, %v4001_v27  ;;  %v5238_v23 = vpack.c.bf16 %v4161_v62, %v4161_v62  ;;  %v5254_v50 = vpack.c.bf16 %v4386_v63, %v4386_v63  ;;  %v5270_v24 = vpack.c.bf16 %v4611_v51, %v4611_v51 }
 0xac1   : > { %4694 = vst.msk [vmem:[%s8999_s23 + $0x8] sm:$0xf] %vm4691_vm7, %v5272_v52  ;;  %v4068_v43 = vld [vmem:[#allocation4 + $0x18] sm:$0xff]  ;;  %v4071_v5 = vld [vmem:[#allocation4 + $0x30] sm:$0xff]  ;;  %v4004_v35 = vadd.f32 %v3964_v39, %v3795_v16  ;;  %v4007_v61 = vadd.f32 %v3970_v31, %v3798_v49  ;;  %v5286_v37 = vpack.c.bf16 %v4836_v59, %v4836_v59 }
 0xac2   : > { %4919 = vst.msk [vmem:[%s8999_s23 + $0x8] sm:$0xf] %vm4916_vm8, %v5288_v45  ;;  %v4164_v12 = vmul.f32 %v8810_v14, %v4068_v43  ;;  %v4389_v20 = vmul.f32 %v8841_v8, %v4068_v43  ;;  %v4614_v44 = vmul.f32 %v8873_v13, %v4068_v43  ;;  %v4839_v28 = vmul.f32 %v8963_v48, %v4068_v43  ;;  %v3707_v48 = vld [vmem:[#allocation4 + $0x78] sm:$0xff] }
 0xac3   : > { %4242 = vst.msk [vmem:[%s8999_s23] sm:$0xf] %vm4241_vm5, %v5238_v23  ;;  %v4167_v41 = vmul.f32 %v8792_v1, %v4071_v5  ;;  %v4392_v49 = vmul.f32 %v8831_v30, %v4071_v5  ;;  %v4617_v27 = vmul.f32 %v8863_v15, %v4071_v5  ;;  %v3960_v14 = vpop.permute.xlu1 %3959  ;;  %v3966_v8 = vpop.permute.xlu0 %3965  ;;  %v9040_v13 = vmul.f32 %v8912_v42, %v3701_v19 }
 0xac4   : > { %4467 = vst.msk [vmem:[%s8999_s23] sm:$0xf] %vm4466_vm6, %v5254_v50  ;;  %v5241_v29 = vpack.c.bf16 %v4164_v12, %v4164_v12  ;;  %v5257_v1 = vpack.c.bf16 %v4389_v20, %v4389_v20  ;;  %v4842_v30 = vmul.f32 %v8961_v11, %v4071_v5  ;;  %v9046_v15 = vmul.f32 %v8916_v9, %v3707_v48 }
 0xac5   : > { %4021 = vst.msk [vmem:[#allocation4 + $0x38] sm:$0xff] %vm4013_vm4, %v4004_v35  ;;  %4024 = vst.msk [vmem:[#allocation4 + $0x50] sm:$0xff] %vm4013_vm4, %v4007_v61  ;;  %v5273_v2 = vpack.c.bf16 %v4614_v44, %v4614_v44  ;;  %v5244_v52 = vpack.c.bf16 %v4167_v41, %v4167_v41  ;;  %v5260_v62 = vpack.c.bf16 %v4392_v49, %v4392_v49 }
 0xac6   : > { %4692 = vst.msk [vmem:[%s8999_s23] sm:$0xf] %vm4691_vm7, %v5270_v24  ;;  %v5289_v42 = vpack.c.bf16 %v4839_v28, %v4839_v28  ;;  %v5276_v63 = vpack.c.bf16 %v4617_v27, %v4617_v27  ;;  %v4002_v16 = vadd.f32 %v3960_v14, %v3793_v6  ;;  %v4005_v32 = vadd.f32 %v3966_v8, %v8996_v46 }
 0xac7   : > { %4917 = vst.msk [vmem:[%s8999_s23] sm:$0xf] %vm4916_vm8, %v5286_v37  ;;  %v4066_v51 = vld [vmem:[#allocation4 + $0x8] sm:$0xff]  ;;  %v4069_v0 = vld [vmem:[#allocation4 + $0x20] sm:$0xff]  ;;  %v3972_v39 = vpop.permute.xlu1 %3971  ;;  %v3978_v31 = vpop.permute.xlu0 %3977  ;;  %v5292_v46 = vpack.c.bf16 %v4842_v30, %v4842_v30  ;;  %v9429_v30 = vld [vmem:[#allocation38_spill] sm:$0xff] }
 0xac8   : > { %4245 = vst.msk [vmem:[%s8999_s23 + $0xc] sm:$0xf] %vm4241_vm5, %v5241_v29  ;;  %4248 = vst.msk [vmem:[%s8999_s23 + $0x18] sm:$0xf] %vm4241_vm5, %v5244_v52  ;;  %v4162_v9 = vmul.f32 %v8806_v33, %v4066_v51  ;;  %v4387_v11 = vmul.f32 %v8837_v3, %v4066_v51  ;;  %v4612_v45 = vmul.f32 %v8869_v25, %v4066_v51  ;;  %v9430_v52 = vld [vmem:[#allocation23_spill] sm:$0xff] }
 0xac9   : > { %4470 = vst.msk [vmem:[%s8999_s23 + $0xc] sm:$0xf] %vm4466_vm6, %v5257_v1  ;;  %v4837_v59 = vmul.f32 %v8967_v55, %v4066_v51  ;;  %4473 = vst.msk [vmem:[%s8999_s23 + $0x18] sm:$0xf] %vm4466_vm6, %v5260_v62  ;;  %v4165_v6 = vmul.f32 %v8783_v58, %v4069_v0  ;;  %v4390_v17 = vmul.f32 %v8827_v38, %v4069_v0  ;;  %v9433_v51 = vld [vmem:[#allocation39_spill] sm:$0xff] }
 0xaca   : > { %4695 = vst.msk [vmem:[%s8999_s23 + $0xc] sm:$0xf] %vm4691_vm7, %v5273_v2  ;;  %v4615_v33 = vmul.f32 %v8859_v36, %v4069_v0  ;;  %4698 = vst.msk [vmem:[%s8999_s23 + $0x18] sm:$0xf] %vm4691_vm7, %v5276_v63  ;;  %v5239_v3 = vpack.c.bf16 %v4162_v9, %v4162_v9  ;;  %v5255_v25 = vpack.c.bf16 %v4387_v11, %v4387_v11  ;;  %v3705_v63 = vld [vmem:[#allocation4 + $0x68] sm:$0xff] }
 0xacb   : > { %4019 = vst.msk [vmem:[#allocation4 + $0x28] sm:$0xff] %vm4013_vm4, %v4002_v16  ;;  %4022 = vst.msk [vmem:[#allocation4 + $0x40] sm:$0xff] %vm4013_vm4, %v4005_v32  ;;  %v5271_v55 = vpack.c.bf16 %v4612_v45, %v4612_v45  ;;  %v4840_v58 = vmul.f32 %v8965_v22, %v4069_v0  ;;  %v5287_v38 = vpack.c.bf16 %v4837_v59, %v4837_v59  ;;  %v3968_v12 = vpop.permute.xlu1 %3967  ;;  %v9434_v16 = vld [vmem:[#allocation29_spill] sm:$0xff] }
 0xacc   : > { %4920 = vst.msk [vmem:[%s8999_s23 + $0xc] sm:$0xf] %vm4916_vm8, %v5289_v42  ;;  %4923 = vst.msk [vmem:[%s8999_s23 + $0x18] sm:$0xf] %vm4916_vm8, %v5292_v46  ;;  %v5242_v36 = vpack.c.bf16 %v4165_v6, %v4165_v6  ;;  %v5258_v23 = vpack.c.bf16 %v4390_v17, %v4390_v17  ;;  %v5274_v50 = vpack.c.bf16 %v4615_v33, %v4615_v33  ;;  %v4072_v24 = vld [vmem:[#allocation4 + $0x38] sm:$0xff]  ;;  %v4075_v43 = vld [vmem:[#allocation4 + $0x50] sm:$0xff] }
 0xacd   : > { %4243 = vst.msk [vmem:[%s8999_s23 + $0x4] sm:$0xf] %vm4241_vm5, %v5239_v3  ;;  %v4168_v5 = vmul.f32 %v8816_v56, %v4072_v24  ;;  %v4393_v35 = vmul.f32 %v8849_v47, %v4072_v24  ;;  %v4618_v61 = vmul.f32 %v8881_v40, %v4072_v24  ;;  %v4843_v22 = vmul.f32 %v8969_v54, %v4072_v24  ;;  %v3974_v40 = vpop.permute.xlu0 %3973  ;;  %v9431_v42 = vld [vmem:[#allocation33_spill] sm:$0xff]  ;;  %v9438_v24 = vld [vmem:[#allocation43_spill] sm:$0xff] }
 0xace   : > { %4468 = vst.msk [vmem:[%s8999_s23 + $0x4] sm:$0xf] %vm4466_vm6, %v5255_v25  ;;  %v4171_v20 = vmul.f32 %v8804_v26, %v4075_v43  ;;  %v4396_v44 = vmul.f32 %v8839_v34, %v4075_v43  ;;  %v4621_v56 = vmul.f32 %v8871_v60, %v4075_v43  ;;  %v4846_v47 = vmul.f32 %v8971_v4, %v4075_v43 }
 0xacf   : > { %4246 = vst.msk [vmem:[%s8999_s23 + $0x10] sm:$0xf] %vm4241_vm5, %v5242_v36  ;;  %v5290_v54 = vpack.c.bf16 %v4840_v58, %v4840_v58  ;;  %v5245_v28 = vpack.c.bf16 %v4168_v5, %v4168_v5  ;;  %v5261_v19 = vpack.c.bf16 %v4393_v35, %v4393_v35  ;;  %v5277_v37 = vpack.c.bf16 %v4618_v61, %v4618_v61  ;;  %v3980_v29 = vpop.permute.xlu1 %3979  ;;  %v9439_v35 = vld [vmem:[#allocation37_spill] sm:$0xff] }
 0xad0   : > { %4693 = vst.msk [vmem:[%s8999_s23 + $0x4] sm:$0xf] %vm4691_vm7, %v5271_v55  ;;  %v5293_v26 = vpack.c.bf16 %v4843_v22, %v4843_v22  ;;  %v5248_v34 = vpack.c.bf16 %v4171_v20, %v4171_v20  ;;  %v5264_v60 = vpack.c.bf16 %v4396_v44, %v4396_v44  ;;  %v5280_v41 = vpack.c.bf16 %v4621_v56, %v4621_v56  ;;  %v9435_v55 = vld [vmem:[#allocation41_spill] sm:$0xff]  ;;  %v9441_v20 = vld [vmem:[#allocation27_spill] sm:$0xff]  ;;  %v9442_v56 = vld [vmem:[#allocation44_spill] sm:$0xff] }
 0xad1   : > { %4471 = vst.msk [vmem:[%s8999_s23 + $0x10] sm:$0xf] %vm4466_vm6, %v5258_v23  ;;  %v4008_v27 = vadd.f32 %v3972_v39, %v9022_v57  ;;  %v4011_v14 = vadd.f32 %v3978_v31, %v9007_v18  ;;  %v4006_v8 = vadd.f32 %v3968_v12, %v9040_v13  ;;  %v4009_v48 = vadd.f32 %v3974_v40, %v9016_v7  ;;  %v9432_v7 = vld [vmem:[#allocation22_spill] sm:$0xff]  ;;  %v4819_v33 = vpop.permute.xlu0 %4818  ;;  %v9437_v23 = vld [vmem:[#allocation32_spill] sm:$0xff]  ;;  %v9440_v22 = vld [vmem:[#allocation25_spill] sm:$0xff] }
 0xad2   : > { %4918 = vst.msk [vmem:[%s8999_s23 + $0x4] sm:$0xf] %vm4916_vm8, %v5287_v38  ;;  %v4070_v4 = vld [vmem:[#allocation4 + $0x28] sm:$0xff]  ;;  %v4073_v49 = vld [vmem:[#allocation4 + $0x40] sm:$0xff]  ;;  %v5296_v1 = vpack.c.bf16 %v4846_v47, %v4846_v47  ;;  %v3801_v9 = vmul.f32 %v8922_v21, %v3705_v63  ;;  %v4012_v46 = vadd.f32 %v3980_v29, %v9046_v15  ;;  %v9445_v29 = vld [vmem:[#allocation34_spill] sm:$0xff] }
 0xad3   : > { %4696 = vst.msk [vmem:[%s8999_s23 + $0x10] sm:$0xf] %vm4691_vm7, %v5274_v50  ;;  %v4166_v2 = vmul.f32 %v9429_v30, %v4070_v4  ;;  %v4391_v62 = vmul.f32 %v9430_v52, %v4070_v4  ;;  %v4616_v57 = vmul.f32 %v9431_v42, %v4070_v4  ;;  %v4841_v18 = vmul.f32 %v8973_v10, %v4070_v4  ;;  %v3976_v31 = vpop.permute.xlu1 %3975  ;;  %v9436_v38 = vld [vmem:[#allocation24_spill] sm:$0xff] }
 0xad4   : > { %4921 = vst.msk [vmem:[%s8999_s23 + $0x10] sm:$0xf] %vm4916_vm8, %v5290_v54  ;;  %v4169_v13 = vmul.f32 %v9432_v7, %v4073_v49  ;;  %v4394_v0 = vmul.f32 %v9433_v51, %v4073_v49  ;;  %v4619_v32 = vmul.f32 %v9434_v16, %v4073_v49  ;;  %v4844_v45 = vmul.f32 %v8975_v53, %v4073_v49 }
 0xad5   : > { %4249 = vst.msk [vmem:[%s8999_s23 + $0x1c] sm:$0xf] %vm4241_vm5, %v5245_v28  ;;  %4252 = vst.msk [vmem:[%s8999_s23 + $0x28] sm:$0xf] %vm4241_vm5, %v5248_v34  ;;  %v5243_v10 = vpack.c.bf16 %v4166_v2, %v4166_v2  ;;  %v5259_v11 = vpack.c.bf16 %v4391_v62, %v4391_v62  ;;  %v5275_v21 = vpack.c.bf16 %v4616_v57, %v4616_v57  ;;  %v4829_v34 = vpop.permute.xlu0 %4828  ;;  %v9446_v2 = vld [vmem:[#allocation20_spill] sm:$0xff]  ;;  %v9447_v62 = vld [vmem:[#allocation26_spill] sm:$0xff] }
 0xad6   : > { %4474 = vst.msk [vmem:[%s8999_s23 + $0x1c] sm:$0xf] %vm4466_vm6, %v5261_v19  ;;  %4477 = vst.msk [vmem:[%s8999_s23 + $0x28] sm:$0xf] %vm4466_vm6, %v5264_v60  ;;  %v5246_v59 = vpack.c.bf16 %v4169_v13, %v4169_v13  ;;  %v5262_v39 = vpack.c.bf16 %v4394_v0, %v4394_v0  ;;  %v4010_v6 = vadd.f32 %v3976_v31, %v3801_v9  ;;  %v9448_v57 = vld [vmem:[#allocation36_spill] sm:$0xff] }
 0xad7   : > { %4699 = vst.msk [vmem:[%s8999_s23 + $0x1c] sm:$0xf] %vm4691_vm7, %v5277_v37  ;;  %4702 = vst.msk [vmem:[%s8999_s23 + $0x28] sm:$0xf] %vm4691_vm7, %v5280_v41  ;;  %v5291_v17 = vpack.c.bf16 %v4841_v18, %v4841_v18  ;;  %v5278_v53 = vpack.c.bf16 %v4619_v32, %v4619_v32  ;;  %v5294_v3 = vpack.c.bf16 %v4844_v45, %v4844_v45  ;;  %v4824_v5 = vpop.permute.xlu1 %4823 }
 0xad8   : > { %4025 = vst.msk [vmem:[#allocation4 + $0x58] sm:$0xff] %vm4013_vm4, %v4008_v27  ;;  %4028 = vst.msk [vmem:[#allocation4 + $0x70] sm:$0xff] %vm4013_vm4, %v4011_v14  ;;  %v9443_v27 = vld [vmem:[#allocation19_spill] sm:$0xff] }
 0xad9   : > { %4023 = vst.msk [vmem:[#allocation4 + $0x48] sm:$0xff] %vm4013_vm4, %v4006_v8  ;;  %4026 = vst.msk [vmem:[#allocation4 + $0x60] sm:$0xff] %vm4013_vm4, %v4009_v48  ;;  %v9444_v8 = vld [vmem:[#allocation40_spill] sm:$0xff] }
 0xada   : > { %4924 = vst.msk [vmem:[%s8999_s23 + $0x1c] sm:$0xf] %vm4916_vm8, %v5293_v26  ;;  %4927 = vst.msk [vmem:[%s8999_s23 + $0x28] sm:$0xf] %vm4916_vm8, %v5296_v1 }
 0xadb   : > { %4247 = vst.msk [vmem:[%s8999_s23 + $0x14] sm:$0xf] %vm4241_vm5, %v5243_v10  ;;  %4250 = vst.msk [vmem:[%s8999_s23 + $0x20] sm:$0xf] %vm4241_vm5, %v5246_v59  ;;  %v4834_v9 = vpop.permute.xlu1 %4833 }
 0xadc   : > { %4472 = vst.msk [vmem:[%s8999_s23 + $0x14] sm:$0xf] %vm4466_vm6, %v5259_v11  ;;  %4475 = vst.msk [vmem:[%s8999_s23 + $0x20] sm:$0xf] %vm4466_vm6, %v5262_v39  ;;  %v9449_v39 = vld [vmem:[#allocation21_spill] sm:$0xff] }
 0xadd   : > { %4697 = vst.msk [vmem:[%s8999_s23 + $0x14] sm:$0xf] %vm4691_vm7, %v5275_v21  ;;  %4700 = vst.msk [vmem:[%s8999_s23 + $0x20] sm:$0xf] %vm4691_vm7, %v5278_v53  ;;  %v9450_v21 = vld [vmem:[#allocation30_spill] sm:$0xff] }
 0xade   : > { %4029 = vst.msk [vmem:[#allocation4 + $0x78] sm:$0xff] %vm4013_vm4, %v4012_v46  ;;  %4027 = vst.msk [vmem:[#allocation4 + $0x68] sm:$0xff] %vm4013_vm4, %v4010_v6  ;;  %v9451_v6 = vld [vmem:[#allocation31_spill] sm:$0xff] }
 0xadf   : > { %4922 = vst.msk [vmem:[%s8999_s23 + $0x14] sm:$0xf] %vm4916_vm8, %v5291_v17  ;;  %4925 = vst.msk [vmem:[%s8999_s23 + $0x20] sm:$0xf] %vm4916_vm8, %v5294_v3  ;;  %v4076_v15 = vld [vmem:[#allocation4 + $0x58] sm:$0xff]  ;;  %v4079_v26 = vld [vmem:[#allocation4 + $0x70] sm:$0xff] }
 0xae0   : > { %v4074_v25 = vld [vmem:[#allocation4 + $0x48] sm:$0xff]  ;;  %v4172_v58 = vmul.f32 %v9435_v55, %v4076_v15  ;;  %v4397_v36 = vmul.f32 %v9436_v38, %v4076_v15  ;;  %v4622_v50 = vmul.f32 %v9437_v23, %v4076_v15  ;;  %v4847_v43 = vmul.f32 %v9438_v24, %v4076_v15  ;;  %v4077_v40 = vld [vmem:[#allocation4 + $0x60] sm:$0xff] }
 0xae1   : > { %v4170_v61 = vmul.f32 %v9439_v35, %v4074_v25  ;;  %v4395_v12 = vmul.f32 %v9440_v22, %v4074_v25  ;;  %v4620_v44 = vmul.f32 %v9441_v20, %v4074_v25  ;;  %v4845_v47 = vmul.f32 %v9442_v56, %v4074_v25  ;;  %v9453_v15 = vld [vmem:[#allocation28_spill] sm:$0xff]  ;;  %v9454_v55 = vld [vmem:[#allocation35_spill] sm:$0xff] }
 0xae2   : > { %v5249_v54 = vpack.c.bf16 %v4172_v58, %v4172_v58  ;;  %v5265_v28 = vpack.c.bf16 %v4397_v36, %v4397_v36  ;;  %v5281_v19 = vpack.c.bf16 %v4622_v50, %v4622_v50  ;;  %v5297_v37 = vpack.c.bf16 %v4847_v43, %v4847_v43 }
 0xae3   : > { %v5247_v60 = vpack.c.bf16 %v4170_v61, %v4170_v61  ;;  %v5263_v41 = vpack.c.bf16 %v4395_v12, %v4395_v12  ;;  %v5279_v4 = vpack.c.bf16 %v4620_v44, %v4620_v44  ;;  %v5295_v49 = vpack.c.bf16 %v4845_v47, %v4845_v47 }
 0xae4   : > { %4253 = vst.msk [vmem:[%s8999_s23 + $0x2c] sm:$0xf] %vm4241_vm5, %v5249_v54  ;;  %v4173_v14 = vmul.f32 %v9443_v27, %v4077_v40  ;;  %v4398_v48 = vmul.f32 %v9444_v8, %v4077_v40  ;;  %v4623_v1 = vmul.f32 %v9445_v29, %v4077_v40  ;;  %v4848_v30 = vmul.f32 %v4819_v33, %v4077_v40  ;;  %v9452_v33 = vld [vmem:[#allocation42_spill] sm:$0xff] }
 0xae5   : > { %4478 = vst.msk [vmem:[%s8999_s23 + $0x2c] sm:$0xf] %vm4466_vm6, %v5265_v28  ;;  %v4175_v52 = vmul.f32 %v9446_v2, %v4079_v26  ;;  %v4400_v42 = vmul.f32 %v9447_v62, %v4079_v26  ;;  %v4625_v63 = vmul.f32 %v9448_v57, %v4079_v26  ;;  %v4850_v18 = vmul.f32 %v4829_v34, %v4079_v26  ;;  %v4078_v7 = vld [vmem:[#allocation4 + $0x68] sm:$0xff]  ;;  %v4080_v32 = vld [vmem:[#allocation4 + $0x78] sm:$0xff] }
 0xae6   : > { %4251 = vst.msk [vmem:[%s8999_s23 + $0x24] sm:$0xf] %vm4241_vm5, %v5247_v60  ;;  %v5250_v13 = vpack.c.bf16 %v4173_v14, %v4173_v14  ;;  %v5266_v51 = vpack.c.bf16 %v4398_v48, %v4398_v48  ;;  %v5282_v0 = vpack.c.bf16 %v4623_v1, %v4623_v1  ;;  %v5298_v16 = vpack.c.bf16 %v4848_v30, %v4848_v30 }
 0xae7   : > { %4703 = vst.msk [vmem:[%s8999_s23 + $0x2c] sm:$0xf] %vm4691_vm7, %v5281_v19  ;;  %v5252_v10 = vpack.c.bf16 %v4175_v52, %v4175_v52  ;;  %v5268_v11 = vpack.c.bf16 %v4400_v42, %v4400_v42  ;;  %v5284_v45 = vpack.c.bf16 %v4625_v63, %v4625_v63  ;;  %v5300_v59 = vpack.c.bf16 %v4850_v18, %v4850_v18 }
 0xae8   : > { %4476 = vst.msk [vmem:[%s8999_s23 + $0x24] sm:$0xf] %vm4466_vm6, %v5263_v41  ;;  %v4174_v31 = vmul.f32 %v9449_v39, %v4078_v7  ;;  %v4399_v46 = vmul.f32 %v9450_v21, %v4078_v7  ;;  %v4624_v17 = vmul.f32 %v9451_v6, %v4078_v7  ;;  %v4849_v53 = vmul.f32 %v4824_v5, %v4078_v7 }
 0xae9   : > { %4928 = vst.msk [vmem:[%s8999_s23 + $0x2c] sm:$0xf] %vm4916_vm8, %v5297_v37  ;;  %v4176_v3 = vmul.f32 %v9452_v33, %v4080_v32  ;;  %v4401_v25 = vmul.f32 %v9453_v15, %v4080_v32  ;;  %v4626_v58 = vmul.f32 %v9454_v55, %v4080_v32  ;;  %v4851_v38 = vmul.f32 %v4834_v9, %v4080_v32 }
 0xaea   : > { %4701 = vst.msk [vmem:[%s8999_s23 + $0x24] sm:$0xf] %vm4691_vm7, %v5279_v4  ;;  %v5251_v36 = vpack.c.bf16 %v4174_v31, %v4174_v31  ;;  %v5267_v23 = vpack.c.bf16 %v4399_v46, %v4399_v46  ;;  %v5283_v43 = vpack.c.bf16 %v4624_v17, %v4624_v17  ;;  %v5299_v35 = vpack.c.bf16 %v4849_v53, %v4849_v53 }
 0xaeb   : > { %4926 = vst.msk [vmem:[%s8999_s23 + $0x24] sm:$0xf] %vm4916_vm8, %v5295_v49  ;;  %v5253_v50 = vpack.c.bf16 %v4176_v3, %v4176_v3  ;;  %v5269_v24 = vpack.c.bf16 %v4401_v25, %v4401_v25  ;;  %v5301_v5 = vpack.c.bf16 %v4851_v38, %v4851_v38  ;;  %v5285_v61 = vpack.c.bf16 %v4626_v58, %v4626_v58 }
 0xaec   : > { %4254 = vst.msk [vmem:[%s8999_s23 + $0x30] sm:$0xf] %vm4241_vm5, %v5250_v13  ;;  %4256 = vst.msk [vmem:[%s8999_s23 + $0x38] sm:$0xf] %vm4241_vm5, %v5252_v10 }
 0xaed   : > { %4479 = vst.msk [vmem:[%s8999_s23 + $0x30] sm:$0xf] %vm4466_vm6, %v5266_v51  ;;  %4481 = vst.msk [vmem:[%s8999_s23 + $0x38] sm:$0xf] %vm4466_vm6, %v5268_v11 }
 0xaee   : > { %4704 = vst.msk [vmem:[%s8999_s23 + $0x30] sm:$0xf] %vm4691_vm7, %v5282_v0  ;;  %4706 = vst.msk [vmem:[%s8999_s23 + $0x38] sm:$0xf] %vm4691_vm7, %v5284_v45 }
 0xaef   : > { %4929 = vst.msk [vmem:[%s8999_s23 + $0x30] sm:$0xf] %vm4916_vm8, %v5298_v16  ;;  %4931 = vst.msk [vmem:[%s8999_s23 + $0x38] sm:$0xf] %vm4916_vm8, %v5300_v59 }
 0xaf0   : > { %4255 = vst.msk [vmem:[%s8999_s23 + $0x34] sm:$0xf] %vm4241_vm5, %v5251_v36  ;;  %4257 = vst.msk [vmem:[%s8999_s23 + $0x3c] sm:$0xf] %vm4241_vm5, %v5253_v50 }
 0xaf1   : > { %4480 = vst.msk [vmem:[%s8999_s23 + $0x34] sm:$0xf] %vm4466_vm6, %v5267_v23  ;;  %4482 = vst.msk [vmem:[%s8999_s23 + $0x3c] sm:$0xf] %vm4466_vm6, %v5269_v24 }
 0xaf2   : > { %4705 = vst.msk [vmem:[%s8999_s23 + $0x34] sm:$0xf] %vm4691_vm7, %v5283_v43  ;;  %4707 = vst.msk [vmem:[%s8999_s23 + $0x3c] sm:$0xf] %vm4691_vm7, %v5285_v61 }
 0xaf3   : > { %4930 = vst.msk [vmem:[%s8999_s23 + $0x34] sm:$0xf] %vm4916_vm8, %v5299_v35  ;;  %4932 = vst.msk [vmem:[%s8999_s23 + $0x3c] sm:$0xf] %vm4916_vm8, %v5301_v5 }
 0xaf4   : > { %6341 = shalt.err (!%p6338_p7)
}
 0xaf5   : > { %s6342_s10 = scalar_lea.hbm %s9216_s20, 1024  ;;  %s6346_s21 = scalar_lea.hbm %s9281_s3, 2048 }
 0xaf6   : > { %p6343_p6 = scmp.ne.s32.totalorder %s9216_s20, %s6342_s10  ;;  %p6347_p2 = scmp.lt.s32.totalorder %s9216_s20, %s9281_s3 }
 0xaf7   : > { %p6348_p8 = scmp.lt.s32.totalorder %s6346_s21, %s6342_s10 }
 0xaf8   : > { %p6344_p10 = pnand %p6343_p6, %p6503_p9 }
 0xaf9   : > { %p6349_p0 = por %p6348_p8, %p6347_p2 }
 0xafa   : > { %p6345_p13 = pneg %p6344_p10 }
 0xafc   : > { %p6350_p1 = pnand %p6349_p0, %p6345_p13 }
 0xafe   : > { %6353 = shalt.err (!%p6350_p1)
}
 0xaff   : > { %s6427_s5 = smov 4  }
 0xb00   : > { %5726 = dma.vmem_to_hbm [thread:$0]  (%p6503_p9), %s9222_s8, 1024, %s9216_s20, %s4934_s26, %s6424_s7, %s6424_s7, %s6427_s5  }
 0xb01 PF: > { %s4965_s24 = sand.u32 1, %s6392_s12   ;;  %p5739_p3 = pnand %p5101_p12, %p6510_p11 }
 0xb02   : > { %s4966_s28 = scalar_lea.sflag [#allocation7], %s4965_s24 }
 0xb03   : > { %p5740_p4 = pneg %p5739_p3 }
 0xb05   : > { %6387 = dma.done.wait (%p5740_p4), %s4966_s28, 1024  }
 0xb06   : > { %6389 = vsyncadd (%p5740_p4), %s4966_s28, 4294966272  ;;  %s22_s17 = sadd.s32 1, %s6412_s17   ;;  %s9456_s25 = sld [smem:[#allocation17_spill]] }
 0xb07   : > { %p19_p5 = scmp.ge.s32.totalorder %s22_s17, 4   ;;  %s9457_s15 = sld [smem:[#allocation15_spill]] }
 0xb08   : > { %s9458_s16 = sld [smem:[#allocation16_spill]]  ;;  %s9459_s12 = smov %s6396_s13 }
 0xb09   : > { %s9460_s13 = smov %s6400_s14  ;;  %21 = sbr.rel (!%p19_p5) target bundleno = 10 (0xa), region = 115 }
 0xb0c   : > { %s9461_s14 = smov %s9456_s25 }
 0xb0e   :  { %4971 = vsyncpa [#allocation6], 1 }
 0xb0f   :  { %4973 = vsyncpa [#allocation6 + $0x1], 1 }
 0xb10   :  { %4974 = vsyncpa [#allocation9], 1 }
 0xb11   :  { %4976 = vsyncpa [#allocation9 + $0x1], 1 }
 0xb12   :  { %4977 = vsyncpa [#allocation7], 1 }
 0xb13   :  { %4979 = vsyncpa [#allocation7 + $0x1], 1 }

</bundles_post_ra>
